<compile_context>
chip_gen: v5e
topology: v5e:2x2
jax: 0.10.0
libtpu: 0.0.40
codegen_flags: <defaults>
</compile_context>

<pallas_src>
import functools

import jax
import jax.numpy as jnp
from jax.experimental import pallas as pl
from jax.experimental.pallas import tpu as pltpu

EPS = 1e-5  # nn.LayerNorm default


def _round_up(x, m):
    return ((x + m - 1) // m) * m


def _layernorm(x, gamma, beta):
    mu = jnp.mean(x, axis=-1, keepdims=True)
    var = jnp.mean((x - mu) ** 2, axis=-1, keepdims=True)
    return (x - mu) * jax.lax.rsqrt(var + EPS) * gamma + beta


# ---------------------------------------------------------------------------
# Fused new_encoder kernel: one grid step == TB news items, all tensors kept
# in a lane-dense (rows = items, lanes = E*feature) 2-D layout.
# ---------------------------------------------------------------------------
def new_encoder_kernel(x_ref, w1_ref, w2_ref, bg_ref, g3_ref, b3_ref,
                       s_ref, w3_ref, ba_ref, q_ref, sq_ref, fold_ref,
                       g4_ref, b4_ref, out_ref):
    f32 = jnp.float32
    adim = fold_ref.shape[1]

    # Hoisted single reads (parameters are resident across grid steps).
    x = x_ref[...]            # (TB, E*D)
    w1 = w1_ref[...]          # (E*D, E*D)   = kron(A^T, I_D)
    w2 = w2_ref[...]          # (E*D, E*ADIM)= block-diag(Wg)
    bg = bg_ref[...]          # (1, E*ADIM)
    g3 = g3_ref[...]          # (1, E*ADIM)
    b3 = b3_ref[...]          # (1, E*ADIM)
    savg = s_ref[...]         # (E*ADIM, E*ADIM) block-averaging matrix
    w3 = w3_ref[...]          # (E*ADIM, E*Q)  = block-diag(Wa)
    ba = ba_ref[...]          # (1, E*Q)
    qv = q_ref[...]           # (1, E*Q)
    sumq = sq_ref[...]        # (E*Q, E*ADIM)  block-ones (sum over q per entity)
    folde = fold_ref[...]     # (E*ADIM, ADIM) stacked identities (sum over e)
    g4 = g4_ref[...]          # (ADIM, 1)
    b4 = b4_ref[...]          # (ADIM, 1)

    def mm(a, b):
        return jnp.dot(a, b, preferred_element_type=f32)

    # ---- GCN: relu( (A @ X) Wg + bg ), as two lane-dense 2-D matmuls ----
    h = mm(x, w1)                                    # (TB, E*D)
    g = jnp.maximum(mm(h, w2) + bg, 0.0)             # (TB, E*ADIM)
    # dropout (p=0.2) skipped: eval mode

    # ---- norm3: per-entity LayerNorm over each ADIM chunk.  Segmented lane
    #      reductions done on the (idle) MXU via the block-averaging matrix.
    mu = mm(g, savg)                                 # per-chunk mean, broadcast
    c = g - mu
    var = mm(c * c, savg)                            # per-chunk variance, broadcast
    g = c * jax.lax.rsqrt(var + EPS) * g3 + b3       # (TB, E*ADIM)

    # ---- additive attention over the entity chunks ----
    t = jnp.tanh(mm(g, w3) + ba)                     # (TB, E*Q)
    sb = mm(t * qv, sumq)                            # (TB, E*ADIM): s[b,e] per lane
    m = jnp.max(sb, axis=-1, keepdims=True)          # = max_e s[b,e]
    p = jnp.exp(sb - m)
    denom = jnp.sum(p, axis=-1, keepdims=True)       # = ADIM * softmax denominator
    w = p * (jnp.float32(adim) / denom)              # softmax weight per lane (exact)
    rep = mm(w * g, folde)                           # (TB, ADIM): sum_e w[b,e] g[b,e,:]
    # dropout skipped: eval mode

    # ---- norm4 on the transposed (lane-dense) block; unmasked stores ----
    rep_t = rep.T                                    # (ADIM, TB)
    mu4 = jnp.mean(rep_t, axis=0, keepdims=True)
    var4 = jnp.mean((rep_t - mu4) ** 2, axis=0, keepdims=True)
    out_ref[...] = (rep_t - mu4) * jax.lax.rsqrt(var4 + EPS) * g4 + b4


# ---------------------------------------------------------------------------
# One-time folding of the PyTorch-style parameters into the structured,
# lane-dense weight matrices consumed by the kernel (plain JAX, tiny).
# ---------------------------------------------------------------------------
def fold_params(p, e, d):
    f32 = jnp.float32
    adim = p["wg"].shape[1]
    qdim = p["wa"].shape[1]
    I_d = jnp.eye(d, dtype=f32)
    I_e = jnp.eye(e, dtype=f32)
    return {
        "w1":   jnp.kron(p["A"].astype(f32).T, I_d),                    # (E*D, E*D)
        "w2":   jnp.kron(I_e, p["wg"].astype(f32)),                     # (E*D, E*ADIM)
        "bg":   jnp.tile(p["bg"].astype(f32).reshape(1, -1), (1, e)),   # (1, E*ADIM)
        "g3":   jnp.tile(p["g3"].astype(f32).reshape(1, -1), (1, e)),
        "b3":   jnp.tile(p["b3"].astype(f32).reshape(1, -1), (1, e)),
        "S":    jnp.kron(I_e, jnp.full((adim, adim), 1.0 / adim, f32)), # (E*ADIM, E*ADIM)
        "w3":   jnp.kron(I_e, p["wa"].astype(f32)),                     # (E*ADIM, E*Q)
        "ba":   jnp.tile(p["ba"].astype(f32).reshape(1, -1), (1, e)),   # (1, E*Q)
        "q":    jnp.tile(p["q"].astype(f32).reshape(1, -1), (1, e)),    # (1, E*Q)
        "sumq": jnp.kron(I_e, jnp.ones((qdim, adim), f32)),             # (E*Q, E*ADIM)
        "fold": jnp.tile(jnp.eye(adim, dtype=f32), (e, 1)),             # (E*ADIM, ADIM)
        "g4":   p["g4"].astype(f32).reshape(-1, 1),                     # (ADIM, 1)
        "b4":   p["b4"].astype(f32).reshape(-1, 1),                     # (ADIM, 1)
    }


def _choose_tb(n, block_items):
    """Per-step item count: multiple of 128 (lane-dense output), <= block_items,
    chosen to minimize padding when several grid steps are needed."""
    block_items = max(128, _round_up(block_items, 128))
    n128 = _round_up(max(n, 1), 128)
    if n128 <= block_items:
        return n128
    steps = -(-n128 // block_items)
    return _round_up(-(-n128 // steps), 128)


def new_encoder_forward(entity_embedding, fused, *, block_items=2048,
                        input_bf16=False):
    """entity_embedding: (N, E, D) -> (N, ADIM)."""
    n, e, d = entity_embedding.shape
    ed = e * d
    adim = fused["fold"].shape[1]

    # Lane-dense input: fold (E, D) into one flat lane axis in the wrapper so
    # the kernel never reshapes across (8,128) tile boundaries.
    x = entity_embedding.reshape(n, ed).astype(jnp.float32)
    w1 = fused["w1"]
    if input_bf16:
        # Optional: halve the only large HBM stream (f32 accumulation inside).
        x = x.astype(jnp.bfloat16)
        w1 = w1.astype(jnp.bfloat16)

    tb = _choose_tb(n, block_items)
    n_pad = _round_up(n, tb)
    if n_pad != n:
        x = jnp.pad(x, ((0, n_pad - n), (0, 0)))   # zero items: independent rows,
                                                   # finite through LN, sliced off.

    def const_spec(arr):
        nd = arr.ndim
        return pl.BlockSpec(arr.shape, lambda i, _nd=nd: (0,) * _nd)

    operands = [x, w1, fused["w2"], fused["bg"], fused["g3"], fused["b3"],
                fused["S"], fused["w3"], fused["ba"], fused["q"],
                fused["sumq"], fused["fold"], fused["g4"], fused["b4"]]

    in_specs = [pl.BlockSpec((tb, ed), lambda i: (i, 0))] + \
               [const_spec(a) for a in operands[1:]]
    # If a trace shows the X DMA exposed, bump in_specs[0] to
    # pipeline_mode=pl.Buffered(3).

    out_t = pl.pallas_call(
        new_encoder_kernel,
        out_shape=jax.ShapeDtypeStruct((adim, n_pad), jnp.float32),
        grid=(n_pad // tb,),
        in_specs=in_specs,
        out_specs=pl.BlockSpec((adim, tb), lambda i: (0, i)),
        compiler_params=pltpu.CompilerParams(
            dimension_semantics=("parallel",),
            # Above the 16/32 MiB scoped defaults (v5e/v6e-v7x), below v7x's
            # 64 MiB physical VMEM.
            vmem_limit_bytes=48 * 1024 * 1024),
    )(*operands)

    # (ADIM, N_pad) -> (N, ADIM): pure layout plumbing in plain JAX.
    return out_t[:, :n].T


# ---------------------------------------------------------------------------
# Pure-JAX reference (same math, f32 throughout) for a sanity check.
# ---------------------------------------------------------------------------
def new_encoder_reference(x, p):
    h = jnp.einsum("ef,bfd->bed", p["A"], x)
    h = jnp.maximum(jnp.einsum("bed,da->bea", h, p["wg"]) + p["bg"], 0.0)
    h = _layernorm(h, p["g3"], p["b3"])
    t = jnp.tanh(jnp.einsum("bea,aq->beq", h, p["wa"]) + p["ba"])
    s = jnp.sum(t * p["q"], axis=-1)
    w = jax.nn.softmax(s, axis=-1)
    rep = jnp.sum(w[..., None] * h, axis=1)
    return _layernorm(rep, p["g4"], p["b4"])


# ---------------------------------------------------------------------------
# Deterministic synthetic parameters (shapes follow new_encoder.__init__)
# ---------------------------------------------------------------------------
def init_params(key, e, d, adim, qdim):
    ks = jax.random.split(key, 4)
    return {
        "A":  jax.random.normal(ks[0], (e, e), jnp.float32) * 0.1,
        "wg": jax.random.normal(ks[1], (d, adim), jnp.float32) * 0.1,
        "bg": jnp.zeros((1, adim), jnp.float32),
        "g3": jnp.ones((1, adim), jnp.float32),
        "b3": jnp.zeros((1, adim), jnp.float32),
        "wa": jax.random.normal(ks[2], (adim, qdim), jnp.float32) * 0.1,
        "ba": jnp.zeros((1, qdim), jnp.float32),
        "q":  jax.random.normal(ks[3], (1, qdim), jnp.float32) * 0.1,
        "g4": jnp.ones((1, adim), jnp.float32),
        "b4": jnp.zeros((1, adim), jnp.float32),
    }


if __name__ == "__main__":
    B = 6      # batch of news items fed to new_encoder.forward
    E = 8      # new_entity_size
    D = 16     # entity_embedding_dim      (E*D = 128 -> fully lane-dense)
    ADIM = 32  # attention_dim             (E*ADIM = 256)
    QDIM = 16  # query_vector_dim          (E*QDIM = 128)

    root = jax.random.PRNGKey(0)
    kx, kp = jax.random.split(root)
    entity_embedding = jax.random.normal(kx, (B, E, D), jnp.float32)
    params = init_params(kp, E, D, ADIM, QDIM)
    fused = fold_params(params, E, D)

    out = new_encoder_forward(entity_embedding, fused)
    out = jax.block_until_ready(out)
    assert out.shape == (B, ADIM) and out.dtype == jnp.float32
    assert bool(jnp.all(jnp.isfinite(out)))

    ref = new_encoder_reference(entity_embedding, params)
    assert bool(jnp.allclose(out, ref, atol=2e-2, rtol=2e-2))

    print("KERNEL_OK")
</pallas_src>

<mosaic_0001>
module attributes {stable_mosaic.version = 11 : i64} {
  func.func @new_encoder_kernel(%arg0: i32, %arg1: memref<128x128xf32, #tpu.memory_space<vmem>>, %arg2: memref<128x128xf32, #tpu.memory_space<vmem>>, %arg3: memref<128x256xf32, #tpu.memory_space<vmem>>, %arg4: memref<1x256xf32, #tpu.memory_space<vmem>>, %arg5: memref<1x256xf32, #tpu.memory_space<vmem>>, %arg6: memref<1x256xf32, #tpu.memory_space<vmem>>, %arg7: memref<256x256xf32, #tpu.memory_space<vmem>>, %arg8: memref<256x128xf32, #tpu.memory_space<vmem>>, %arg9: memref<1x128xf32, #tpu.memory_space<vmem>>, %arg10: memref<1x128xf32, #tpu.memory_space<vmem>>, %arg11: memref<128x256xf32, #tpu.memory_space<vmem>>, %arg12: memref<256x32xf32, #tpu.memory_space<vmem>>, %arg13: memref<32x1xf32, #tpu.memory_space<vmem>>, %arg14: memref<32x1xf32, #tpu.memory_space<vmem>>, %arg15: memref<32x128xf32, #tpu.memory_space<vmem>>) attributes {dimension_semantics = [#tpu.dimension_semantics<parallel>], iteration_bounds = array<i64: 1>, scalar_prefetch = 0 : i64, scratch_operands = 0 : i64, tpu.core_type = #tpu.core_type<tc>, window_params = [{transform_indices = @transform_0, window_bounds = array<i64: 128, 128>}, {pipeline_mode = #tpu.pipeline_mode<synchronous>, transform_indices = @transform_1, window_bounds = array<i64: 128, 128>}, {pipeline_mode = #tpu.pipeline_mode<synchronous>, transform_indices = @transform_2, window_bounds = array<i64: 128, 256>}, {pipeline_mode = #tpu.pipeline_mode<synchronous>, transform_indices = @transform_3, window_bounds = array<i64: 1, 256>}, {pipeline_mode = #tpu.pipeline_mode<synchronous>, transform_indices = @transform_4, window_bounds = array<i64: 1, 256>}, {pipeline_mode = #tpu.pipeline_mode<synchronous>, transform_indices = @transform_5, window_bounds = array<i64: 1, 256>}, {pipeline_mode = #tpu.pipeline_mode<synchronous>, transform_indices = @transform_6, window_bounds = array<i64: 256, 256>}, {pipeline_mode = #tpu.pipeline_mode<synchronous>, transform_indices = @transform_7, window_bounds = array<i64: 256, 128>}, {pipeline_mode = #tpu.pipeline_mode<synchronous>, transform_indices = @transform_8, window_bounds = array<i64: 1, 128>}, {pipeline_mode = #tpu.pipeline_mode<synchronous>, transform_indices = @transform_9, window_bounds = array<i64: 1, 128>}, {pipeline_mode = #tpu.pipeline_mode<synchronous>, transform_indices = @transform_10, window_bounds = array<i64: 128, 256>}, {pipeline_mode = #tpu.pipeline_mode<synchronous>, transform_indices = @transform_11, window_bounds = array<i64: 256, 32>}, {pipeline_mode = #tpu.pipeline_mode<synchronous>, transform_indices = @transform_12, window_bounds = array<i64: 32, 1>}, {pipeline_mode = #tpu.pipeline_mode<synchronous>, transform_indices = @transform_13, window_bounds = array<i64: 32, 1>}, {transform_indices = @transform_14, window_bounds = array<i64: 32, 128>}]} {
    %c0 = arith.constant 0 : index
    %c0_0 = arith.constant 0 : index
    %0 = vector.load %arg1[%c0, %c0_0] : memref<128x128xf32, #tpu.memory_space<vmem>>, vector<128x128xf32>
    %c0_1 = arith.constant 0 : index
    %c0_2 = arith.constant 0 : index
    %1 = vector.load %arg2[%c0_1, %c0_2] : memref<128x128xf32, #tpu.memory_space<vmem>>, vector<128x128xf32>
    %c0_3 = arith.constant 0 : index
    %c0_4 = arith.constant 0 : index
    %2 = vector.load %arg3[%c0_3, %c0_4] : memref<128x256xf32, #tpu.memory_space<vmem>>, vector<128x256xf32>
    %c0_5 = arith.constant 0 : index
    %c0_6 = arith.constant 0 : index
    %3 = vector.load %arg4[%c0_5, %c0_6] : memref<1x256xf32, #tpu.memory_space<vmem>>, vector<1x256xf32>
    %c0_7 = arith.constant 0 : index
    %c0_8 = arith.constant 0 : index
    %4 = vector.load %arg5[%c0_7, %c0_8] : memref<1x256xf32, #tpu.memory_space<vmem>>, vector<1x256xf32>
    %c0_9 = arith.constant 0 : index
    %c0_10 = arith.constant 0 : index
    %5 = vector.load %arg6[%c0_9, %c0_10] : memref<1x256xf32, #tpu.memory_space<vmem>>, vector<1x256xf32>
    %c0_11 = arith.constant 0 : index
    %c0_12 = arith.constant 0 : index
    %6 = vector.load %arg7[%c0_11, %c0_12] : memref<256x256xf32, #tpu.memory_space<vmem>>, vector<256x256xf32>
    %c0_13 = arith.constant 0 : index
    %c0_14 = arith.constant 0 : index
    %7 = vector.load %arg8[%c0_13, %c0_14] : memref<256x128xf32, #tpu.memory_space<vmem>>, vector<256x128xf32>
    %c0_15 = arith.constant 0 : index
    %c0_16 = arith.constant 0 : index
    %8 = vector.load %arg9[%c0_15, %c0_16] : memref<1x128xf32, #tpu.memory_space<vmem>>, vector<1x128xf32>
    %c0_17 = arith.constant 0 : index
    %c0_18 = arith.constant 0 : index
    %9 = vector.load %arg10[%c0_17, %c0_18] : memref<1x128xf32, #tpu.memory_space<vmem>>, vector<1x128xf32>
    %c0_19 = arith.constant 0 : index
    %c0_20 = arith.constant 0 : index
    %10 = vector.load %arg11[%c0_19, %c0_20] : memref<128x256xf32, #tpu.memory_space<vmem>>, vector<128x256xf32>
    %c0_21 = arith.constant 0 : index
    %c0_22 = arith.constant 0 : index
    %11 = vector.load %arg12[%c0_21, %c0_22] : memref<256x32xf32, #tpu.memory_space<vmem>>, vector<256x32xf32>
    %c0_23 = arith.constant 0 : index
    %c0_24 = arith.constant 0 : index
    %12 = vector.load %arg13[%c0_23, %c0_24] : memref<32x1xf32, #tpu.memory_space<vmem>>, vector<32x1xf32>
    %c0_25 = arith.constant 0 : index
    %c0_26 = arith.constant 0 : index
    %13 = vector.load %arg14[%c0_25, %c0_26] : memref<32x1xf32, #tpu.memory_space<vmem>>, vector<32x1xf32>
    %cst = arith.constant dense<0.000000e+00> : vector<128x128xf32>
    %14 = tpu.matmul %0, %1, %cst {dimension_numbers = #tpu.dot_dimension_numbers<[1], [0], [0], [1], [0, 0, 1, 1], [], []>} : vector<128x128xf32>, vector<128x128xf32>, vector<128x128xf32> -> vector<128x128xf32>
    %cst_27 = arith.constant dense<0.000000e+00> : vector<128x256xf32>
    %15 = tpu.matmul %14, %2, %cst_27 {dimension_numbers = #tpu.dot_dimension_numbers<[1], [0], [0], [1], [0, 0, 1, 1], [], []>} : vector<128x128xf32>, vector<128x256xf32>, vector<128x256xf32> -> vector<128x256xf32>
    %16 = vector.broadcast %3 : vector<1x256xf32> to vector<128x256xf32>
    %17 = arith.addf %15, %16 : vector<128x256xf32>
    %cst_28 = arith.constant 0.000000e+00 : f32
    %18 = vector.broadcast %cst_28 : f32 to vector<128x256xf32>
    %19 = arith.maximumf %17, %18 : vector<128x256xf32>
    %cst_29 = arith.constant dense<0.000000e+00> : vector<128x256xf32>
    %20 = tpu.matmul %19, %6, %cst_29 {dimension_numbers = #tpu.dot_dimension_numbers<[1], [0], [0], [1], [0, 0, 1, 1], [], []>} : vector<128x256xf32>, vector<256x256xf32>, vector<128x256xf32> -> vector<128x256xf32>
    %21 = arith.subf %19, %20 : vector<128x256xf32>
    %22 = arith.mulf %21, %21 : vector<128x256xf32>
    %cst_30 = arith.constant dense<0.000000e+00> : vector<128x256xf32>
    %23 = tpu.matmul %22, %6, %cst_30 {dimension_numbers = #tpu.dot_dimension_numbers<[1], [0], [0], [1], [0, 0, 1, 1], [], []>} : vector<128x256xf32>, vector<256x256xf32>, vector<128x256xf32> -> vector<128x256xf32>
    %cst_31 = arith.constant 9.99999974E-6 : f32
    %24 = vector.broadcast %cst_31 : f32 to vector<128x256xf32>
    %25 = arith.addf %23, %24 : vector<128x256xf32>
    %26 = math.rsqrt %25 : vector<128x256xf32>
    %27 = arith.mulf %21, %26 : vector<128x256xf32>
    %28 = vector.broadcast %4 : vector<1x256xf32> to vector<128x256xf32>
    %29 = arith.mulf %27, %28 : vector<128x256xf32>
    %30 = vector.broadcast %5 : vector<1x256xf32> to vector<128x256xf32>
    %31 = arith.addf %29, %30 : vector<128x256xf32>
    %cst_32 = arith.constant dense<0.000000e+00> : vector<128x128xf32>
    %32 = tpu.matmul %31, %7, %cst_32 {dimension_numbers = #tpu.dot_dimension_numbers<[1], [0], [0], [1], [0, 0, 1, 1], [], []>} : vector<128x256xf32>, vector<256x128xf32>, vector<128x128xf32> -> vector<128x128xf32>
    %33 = vector.broadcast %8 : vector<1x128xf32> to vector<128x128xf32>
    %34 = arith.addf %32, %33 : vector<128x128xf32>
    %35 = math.tanh %34 : vector<128x128xf32>
    %36 = vector.broadcast %9 : vector<1x128xf32> to vector<128x128xf32>
    %37 = arith.mulf %35, %36 : vector<128x128xf32>
    %cst_33 = arith.constant dense<0.000000e+00> : vector<128x256xf32>
    %38 = tpu.matmul %37, %10, %cst_33 {dimension_numbers = #tpu.dot_dimension_numbers<[1], [0], [0], [1], [0, 0, 1, 1], [], []>} : vector<128x128xf32>, vector<128x256xf32>, vector<128x256xf32> -> vector<128x256xf32>
    %cst_34 = arith.constant dense<0xFF800000> : vector<128xf32>
    %39 = vector.multi_reduction <maximumf>, %38, %cst_34 [1] : vector<128x256xf32> to vector<128xf32>
    %40 = vector.shape_cast %39 : vector<128xf32> to vector<128x1xf32>
    %41 = vector.broadcast %40 : vector<128x1xf32> to vector<128x256xf32>
    %42 = arith.subf %38, %41 : vector<128x256xf32>
    %43 = math.exp %42 : vector<128x256xf32>
    %cst_35 = arith.constant dense<0.000000e+00> : vector<128xf32>
    %44 = vector.multi_reduction <add>, %43, %cst_35 [1] : vector<128x256xf32> to vector<128xf32>
    %45 = vector.shape_cast %44 : vector<128xf32> to vector<128x1xf32>
    %cst_36 = arith.constant 3.200000e+01 : f32
    %46 = vector.broadcast %cst_36 : f32 to vector<128x1xf32>
    %47 = arith.divf %46, %45 : vector<128x1xf32>
    %48 = vector.broadcast %47 : vector<128x1xf32> to vector<128x256xf32>
    %49 = arith.mulf %43, %48 : vector<128x256xf32>
    %50 = arith.mulf %49, %31 : vector<128x256xf32>
    %cst_37 = arith.constant dense<0.000000e+00> : vector<128x32xf32>
    %51 = tpu.matmul %50, %11, %cst_37 {dimension_numbers = #tpu.dot_dimension_numbers<[1], [0], [0], [1], [0, 0, 1, 1], [], []>} : vector<128x256xf32>, vector<256x32xf32>, vector<128x32xf32> -> vector<128x32xf32>
    %52 = tpu.transpose %51, [1, 0] : vector<128x32xf32> -> vector<32x128xf32>
    %cst_38 = arith.constant dense<0.000000e+00> : vector<128xf32>
    %53 = vector.multi_reduction <add>, %52, %cst_38 [0] : vector<32x128xf32> to vector<128xf32>
    %54 = vector.shape_cast %53 : vector<128xf32> to vector<1x128xf32>
    %cst_39 = arith.constant 3.200000e+01 : f32
    %55 = vector.broadcast %cst_39 : f32 to vector<1x128xf32>
    %56 = arith.divf %54, %55 : vector<1x128xf32>
    %57 = vector.broadcast %56 : vector<1x128xf32> to vector<32x128xf32>
    %58 = arith.subf %52, %57 : vector<32x128xf32>
    %59 = arith.mulf %58, %58 : vector<32x128xf32>
    %cst_40 = arith.constant dense<0.000000e+00> : vector<128xf32>
    %60 = vector.multi_reduction <add>, %59, %cst_40 [0] : vector<32x128xf32> to vector<128xf32>
    %61 = vector.shape_cast %60 : vector<128xf32> to vector<1x128xf32>
    %cst_41 = arith.constant 3.200000e+01 : f32
    %62 = vector.broadcast %cst_41 : f32 to vector<1x128xf32>
    %63 = arith.divf %61, %62 : vector<1x128xf32>
    %64 = vector.broadcast %56 : vector<1x128xf32> to vector<32x128xf32>
    %65 = arith.subf %52, %64 : vector<32x128xf32>
    %cst_42 = arith.constant 9.99999974E-6 : f32
    %66 = vector.broadcast %cst_42 : f32 to vector<1x128xf32>
    %67 = arith.addf %63, %66 : vector<1x128xf32>
    %68 = math.rsqrt %67 : vector<1x128xf32>
    %69 = vector.broadcast %68 : vector<1x128xf32> to vector<32x128xf32>
    %70 = arith.mulf %65, %69 : vector<32x128xf32>
    %71 = vector.broadcast %12 : vector<32x1xf32> to vector<32x128xf32>
    %72 = arith.mulf %70, %71 : vector<32x128xf32>
    %73 = vector.broadcast %13 : vector<32x1xf32> to vector<32x128xf32>
    %74 = arith.addf %72, %73 : vector<32x128xf32>
    %c0_43 = arith.constant 0 : index
    %c0_44 = arith.constant 0 : index
    %75 = vector.load %arg15[%c0_43, %c0_44] : memref<32x128xf32, #tpu.memory_space<vmem>>, vector<32x128xf32>
    tpu.vector_store %arg15[%c0_43, %c0_44], %74 {strides = array<i32>} : memref<32x128xf32, #tpu.memory_space<vmem>>, vector<32x128xf32>,
    return
  }
  func.func @transform_0(%arg0: i32) -> (i32, i32) {
    %c0_i32 = arith.constant 0 : i32
    %c0_i32_0 = arith.constant 0 : i32
    return %arg0, %c0_i32 : i32, i32
  }
  func.func @transform_1(%arg0: i32) -> (i32, i32) {
    %c0_i32 = arith.constant 0 : i32
    %c0_i32_0 = arith.constant 0 : i32
    %c0_i32_1 = arith.constant 0 : i32
    return %c0_i32, %c0_i32_0 : i32, i32
  }
  func.func @transform_2(%arg0: i32) -> (i32, i32) {
    %c0_i32 = arith.constant 0 : i32
    %c0_i32_0 = arith.constant 0 : i32
    %c0_i32_1 = arith.constant 0 : i32
    return %c0_i32, %c0_i32_0 : i32, i32
  }
  func.func @transform_3(%arg0: i32) -> (i32, i32) {
    %c0_i32 = arith.constant 0 : i32
    %c0_i32_0 = arith.constant 0 : i32
    %c0_i32_1 = arith.constant 0 : i32
    return %c0_i32, %c0_i32_0 : i32, i32
  }
  func.func @transform_4(%arg0: i32) -> (i32, i32) {
    %c0_i32 = arith.constant 0 : i32
    %c0_i32_0 = arith.constant 0 : i32
    %c0_i32_1 = arith.constant 0 : i32
    return %c0_i32, %c0_i32_0 : i32, i32
  }
  func.func @transform_5(%arg0: i32) -> (i32, i32) {
    %c0_i32 = arith.constant 0 : i32
    %c0_i32_0 = arith.constant 0 : i32
    %c0_i32_1 = arith.constant 0 : i32
    return %c0_i32, %c0_i32_0 : i32, i32
  }
  func.func @transform_6(%arg0: i32) -> (i32, i32) {
    %c0_i32 = arith.constant 0 : i32
    %c0_i32_0 = arith.constant 0 : i32
    %c0_i32_1 = arith.constant 0 : i32
    return %c0_i32, %c0_i32_0 : i32, i32
  }
  func.func @transform_7(%arg0: i32) -> (i32, i32) {
    %c0_i32 = arith.constant 0 : i32
    %c0_i32_0 = arith.constant 0 : i32
    %c0_i32_1 = arith.constant 0 : i32
    return %c0_i32, %c0_i32_0 : i32, i32
  }
  func.func @transform_8(%arg0: i32) -> (i32, i32) {
    %c0_i32 = arith.constant 0 : i32
    %c0_i32_0 = arith.constant 0 : i32
    %c0_i32_1 = arith.constant 0 : i32
    return %c0_i32, %c0_i32_0 : i32, i32
  }
  func.func @transform_9(%arg0: i32) -> (i32, i32) {
    %c0_i32 = arith.constant 0 : i32
    %c0_i32_0 = arith.constant 0 : i32
    %c0_i32_1 = arith.constant 0 : i32
    return %c0_i32, %c0_i32_0 : i32, i32
  }
  func.func @transform_10(%arg0: i32) -> (i32, i32) {
    %c0_i32 = arith.constant 0 : i32
    %c0_i32_0 = arith.constant 0 : i32
    %c0_i32_1 = arith.constant 0 : i32
    return %c0_i32, %c0_i32_0 : i32, i32
  }
  func.func @transform_11(%arg0: i32) -> (i32, i32) {
    %c0_i32 = arith.constant 0 : i32
    %c0_i32_0 = arith.constant 0 : i32
    %c0_i32_1 = arith.constant 0 : i32
    return %c0_i32, %c0_i32_0 : i32, i32
  }
  func.func @transform_12(%arg0: i32) -> (i32, i32) {
    %c0_i32 = arith.constant 0 : i32
    %c0_i32_0 = arith.constant 0 : i32
    %c0_i32_1 = arith.constant 0 : i32
    return %c0_i32, %c0_i32_0 : i32, i32
  }
  func.func @transform_13(%arg0: i32) -> (i32, i32) {
    %c0_i32 = arith.constant 0 : i32
    %c0_i32_0 = arith.constant 0 : i32
    %c0_i32_1 = arith.constant 0 : i32
    return %c0_i32, %c0_i32_0 : i32, i32
  }
  func.func @transform_14(%arg0: i32) -> (i32, i32) {
    %c0_i32 = arith.constant 0 : i32
    %c0_i32_0 = arith.constant 0 : i32
    return %c0_i32, %arg0 : i32, i32
  }
}

</mosaic_0001>

<bundles_post_ra>
// kernel: tpu_custom_call.1
= control target key start
LH: loop header
LB: loop body
LE: loop exit
PB: predicated region body
PF: predicated region fallthrough
CT: control target
= control target key end

     0   :  { %19 = vsyncpa [#allocation3], 0  ;;  %s4945_s0 = inlined_call_operand.hbm [shape: f32[128,128], index: 0, kind: input, shape index: {}]   ;;  %s4946_s1 = inlined_call_operand.hbm [shape: f32[128,128], index: 1, kind: input, shape index: {}]   ;;  %s4947_s2 = inlined_call_operand.vmem [shape: f32[128,256], index: 2, kind: input, shape index: {}]   ;;  %s4948_s3 = inlined_call_operand.vmem [shape: f32[1,256], index: 3, kind: input, shape index: {}]   ;;  %s4949_s4 = inlined_call_operand.vmem [shape: f32[1,256], index: 4, kind: input, shape index: {}]   ;;  %s4950_s5 = inlined_call_operand.vmem [shape: f32[1,256], index: 5, kind: input, shape index: {}]   ;;  %s4951_s6 = inlined_call_operand.hbm [shape: f32[256,256], index: 6, kind: input, shape index: {}]   ;;  %s4952_s7 = inlined_call_operand.hbm [shape: f32[256,128], index: 7, kind: input, shape index: {}]   ;;  %s4953_s8 = inlined_call_operand.vmem [shape: f32[1,128], index: 8, kind: input, shape index: {}]   ;;  %s4954_s9 = inlined_call_operand.vmem [shape: f32[1,128], index: 9, kind: input, shape index: {}]   ;;  %s4955_s10 = inlined_call_operand.hbm [shape: f32[128,256], index: 10, kind: input, shape index: {}]   ;;  %s4956_s11 = inlined_call_operand.vmem [shape: f32[256,32], index: 11, kind: input, shape index: {}]   ;;  %s4957_s12 = inlined_call_operand.vmem [shape: f32[32,1], index: 12, kind: input, shape index: {}]   ;;  %s4958_s13 = inlined_call_operand.vmem [shape: f32[32,1], index: 13, kind: input, shape index: {}]   ;;  %s4959_s14 = inlined_call_operand.hbm [shape: f32[32,128], index: 14, kind: output, shape index: {}]  }
   0x1   :  { %20 = vsyncpa [#allocation6], 0 }
   0x2   :  { %21 = vsyncpa [#allocation9], 0 }
   0x3   :  { %22 = vsyncpa [#allocation4], 0  ;;  %s40_s15 = sshll.u32 %s4946_s1, 4  ;;  %s3096_s16 = smov [#allocation5]   ;;  %s41_s15 = int_to_ptr.hbm [resolvable:$true] %s40_s15 }
   0x4   :  { %s42_s17 = sshll.u32 %s3096_s16, 4  ;;  %s74_s20 = sshll.u32 %s4952_s7, 4  ;;  %s43_s17 = int_to_ptr.vmem [resolvable:$true] %s42_s17  ;;  %s75_s20 = int_to_ptr.hbm [resolvable:$true] %s74_s20 }
   0x5   :  { %s3097_s21 = smov 128   ;;  %s3098_s22 = smov 8  }
   0x6   :  { %48 = dma.hbm_to_vmem [thread:$0]  %s41_s15, 2048, %s43_s17, [#allocation6], %s3097_s21, %s3097_s21, %s3098_s22  }
   0x7   :  { %s3099_s23 = smov [#allocation8]   ;;  %s27_s1 = sshll.u32 %s4945_s0, 4  ;;  %s28_s1 = int_to_ptr.hbm [resolvable:$true] %s27_s1 }
   0x8   :  { %s76_s24 = sshll.u32 %s3099_s23, 4  ;;  %s61_s28 = sshll.u32 %s4951_s6, 4  ;;  %s77_s24 = int_to_ptr.vmem [resolvable:$true] %s76_s24  ;;  %s62_s28 = int_to_ptr.hbm [resolvable:$true] %s61_s28 }
   0x9   :  { %82 = dma.hbm_to_vmem [thread:$0]  %s75_s20, 4096, %s77_s24, [#allocation9], %s3097_s21, %s3097_s21, %s3098_s22  }
   0xa   :  { %s3100_s29 = smov [#allocation2]   ;;  %s3101_s15 = smov [#allocation7]  }
   0xb   :  { %s29_s30 = sshll.u32 %s3100_s29, 4  ;;  %s63_s0 = sshll.u32 %s3101_s15, 4  ;;  %s30_s30 = int_to_ptr.vmem [resolvable:$true] %s29_s30  ;;  %s64_s0 = int_to_ptr.vmem [resolvable:$true] %s63_s0 }
   0xc   :  { %35 = dma.hbm_to_vmem [thread:$0]  %s28_s1, 2048, %s30_s30, [#allocation3], %s3097_s21, %s3097_s21, %s3098_s22  }
   0xd   :  { %s3102_s16 = smov 256   ;;  %s3103_s17 = smov 16  }
   0xe   :  { %69 = dma.hbm_to_vmem [thread:$0]  %s62_s28, 8192, %s64_s0, [#allocation6], %s3102_s16, %s3102_s16, %s3103_s17  }
   0xf   :  { %s91_s20 = sshll.u32 %s4955_s10, 4  ;;  %s3104_s6 = smov [#allocation10]   ;;  %s92_s20 = int_to_ptr.hbm [resolvable:$true] %s91_s20 }
  0x10   :  { %s93_s23 = sshll.u32 %s3104_s6, 4  ;;  %s94_s23 = int_to_ptr.vmem [resolvable:$true] %s93_s23 }
  0x11   :  { %99 = dma.hbm_to_vmem [thread:$0]  %s92_s20, 4096, %s94_s23, [#allocation9], %s3102_s16, %s3102_s16, %s3103_s17  }
  0x12   :  { %3088 = dma.done.wait [#allocation3], 2048  }
  0x13   :  { %3089 = vsyncadd [#allocation3], 4294965248 }
  0x14   :  { %3090 = dma.done.wait [#allocation6], 10240  }
  0x15   :  { %3091 = vsyncadd [#allocation6], 4294957056 }
  0x16   :  { %3092 = dma.done.wait [#allocation9], 8192  }
  0x17   :  { %3093 = vsyncadd [#allocation9], 4294959104  ;;  %v157_v0 = vld [vmem:[#allocation5 + $0x78] sm:$0xff]  ;;  %v156_v1 = vld [vmem:[#allocation5 + $0x70] sm:$0xff]  ;;  %s2669_s6 = sshll.u32 %s4959_s14, 4  ;;  %s2670_s6 = int_to_ptr.hbm [resolvable:$true] %s2669_s6 }
  0x18   :  { %363 = vmatpush.msra.mxu0 %v157_v0  ;;  %2684 = vmatpush.msra.mxu1 %v157_v0  ;;  %v155_v2 = vld [vmem:[#allocation5 + $0x68] sm:$0xff]  ;;  %v154_v3 = vld [vmem:[#allocation5 + $0x60] sm:$0xff]  ;;  %v153_v4 = vld [vmem:[#allocation5 + $0x58] sm:$0xff] }
  0x19   :  { %2685 = vmatpush.msra.mxu2 %v157_v0  ;;  %2686 = vmatpush.msra.mxu3 %v157_v0  ;;  %v152_v5 = vld [vmem:[#allocation5 + $0x50] sm:$0xff]  ;;  %v151_v6 = vld [vmem:[#allocation5 + $0x48] sm:$0xff]  ;;  %v150_v7 = vld [vmem:[#allocation5 + $0x40] sm:$0xff] }
  0x1a   :  { %364 = vmatpush.msra.mxu0 %v156_v1  ;;  %2687 = vmatpush.msra.mxu1 %v156_v1  ;;  %v149_v8 = vld [vmem:[#allocation5 + $0x38] sm:$0xff]  ;;  %v148_v9 = vld [vmem:[#allocation5 + $0x30] sm:$0xff]  ;;  %v147_v10 = vld [vmem:[#allocation5 + $0x28] sm:$0xff] }
  0x1b   :  { %2688 = vmatpush.msra.mxu2 %v156_v1  ;;  %2689 = vmatpush.msra.mxu3 %v156_v1  ;;  %v146_v11 = vld [vmem:[#allocation5 + $0x20] sm:$0xff]  ;;  %v145_v12 = vld [vmem:[#allocation5 + $0x18] sm:$0xff]  ;;  %v144_v13 = vld [vmem:[#allocation5 + $0x10] sm:$0xff] }
  0x1c   :  { %365 = vmatpush.msra.mxu0 %v155_v2  ;;  %2690 = vmatpush.msra.mxu1 %v155_v2  ;;  %v143_v14 = vld [vmem:[#allocation5 + $0x8] sm:$0xff]  ;;  %v142_v15 = vld [vmem:[#allocation5] sm:$0xff]  ;;  %v188_v20 = vld [vmem:[%s4947_s2 + $0xf0] sm:$0xff] }
  0x1d   :  { %2691 = vmatpush.msra.mxu2 %v155_v2  ;;  %2692 = vmatpush.msra.mxu3 %v155_v2  ;;  %v126_v16 = vld [vmem:[#allocation2] sm:$0xff]  ;;  %v189_v21 = vld [vmem:[%s4947_s2 + $0xf8] sm:$0xff]  ;;  %v187_v23 = vld [vmem:[%s4947_s2 + $0xe8] sm:$0xff] }
  0x1e   :  { %366 = vmatpush.msra.mxu0 %v154_v3  ;;  %2693 = vmatpush.msra.mxu1 %v154_v3  ;;  %v130_v17 = vld [vmem:[#allocation2 + $0x20] sm:$0xff]  ;;  %v184_v24 = vld [vmem:[%s4947_s2 + $0xd0] sm:$0xff]  ;;  %v185_v25 = vld [vmem:[%s4947_s2 + $0xd8] sm:$0xff] }
  0x1f   :  { %2694 = vmatpush.msra.mxu2 %v154_v3  ;;  %2695 = vmatpush.msra.mxu3 %v154_v3  ;;  %v134_v18 = vld [vmem:[#allocation2 + $0x40] sm:$0xff]  ;;  %v127_v26 = vld [vmem:[#allocation2 + $0x8] sm:$0xff]  ;;  %v180_v32 = vld [vmem:[%s4947_s2 + $0xb0] sm:$0xff] }
  0x20   :  { %367 = vmatpush.msra.mxu0 %v153_v4  ;;  %2696 = vmatpush.msra.mxu1 %v153_v4  ;;  %v138_v19 = vld [vmem:[#allocation2 + $0x60] sm:$0xff]  ;;  %v131_v27 = vld [vmem:[#allocation2 + $0x28] sm:$0xff]  ;;  %v181_v33 = vld [vmem:[%s4947_s2 + $0xb8] sm:$0xff] }
  0x21   :  { %2697 = vmatpush.msra.mxu2 %v153_v4  ;;  %2698 = vmatpush.msra.mxu3 %v153_v4  ;;  %v186_v22 = vld [vmem:[%s4947_s2 + $0xe0] sm:$0xff]  ;;  %v183_v29 = vld [vmem:[%s4947_s2 + $0xc8] sm:$0xff]  ;;  %v176_v36 = vld [vmem:[%s4947_s2 + $0x90] sm:$0xff] }
  0x22   :  { %368 = vmatpush.msra.mxu0 %v152_v5  ;;  %2699 = vmatpush.msra.mxu1 %v152_v5  ;;  %v182_v28 = vld [vmem:[%s4947_s2 + $0xc0] sm:$0xff]  ;;  %v135_v30 = vld [vmem:[#allocation2 + $0x48] sm:$0xff]  ;;  %v177_v37 = vld [vmem:[%s4947_s2 + $0x98] sm:$0xff] }
  0x23   :  { %2700 = vmatpush.msra.mxu2 %v152_v5  ;;  %2701 = vmatpush.msra.mxu3 %v152_v5  ;;  %v139_v31 = vld [vmem:[#allocation2 + $0x68] sm:$0xff]  ;;  %v178_v34 = vld [vmem:[%s4947_s2 + $0xa0] sm:$0xff]  ;;  %v128_v38 = vld [vmem:[#allocation2 + $0x10] sm:$0xff] }
  0x24   :  { %369 = vmatpush.msra.mxu0 %v151_v6  ;;  %2702 = vmatpush.msra.mxu1 %v151_v6  ;;  %v179_v35 = vld [vmem:[%s4947_s2 + $0xa8] sm:$0xff]  ;;  %v132_v39 = vld [vmem:[#allocation2 + $0x30] sm:$0xff]  ;;  %v174_v40 = vld [vmem:[%s4947_s2 + $0x80] sm:$0xff] }
  0x25   :  { %2703 = vmatpush.msra.mxu2 %v151_v6  ;;  %2704 = vmatpush.msra.mxu3 %v151_v6  ;;  %v175_v41 = vld [vmem:[%s4947_s2 + $0x88] sm:$0xff]  ;;  %v136_v42 = vld [vmem:[#allocation2 + $0x50] sm:$0xff]  ;;  %v173_v45 = vld [vmem:[%s4947_s2 + $0x78] sm:$0xff] }
  0x26   :  { %370 = vmatpush.msra.mxu0 %v150_v7  ;;  %2705 = vmatpush.msra.mxu1 %v150_v7  ;;  %v140_v43 = vld [vmem:[#allocation2 + $0x70] sm:$0xff]  ;;  %v170_v46 = vld [vmem:[%s4947_s2 + $0x60] sm:$0xff]  ;;  %v171_v47 = vld [vmem:[%s4947_s2 + $0x68] sm:$0xff] }
  0x27   :  { %2706 = vmatpush.msra.mxu2 %v150_v7  ;;  %2707 = vmatpush.msra.mxu3 %v150_v7  ;;  %v172_v44 = vld [vmem:[%s4947_s2 + $0x70] sm:$0xff]  ;;  %v169_v49 = vld [vmem:[%s4947_s2 + $0x58] sm:$0xff]  ;;  %v166_v52 = vld [vmem:[%s4947_s2 + $0x40] sm:$0xff] }
  0x28   :  { %371 = vmatpush.msra.mxu0 %v149_v8  ;;  %2708 = vmatpush.msra.mxu1 %v149_v8  ;;  %v168_v48 = vld [vmem:[%s4947_s2 + $0x50] sm:$0xff]  ;;  %v129_v50 = vld [vmem:[#allocation2 + $0x18] sm:$0xff]  ;;  %v167_v53 = vld [vmem:[%s4947_s2 + $0x48] sm:$0xff] }
  0x29   :  { %2709 = vmatpush.msra.mxu2 %v149_v8  ;;  %2710 = vmatpush.msra.mxu3 %v149_v8  ;;  %v133_v51 = vld [vmem:[#allocation2 + $0x38] sm:$0xff]  ;;  %v164_v56 = vld [vmem:[%s4947_s2 + $0x30] sm:$0xff]  ;;  %v162_v58 = vld [vmem:[%s4947_s2 + $0x20] sm:$0xff] }
  0x2a   :  { %372 = vmatpush.msra.mxu0 %v148_v9  ;;  %2711 = vmatpush.msra.mxu1 %v148_v9  ;;  %v137_v54 = vld [vmem:[#allocation2 + $0x58] sm:$0xff]  ;;  %v163_v59 = vld [vmem:[%s4947_s2 + $0x28] sm:$0xff]  ;;  %v160_v60 = vld [vmem:[%s4947_s2 + $0x10] sm:$0xff] }
  0x2b   :  { %2712 = vmatpush.msra.mxu2 %v148_v9  ;;  %2713 = vmatpush.msra.mxu3 %v148_v9  ;;  %v141_v55 = vld [vmem:[#allocation2 + $0x78] sm:$0xff]  ;;  %v158_v62 = vld [vmem:[%s4947_s2] sm:$0xff]  ;;  %v159_v63 = vld [vmem:[%s4947_s2 + $0x8] sm:$0xff] }
  0x2c   :  { %373 = vmatpush.msra.mxu0 %v147_v10  ;;  %2714 = vmatpush.msra.mxu1 %v147_v10  ;;  %v165_v57 = vld [vmem:[%s4947_s2 + $0x38] sm:$0xff]  ;;  %v3308_v2 = vld [vmem:[#allocation7 + $0x1e8] sm:$0xff] }
  0x2d   :  { %2715 = vmatpush.msra.mxu2 %v147_v10  ;;  %2716 = vmatpush.msra.mxu3 %v147_v10  ;;  %v161_v61 = vld [vmem:[%s4947_s2 + $0x18] sm:$0xff]  ;;  %v3312_v3 = vld [vmem:[#allocation7 + $0xe8] sm:$0xff] }
  0x2e   :  { %374 = vmatpush.msra.mxu0 %v146_v11  ;;  %2717 = vmatpush.msra.mxu1 %v146_v11  ;;  %v3303_v0 = vld [vmem:[#allocation7 + $0x1f8] sm:$0xff]  ;;  %v3320_v7 = vld [vmem:[#allocation7 + $0x1c8] sm:$0xff] }
  0x2f   :  { %2718 = vmatpush.msra.mxu2 %v146_v11  ;;  %2719 = vmatpush.msra.mxu3 %v146_v11  ;;  %v3306_v1 = vld [vmem:[#allocation7 + $0xf8] sm:$0xff]  ;;  %v3324_v9 = vld [vmem:[#allocation7 + $0xc8] sm:$0xff] }
  0x30   :  { %375 = vmatpush.msra.mxu0 %v145_v12  ;;  %2720 = vmatpush.msra.mxu1 %v145_v12  ;;  %v3314_v4 = vld [vmem:[#allocation7 + $0x1d8] sm:$0xff] }
  0x31   :  { %2721 = vmatpush.msra.mxu2 %v145_v12  ;;  %2722 = vmatpush.msra.mxu3 %v145_v12  ;;  %v3318_v6 = vld [vmem:[#allocation7 + $0xd8] sm:$0xff] }
  0x32   :  { %376 = vmatpush.msra.mxu0 %v144_v13  ;;  %2723 = vmatpush.msra.mxu1 %v144_v13  ;;  %v3326_v10 = vld [vmem:[#allocation7 + $0x1b8] sm:$0xff] }
  0x33   :  { %2724 = vmatpush.msra.mxu2 %v144_v13  ;;  %2725 = vmatpush.msra.mxu3 %v144_v13  ;;  %v3330_v12 = vld [vmem:[#allocation7 + $0xb8] sm:$0xff]  ;;  %v3332_v13 = vld [vmem:[#allocation7 + $0x1a8] sm:$0xff] }
  0x34   :  { %377 = vmatpush.msra.mxu0 %v143_v14  ;;  %2726 = vmatpush.msra.mxu1 %v143_v14 }
  0x35   :  { %2727 = vmatpush.msra.mxu2 %v143_v14  ;;  %2728 = vmatpush.msra.mxu3 %v143_v14 }
  0x36   :  { %378 = vmatpush.msra.mxu0 %v142_v15  ;;  %2729 = vmatpush.msra.mxu1 %v142_v15 }
  0x37   :  { %379 = vmatmul.f32.vlgmr.msra.gmra.mxu0 %v126_v16  ;;  %391 = vmatmul.f32.vlgmr.msra.gmra.mxu1 %v130_v17  ;;  %v3336_v16 = vld [vmem:[#allocation7 + $0xa8] sm:$0xff]  ;;  %v3338_v17 = vld [vmem:[#allocation7 + $0x198] sm:$0xff] }
  0x38   :  { %2730 = vmatpush.msra.mxu2 %v142_v15  ;;  %2731 = vmatpush.msra.mxu3 %v142_v15 }
  0x39   :  { %403 = vmatmul.f32.vlgmr.msra.gmra.mxu2 %v134_v18  ;;  %415 = vmatmul.f32.vlgmr.msra.gmra.mxu3 %v138_v19  ;;  %v3342_v18 = vld [vmem:[#allocation7 + $0x98] sm:$0xff]  ;;  %v3344_v19 = vld [vmem:[#allocation7 + $0x188] sm:$0xff] }
  0x3a   :  { %433 = vmatpush.msrb.mxu1 %v188_v20  ;;  %498 = vmatpush.msrb.mxu2 %v189_v21  ;;  %v3348_v21 = vld [vmem:[#allocation7 + $0x88] sm:$0xff] }
  0x3c   :  { %434 = vmatpush.msrb.mxu1 %v186_v22  ;;  %499 = vmatpush.msrb.mxu2 %v187_v23  ;;  %v3350_v22 = vld [vmem:[#allocation7 + $0x178] sm:$0xff] }
  0x3e   :  { %435 = vmatpush.msrb.mxu1 %v184_v24  ;;  %500 = vmatpush.msrb.mxu2 %v185_v25  ;;  %v3354_v24 = vld [vmem:[#allocation7 + $0x78] sm:$0xff]  ;;  %v3356_v25 = vld [vmem:[#allocation7 + $0x168] sm:$0xff] }
  0x3f   :  { %382 = vmatmul.f32.gmra.mxu0 %v127_v26  ;;  %394 = vmatmul.f32.gmra.mxu1 %v131_v27 }
  0x40   :  { %436 = vmatpush.msrb.mxu1 %v182_v28  ;;  %501 = vmatpush.msrb.mxu2 %v183_v29  ;;  %v3360_v28 = vld [vmem:[#allocation7 + $0x68] sm:$0xff]  ;;  %v3362_v29 = vld [vmem:[#allocation7 + $0x158] sm:$0xff] }
  0x41   :  { %406 = vmatmul.f32.gmra.mxu2 %v135_v30  ;;  %418 = vmatmul.f32.gmra.mxu3 %v139_v31  ;;  %v3366_v30 = vld [vmem:[#allocation7 + $0x58] sm:$0xff]  ;;  %v3368_v31 = vld [vmem:[#allocation7 + $0xf0] sm:$0xff] }
  0x42   :  { %437 = vmatpush.msrb.mxu1 %v180_v32  ;;  %502 = vmatpush.msrb.mxu2 %v181_v33  ;;  %v3370_v32 = vld [vmem:[#allocation7 + $0x148] sm:$0xff] }
  0x43   :  { %595 = vmatpush.msrb.mxu3 %v3368_v31 }
  0x44   :  { %438 = vmatpush.msrb.mxu1 %v178_v34  ;;  %503 = vmatpush.msrb.mxu2 %v179_v35  ;;  %v3374_v34 = vld [vmem:[#allocation7 + $0xe0] sm:$0xff]  ;;  %v3377_v35 = vld [vmem:[#allocation7 + $0xd0] sm:$0xff] }
  0x45   :  { %596 = vmatpush.msrb.mxu3 %v3374_v34 }
  0x46   :  { %439 = vmatpush.msrb.mxu1 %v176_v36  ;;  %504 = vmatpush.msrb.mxu2 %v177_v37  ;;  %v3381_v36 = vld [vmem:[#allocation7 + $0xc0] sm:$0xff]  ;;  %v3383_v37 = vld [vmem:[#allocation7 + $0x1f0] sm:$0xff] }
  0x47   :  { %385 = vmatmul.f32.gmra.mxu0 %v128_v38  ;;  %397 = vmatmul.f32.gmra.mxu1 %v132_v39  ;;  %v3385_v38 = vld [vmem:[#allocation7 + $0x48] sm:$0xff]  ;;  %v3389_v39 = vld [vmem:[#allocation7 + $0xb0] sm:$0xff] }
  0x48   :  { %440 = vmatpush.msrb.mxu1 %v174_v40  ;;  %505 = vmatpush.msrb.mxu2 %v175_v41  ;;  %v3391_v40 = vld [vmem:[#allocation7 + $0x1e0] sm:$0xff]  ;;  %v3393_v41 = vld [vmem:[#allocation7 + $0x138] sm:$0xff] }
  0x49   :  { %409 = vmatmul.f32.gmra.mxu2 %v136_v42  ;;  %421 = vmatmul.f32.gmra.mxu3 %v140_v43  ;;  %v3397_v42 = vld [vmem:[#allocation7 + $0xa0] sm:$0xff]  ;;  %v3399_v43 = vld [vmem:[#allocation7 + $0x1d0] sm:$0xff] }
  0x4a   :  { %441 = vmatpush.msrb.mxu1 %v172_v44  ;;  %506 = vmatpush.msrb.mxu2 %v173_v45  ;;  %v3403_v45 = vld [vmem:[#allocation7 + $0x90] sm:$0xff] }
  0x4b   :  { %597 = vmatpush.msrb.mxu3 %v3377_v35  ;;  %660 = vmatpush.msrb.mxu0 %v3383_v37 }
  0x4c   :  { %442 = vmatpush.msrb.mxu1 %v170_v46  ;;  %507 = vmatpush.msrb.mxu2 %v171_v47  ;;  %v3405_v46 = vld [vmem:[#allocation7 + $0x1c0] sm:$0xff] }
  0x4d   :  { %598 = vmatpush.msrb.mxu3 %v3381_v36  ;;  %661 = vmatpush.msrb.mxu0 %v3391_v40  ;;  %v3411_v47 = vld [vmem:[#allocation7 + $0x80] sm:$0xff] }
  0x4e   :  { %443 = vmatpush.msrb.mxu1 %v168_v48  ;;  %508 = vmatpush.msrb.mxu2 %v169_v49  ;;  %v3413_v48 = vld [vmem:[#allocation7 + $0x1b0] sm:$0xff]  ;;  %v3415_v49 = vld [vmem:[#allocation7 + $0x38] sm:$0xff] }
  0x4f   :  { %388 = vmatmul.f32.gmra.mxu0 %v129_v50  ;;  %400 = vmatmul.f32.gmra.mxu1 %v133_v51  ;;  %v3419_v50 = vld [vmem:[#allocation7 + $0x70] sm:$0xff]  ;;  %v3421_v51 = vld [vmem:[#allocation7 + $0x1a0] sm:$0xff] }
  0x50   :  { %444 = vmatpush.msrb.mxu1 %v166_v52  ;;  %509 = vmatpush.msrb.mxu2 %v167_v53  ;;  %v3423_v52 = vld [vmem:[#allocation7 + $0x128] sm:$0xff]  ;;  %v3427_v53 = vld [vmem:[#allocation7 + $0x60] sm:$0xff] }
  0x51   :  { %412 = vmatmul.f32.gmra.mxu2 %v137_v54  ;;  %424 = vmatmul.f32.gmra.mxu3 %v141_v55  ;;  %v3429_v54 = vld [vmem:[#allocation7 + $0x190] sm:$0xff] }
  0x52   :  { %445 = vmatpush.msrb.mxu1 %v164_v56  ;;  %510 = vmatpush.msrb.mxu2 %v165_v57  ;;  %v3433_v55 = vld [vmem:[#allocation7 + $0x50] sm:$0xff]  ;;  %v3435_v56 = vld [vmem:[#allocation7 + $0x180] sm:$0xff] }
  0x53   :  { %599 = vmatpush.msrb.mxu3 %v3389_v39  ;;  %662 = vmatpush.msrb.mxu0 %v3399_v43 }
  0x54   :  { %446 = vmatpush.msrb.mxu1 %v162_v58  ;;  %511 = vmatpush.msrb.mxu2 %v163_v59  ;;  %v3441_v59 = vld [vmem:[#allocation7 + $0x40] sm:$0xff] }
  0x55   :  { %600 = vmatpush.msrb.mxu3 %v3397_v42  ;;  %663 = vmatpush.msrb.mxu0 %v3405_v46 }
  0x56   :  { %447 = vmatpush.msrb.mxu1 %v160_v60  ;;  %512 = vmatpush.msrb.mxu2 %v161_v61  ;;  %v3443_v60 = vld [vmem:[#allocation7 + $0x170] sm:$0xff]  ;;  %v3445_v61 = vld [vmem:[#allocation7 + $0x28] sm:$0xff] }
  0x57   :  { %601 = vmatpush.msrb.mxu3 %v3403_v45  ;;  %664 = vmatpush.msrb.mxu0 %v3413_v48 }
  0x58   :  { %448 = vmatpush.msrb.mxu1 %v158_v62  ;;  %513 = vmatpush.msrb.mxu2 %v159_v63  ;;  %v3449_v62 = vld [vmem:[#allocation7 + $0x30] sm:$0xff]  ;;  %v3451_v63 = vld [vmem:[#allocation7 + $0x160] sm:$0xff] }
  0x59   :  { %602 = vmatpush.msrb.mxu3 %v3411_v47  ;;  %665 = vmatpush.msrb.mxu0 %v3421_v51 }
  0x5a   :  { %790 = vmatpush.msra.mxu2 %v3303_v0  ;;  %725 = vmatpush.msra.mxu1 %v3306_v1 }
  0x5b   :  { %603 = vmatpush.msrb.mxu3 %v3419_v50  ;;  %666 = vmatpush.msrb.mxu0 %v3429_v54 }
  0x5c   :  { %791 = vmatpush.msra.mxu2 %v3308_v2  ;;  %726 = vmatpush.msra.mxu1 %v3312_v3 }
  0x5d   :  { %604 = vmatpush.msrb.mxu3 %v3427_v53  ;;  %667 = vmatpush.msrb.mxu0 %v3435_v56 }
  0x5e   :  { %792 = vmatpush.msra.mxu2 %v3314_v4  ;;  %727 = vmatpush.msra.mxu1 %v3318_v6 }
  0x5f   :  { %605 = vmatpush.msrb.mxu3 %v3433_v55  ;;  %668 = vmatpush.msrb.mxu0 %v3443_v60 }
  0x60   :  { %793 = vmatpush.msra.mxu2 %v3320_v7  ;;  %728 = vmatpush.msra.mxu1 %v3324_v9 }
  0x61   :  { %606 = vmatpush.msrb.mxu3 %v3441_v59  ;;  %669 = vmatpush.msrb.mxu0 %v3451_v63 }
  0x62   :  { %794 = vmatpush.msra.mxu2 %v3326_v10  ;;  %729 = vmatpush.msra.mxu1 %v3330_v12 }
  0x63   :  { %607 = vmatpush.msrb.mxu3 %v3449_v62 }
  0x64   :  { %795 = vmatpush.msra.mxu2 %v3332_v13  ;;  %730 = vmatpush.msra.mxu1 %v3336_v16 }
  0x66   :  { %796 = vmatpush.msra.mxu2 %v3338_v17  ;;  %731 = vmatpush.msra.mxu1 %v3342_v18 }
  0x68   :  { %797 = vmatpush.msra.mxu2 %v3344_v19  ;;  %732 = vmatpush.msra.mxu1 %v3348_v21 }
  0x6a   :  { %798 = vmatpush.msra.mxu2 %v3350_v22  ;;  %733 = vmatpush.msra.mxu1 %v3354_v24 }
  0x6c   :  { %799 = vmatpush.msra.mxu2 %v3356_v25  ;;  %734 = vmatpush.msra.mxu1 %v3360_v28 }
  0x6e   :  { %800 = vmatpush.msra.mxu2 %v3362_v29  ;;  %735 = vmatpush.msra.mxu1 %v3366_v30 }
  0x70   :  { %801 = vmatpush.msra.mxu2 %v3370_v32  ;;  %736 = vmatpush.msra.mxu1 %v3385_v38 }
  0x72   :  { %802 = vmatpush.msra.mxu2 %v3393_v41  ;;  %737 = vmatpush.msra.mxu1 %v3415_v49 }
  0x74   :  { %803 = vmatpush.msra.mxu2 %v3423_v52  ;;  %738 = vmatpush.msra.mxu1 %v3445_v61 }
  0xb4   :  { %v380_v5 = vpop.f32.mrf.mxu0  ;;  %v392_v15 = vpop.f32.mrf.mxu1 }
  0xb5   :  { %449 = vmatmul.f32.vlgmr.msrb.gmra.mxu1 %v380_v5  ;;  %514 = vmatmul.f32.vlgmr.msrb.gmra.mxu2 %v380_v5  ;;  %v3453_v5 = vld [vmem:[#allocation7 + $0x118] sm:$0xff] }
  0xb6   :  { %804 = vmatpush.msra.mxu2 %v3453_v5 }
  0xbc   :  { %v383_v8 = vpop.f32.mrf.mxu0  ;;  %v395_v20 = vpop.f32.mrf.mxu1 }
  0xbd   :  { %452 = vmatmul.f32.gmra.mxu1 %v383_v8  ;;  %517 = vmatmul.f32.gmra.mxu2 %v383_v8  ;;  %v404_v27 = vpop.f32.mrf.mxu2  ;;  %v416_v58 = vpop.f32.mrf.mxu3  ;;  %v3457_v8 = vld [vmem:[#allocation7 + $0x20] sm:$0xff] }
  0xbe   :  { %608 = vmatpush.msrb.mxu3 %v3457_v8 }
  0xc4   :  { %v386_v11 = vpop.f32.mrf.mxu0  ;;  %v398_v23 = vpop.f32.mrf.mxu1 }
  0xc5   :  { %455 = vmatmul.f32.gmra.mxu1 %v386_v11  ;;  %520 = vmatmul.f32.gmra.mxu2 %v386_v11  ;;  %v407_v33 = vpop.f32.mrf.mxu2  ;;  %v3459_v11 = vld [vmem:[#allocation7 + $0x150] sm:$0xff] }
  0xc6   :  { %670 = vmatpush.msrb.mxu0 %v3459_v11 }
  0xcc   :  { %v389_v14 = vpop.f32.mrf.mxu0  ;;  %v401_v26 = vpop.f32.mrf.mxu1 }
  0xcd   :  { %458 = vmatmul.f32.gmra.mxu1 %v389_v14  ;;  %523 = vmatmul.f32.gmra.mxu2 %v389_v14  ;;  %v410_v44 = vpop.f32.mrf.mxu2  ;;  %v3465_v14 = vld [vmem:[#allocation7 + $0x10] sm:$0xff] }
  0xce   :  { %609 = vmatpush.msrb.mxu3 %v3465_v14 }
  0xd5   :  { %461 = vmatmul.f32.gmra.mxu1 %v392_v15  ;;  %526 = vmatmul.f32.gmra.mxu2 %v392_v15  ;;  %v413_v57 = vpop.f32.mrf.mxu2  ;;  %v3467_v15 = vld [vmem:[#allocation7 + $0x140] sm:$0xff] }
  0xd6   :  { %671 = vmatpush.msrb.mxu0 %v3467_v15 }
  0xdd   :  { %464 = vmatmul.f32.gmra.mxu1 %v395_v20  ;;  %529 = vmatmul.f32.gmra.mxu2 %v395_v20  ;;  %v3469_v20 = vld [vmem:[#allocation7 + $0x18] sm:$0xff] }
  0xde   :  { %4979 = vst [vmem:[#allocation16_spill] sm:$0xff] %v3469_v20  ;;  %739 = vmatpush.msra.mxu1 %v3469_v20  ;;  %v3496_v20 = vld [vmem:[#allocation7 + $0x100] sm:$0xff] }
  0xe5   :  { %467 = vmatmul.f32.gmra.mxu1 %v398_v23  ;;  %532 = vmatmul.f32.gmra.mxu2 %v398_v23  ;;  %v3473_v23 = vld [vmem:[#allocation7] sm:$0xff] }
  0xe6   :  { %610 = vmatpush.msrb.mxu3 %v3473_v23 }
  0xe8   :  { %919 = vmatpush.msra.mxu3 %v3368_v31 }
  0xea   :  { %920 = vmatpush.msra.mxu3 %v3374_v34 }
  0xec   :  { %921 = vmatpush.msra.mxu3 %v3377_v35 }
  0xed   :  { %470 = vmatmul.f32.gmra.mxu1 %v401_v26  ;;  %535 = vmatmul.f32.gmra.mxu2 %v401_v26  ;;  %v3475_v26 = vld [vmem:[#allocation7 + $0x130] sm:$0xff] }
  0xee   :  { %672 = vmatpush.msrb.mxu0 %v3475_v26  ;;  %922 = vmatpush.msra.mxu3 %v3381_v36 }
  0xf0   :  { %923 = vmatpush.msra.mxu3 %v3389_v39 }
  0xf2   :  { %924 = vmatpush.msra.mxu3 %v3397_v42 }
  0xf4   :  { %925 = vmatpush.msra.mxu3 %v3403_v45 }
  0xf5   :  { %473 = vmatmul.f32.gmra.mxu1 %v404_v27  ;;  %538 = vmatmul.f32.gmra.mxu2 %v404_v27  ;;  %v3477_v27 = vld [vmem:[#allocation7 + $0x8] sm:$0xff] }
  0xf6   :  { %740 = vmatpush.msra.mxu1 %v3477_v27  ;;  %926 = vmatpush.msra.mxu3 %v3411_v47 }
  0xf8   :  { %1049 = vmatpush.msrb.mxu1 %v3306_v1  ;;  %927 = vmatpush.msra.mxu3 %v3419_v50 }
  0xfa   :  { %1050 = vmatpush.msrb.mxu1 %v3312_v3  ;;  %928 = vmatpush.msra.mxu3 %v3427_v53 }
  0xfc   :  { %1051 = vmatpush.msrb.mxu1 %v3318_v6  ;;  %929 = vmatpush.msra.mxu3 %v3433_v55 }
  0xfd   :  { %476 = vmatmul.f32.gmra.mxu1 %v407_v33  ;;  %541 = vmatmul.f32.gmra.mxu2 %v407_v33  ;;  %v419_v33 = vpop.f32.mrf.mxu3 }
  0xfe   :  { %1052 = vmatpush.msrb.mxu1 %v3324_v9  ;;  %930 = vmatpush.msra.mxu3 %v3441_v59 }
 0x100   :  { %1053 = vmatpush.msrb.mxu1 %v3330_v12  ;;  %931 = vmatpush.msra.mxu3 %v3449_v62 }
 0x102   :  { %1054 = vmatpush.msrb.mxu1 %v3336_v16  ;;  %932 = vmatpush.msra.mxu3 %v3457_v8 }
 0x104   :  { %1055 = vmatpush.msrb.mxu1 %v3342_v18  ;;  %933 = vmatpush.msra.mxu3 %v3465_v14  ;;  %v4980_v18 = vld [vmem:[#allocation16_spill] sm:$0xff] }
 0x105   :  { %479 = vmatmul.f32.gmra.mxu1 %v410_v44  ;;  %544 = vmatmul.f32.gmra.mxu2 %v410_v44  ;;  %v3482_v44 = vld [vmem:[#allocation7 + $0x120] sm:$0xff] }
 0x106   :  { %673 = vmatpush.msrb.mxu0 %v3482_v44  ;;  %1056 = vmatpush.msrb.mxu1 %v3348_v21 }
 0x107   :  { %934 = vmatpush.msra.mxu3 %v3473_v23 }
 0x108   :  { %1057 = vmatpush.msrb.mxu1 %v3354_v24 }
 0x10a   :  { %1058 = vmatpush.msrb.mxu1 %v3360_v28 }
 0x10c   :  { %1059 = vmatpush.msrb.mxu1 %v3366_v30 }
 0x10d   :  { %482 = vmatmul.f32.gmra.mxu1 %v413_v57  ;;  %547 = vmatmul.f32.gmra.mxu2 %v413_v57  ;;  %v3484_v57 = vld [vmem:[#allocation7 + $0x108] sm:$0xff] }
 0x10e   :  { %805 = vmatpush.msra.mxu2 %v3484_v57  ;;  %1060 = vmatpush.msrb.mxu1 %v3385_v38 }
 0x110   :  { %1114 = vmatpush.msrb.mxu2 %v3303_v0  ;;  %v422_v0 = vpop.f32.mrf.mxu3  ;;  %1061 = vmatpush.msrb.mxu1 %v3415_v49 }
 0x112   :  { %1115 = vmatpush.msrb.mxu2 %v3308_v2  ;;  %v190_v2 = vld [vmem:[%s4948_s3] sm:$0x3]  ;;  %1062 = vmatpush.msrb.mxu1 %v3445_v61 }
 0x113   :  { %v3534_v3 = vperm.slane %v190_v2, 0  ;;  %v3551_v9 = vperm.slane %v190_v2, 1 }
 0x114   :  { %1116 = vmatpush.msrb.mxu2 %v3314_v4  ;;  %1063 = vmatpush.msrb.mxu1 %v4980_v18 }
 0x115   :  { %485 = vmatmul.f32.gmra.mxu1 %v416_v58  ;;  %550 = vmatmul.f32.gmra.mxu2 %v416_v58  ;;  %v3490_v58 = vld [vmem:[#allocation7 + $0x110] sm:$0xff] }
 0x116   :  { %674 = vmatpush.msrb.mxu0 %v3490_v58  ;;  %1117 = vmatpush.msrb.mxu2 %v3320_v7 }
 0x117   :  { %1064 = vmatpush.msrb.mxu1 %v3477_v27 }
 0x118   :  { %675 = vmatpush.msrb.mxu0 %v3496_v20  ;;  %1118 = vmatpush.msrb.mxu2 %v3326_v10  ;;  %v425_v1 = vpop.f32.mrf.mxu3 }
 0x11a   :  { %984 = vmatpush.msra.mxu0 %v3383_v37  ;;  %1119 = vmatpush.msrb.mxu2 %v3332_v13 }
 0x11c   :  { %985 = vmatpush.msra.mxu0 %v3391_v40  ;;  %1120 = vmatpush.msrb.mxu2 %v3338_v17 }
 0x11d   :  { %488 = vmatmul.f32.gmra.mxu1 %v419_v33  ;;  %553 = vmatmul.f32.gmra.mxu2 %v419_v33 }
 0x11e   :  { %986 = vmatpush.msra.mxu0 %v3399_v43  ;;  %1121 = vmatpush.msrb.mxu2 %v3344_v19 }
 0x120   :  { %987 = vmatpush.msra.mxu0 %v3405_v46  ;;  %1122 = vmatpush.msrb.mxu2 %v3350_v22 }
 0x122   :  { %988 = vmatpush.msra.mxu0 %v3413_v48  ;;  %1123 = vmatpush.msrb.mxu2 %v3356_v25 }
 0x124   :  { %989 = vmatpush.msra.mxu0 %v3421_v51  ;;  %1124 = vmatpush.msrb.mxu2 %v3362_v29 }
 0x125   :  { %491 = vmatmul.f32.gmra.mxu1 %v422_v0  ;;  %556 = vmatmul.f32.gmra.mxu2 %v422_v0 }
 0x126   :  { %990 = vmatpush.msra.mxu0 %v3429_v54  ;;  %1125 = vmatpush.msrb.mxu2 %v3370_v32 }
 0x128   :  { %991 = vmatpush.msra.mxu0 %v3435_v56  ;;  %1126 = vmatpush.msrb.mxu2 %v3393_v41 }
 0x12a   :  { %992 = vmatpush.msra.mxu0 %v3443_v60  ;;  %1127 = vmatpush.msrb.mxu2 %v3423_v52 }
 0x12c   :  { %993 = vmatpush.msra.mxu0 %v3451_v63  ;;  %1128 = vmatpush.msrb.mxu2 %v3453_v5 }
 0x12d   :  { %494 = vmatmul.f32.gmra.mxu1 %v425_v1  ;;  %559 = vmatmul.f32.gmra.mxu2 %v425_v1 }
 0x12e   :  { %994 = vmatpush.msra.mxu0 %v3459_v11  ;;  %1129 = vmatpush.msrb.mxu2 %v3484_v57 }
 0x130   :  { %995 = vmatpush.msra.mxu0 %v3467_v15 }
 0x132   :  { %v450_v4 = vpop.f32.mrf.mxu1  ;;  %996 = vmatpush.msra.mxu0 %v3475_v26 }
 0x133   :  { %v451_v6 = vadd.f32 %v450_v4, %v3534_v3 }
 0x134   :  { %997 = vmatpush.msra.mxu0 %v3482_v44 }
 0x135   :  { %v3549_v7 = vmax.f32 %v451_v6, 0.0 }
 0x136   :  { %998 = vmatpush.msra.mxu0 %v3490_v58 }
 0x137   :  { %611 = vmatmul.f32.vlgmr.msrb.gmra.mxu3 %v3549_v7  ;;  %741 = vmatmul.f32.vlgmr.msra.gmra.mxu1 %v3549_v7 }
 0x138   :  { %v515_v10 = vpop.f32.mrf.mxu2  ;;  %999 = vmatpush.msra.mxu0 %v3496_v20 }
 0x139   :  { %v516_v12 = vadd.f32 %v515_v10, %v3551_v9 }
 0x13a   :  { %v453_v13 = vpop.f32.mrf.mxu1 }
 0x13b   :  { %v3566_v16 = vmax.f32 %v516_v12, 0.0  ;;  %v454_v17 = vadd.f32 %v453_v13, %v3534_v3 }
 0x13d   :  { %v3572_v19 = vmax.f32 %v454_v17, 0.0  ;;  %676 = vmatmul.f32.vlgmr.msrb.gmra.mxu0 %v3566_v16  ;;  %806 = vmatmul.f32.vlgmr.msra.gmra.mxu2 %v3566_v16 }
 0x13f   :  { %614 = vmatmul.f32.gmra.mxu3 %v3572_v19  ;;  %744 = vmatmul.f32.gmra.mxu1 %v3572_v19 }
 0x140   :  { %v518_v21 = vpop.f32.mrf.mxu2 }
 0x141   :  { %v519_v22 = vadd.f32 %v518_v21, %v3551_v9 }
 0x142   :  { %v456_v24 = vpop.f32.mrf.mxu1 }
 0x143   :  { %v3582_v25 = vmax.f32 %v519_v22, 0.0  ;;  %v457_v28 = vadd.f32 %v456_v24, %v3534_v3 }
 0x145   :  { %v3585_v29 = vmax.f32 %v457_v28, 0.0  ;;  %679 = vmatmul.f32.gmra.mxu0 %v3582_v25  ;;  %809 = vmatmul.f32.gmra.mxu2 %v3582_v25 }
 0x147   :  { %617 = vmatmul.f32.gmra.mxu3 %v3585_v29  ;;  %747 = vmatmul.f32.gmra.mxu1 %v3585_v29 }
 0x148   :  { %v521_v30 = vpop.f32.mrf.mxu2 }
 0x149   :  { %v522_v31 = vadd.f32 %v521_v30, %v3551_v9 }
 0x14a   :  { %v459_v32 = vpop.f32.mrf.mxu1 }
 0x14b   :  { %v3592_v34 = vmax.f32 %v522_v31, 0.0  ;;  %v460_v35 = vadd.f32 %v459_v32, %v3534_v3 }
 0x14d   :  { %v3595_v36 = vmax.f32 %v460_v35, 0.0  ;;  %682 = vmatmul.f32.gmra.mxu0 %v3592_v34  ;;  %812 = vmatmul.f32.gmra.mxu2 %v3592_v34 }
 0x14f   :  { %620 = vmatmul.f32.gmra.mxu3 %v3595_v36  ;;  %750 = vmatmul.f32.gmra.mxu1 %v3595_v36 }
 0x150   :  { %v524_v37 = vpop.f32.mrf.mxu2 }
 0x151   :  { %v525_v38 = vadd.f32 %v524_v37, %v3551_v9 }
 0x152   :  { %v462_v39 = vpop.f32.mrf.mxu1 }
 0x153   :  { %v3602_v40 = vmax.f32 %v525_v38, 0.0  ;;  %v463_v41 = vadd.f32 %v462_v39, %v3534_v3 }
 0x155   :  { %v3605_v42 = vmax.f32 %v463_v41, 0.0  ;;  %685 = vmatmul.f32.gmra.mxu0 %v3602_v40  ;;  %815 = vmatmul.f32.gmra.mxu2 %v3602_v40 }
 0x157   :  { %623 = vmatmul.f32.gmra.mxu3 %v3605_v42  ;;  %753 = vmatmul.f32.gmra.mxu1 %v3605_v42 }
 0x158   :  { %v527_v43 = vpop.f32.mrf.mxu2 }
 0x159   :  { %v528_v45 = vadd.f32 %v527_v43, %v3551_v9 }
 0x15a   :  { %v465_v46 = vpop.f32.mrf.mxu1 }
 0x15b   :  { %v3612_v47 = vmax.f32 %v528_v45, 0.0  ;;  %v466_v48 = vadd.f32 %v465_v46, %v3534_v3 }
 0x15d   :  { %v3615_v49 = vmax.f32 %v466_v48, 0.0  ;;  %688 = vmatmul.f32.gmra.mxu0 %v3612_v47  ;;  %818 = vmatmul.f32.gmra.mxu2 %v3612_v47 }
 0x15f   :  { %626 = vmatmul.f32.gmra.mxu3 %v3615_v49  ;;  %756 = vmatmul.f32.gmra.mxu1 %v3615_v49 }
 0x160   :  { %v530_v50 = vpop.f32.mrf.mxu2 }
 0x161   :  { %v531_v51 = vadd.f32 %v530_v50, %v3551_v9 }
 0x162   :  { %v468_v52 = vpop.f32.mrf.mxu1 }
 0x163   :  { %v3622_v53 = vmax.f32 %v531_v51, 0.0  ;;  %v469_v54 = vadd.f32 %v468_v52, %v3534_v3 }
 0x165   :  { %v3625_v55 = vmax.f32 %v469_v54, 0.0  ;;  %691 = vmatmul.f32.gmra.mxu0 %v3622_v53  ;;  %821 = vmatmul.f32.gmra.mxu2 %v3622_v53 }
 0x167   :  { %629 = vmatmul.f32.gmra.mxu3 %v3625_v55  ;;  %759 = vmatmul.f32.gmra.mxu1 %v3625_v55 }
 0x168   :  { %v533_v56 = vpop.f32.mrf.mxu2 }
 0x169   :  { %v534_v59 = vadd.f32 %v533_v56, %v3551_v9 }
 0x16a   :  { %v471_v60 = vpop.f32.mrf.mxu1 }
 0x16b   :  { %v3632_v61 = vmax.f32 %v534_v59, 0.0  ;;  %v472_v62 = vadd.f32 %v471_v60, %v3534_v3 }
 0x16d   :  { %v3635_v63 = vmax.f32 %v472_v62, 0.0  ;;  %694 = vmatmul.f32.gmra.mxu0 %v3632_v61  ;;  %824 = vmatmul.f32.gmra.mxu2 %v3632_v61 }
 0x16f   :  { %632 = vmatmul.f32.gmra.mxu3 %v3635_v63  ;;  %762 = vmatmul.f32.gmra.mxu1 %v3635_v63 }
 0x170   :  { %v536_v5 = vpop.f32.mrf.mxu2 }
 0x171   :  { %v537_v8 = vadd.f32 %v536_v5, %v3551_v9 }
 0x172   :  { %v474_v11 = vpop.f32.mrf.mxu1 }
 0x173   :  { %v3642_v14 = vmax.f32 %v537_v8, 0.0  ;;  %v475_v15 = vadd.f32 %v474_v11, %v3534_v3 }
 0x175   :  { %v3645_v20 = vmax.f32 %v475_v15, 0.0  ;;  %697 = vmatmul.f32.gmra.mxu0 %v3642_v14  ;;  %827 = vmatmul.f32.gmra.mxu2 %v3642_v14 }
 0x177   :  { %635 = vmatmul.f32.gmra.mxu3 %v3645_v20  ;;  %765 = vmatmul.f32.gmra.mxu1 %v3645_v20 }
 0x178   :  { %v539_v23 = vpop.f32.mrf.mxu2 }
 0x179   :  { %v540_v26 = vadd.f32 %v539_v23, %v3551_v9 }
 0x17a   :  { %v477_v27 = vpop.f32.mrf.mxu1 }
 0x17b   :  { %v3652_v33 = vmax.f32 %v540_v26, 0.0  ;;  %v478_v44 = vadd.f32 %v477_v27, %v3534_v3 }
 0x17d   :  { %v3655_v57 = vmax.f32 %v478_v44, 0.0  ;;  %700 = vmatmul.f32.gmra.mxu0 %v3652_v33  ;;  %830 = vmatmul.f32.gmra.mxu2 %v3652_v33 }
 0x17f   :  { %638 = vmatmul.f32.gmra.mxu3 %v3655_v57  ;;  %768 = vmatmul.f32.gmra.mxu1 %v3655_v57 }
 0x180   :  { %v542_v58 = vpop.f32.mrf.mxu2 }
 0x181   :  { %v543_v0 = vadd.f32 %v542_v58, %v3551_v9 }
 0x182   :  { %v480_v1 = vpop.f32.mrf.mxu1 }
 0x183   :  { %v3662_v2 = vmax.f32 %v543_v0, 0.0  ;;  %v481_v4 = vadd.f32 %v480_v1, %v3534_v3 }
 0x185   :  { %v3665_v6 = vmax.f32 %v481_v4, 0.0  ;;  %703 = vmatmul.f32.gmra.mxu0 %v3662_v2  ;;  %833 = vmatmul.f32.gmra.mxu2 %v3662_v2 }
 0x187   :  { %641 = vmatmul.f32.gmra.mxu3 %v3665_v6  ;;  %771 = vmatmul.f32.gmra.mxu1 %v3665_v6 }
 0x188   :  { %v545_v10 = vpop.f32.mrf.mxu2 }
 0x189   :  { %v546_v12 = vadd.f32 %v545_v10, %v3551_v9 }
 0x18a   :  { %v483_v13 = vpop.f32.mrf.mxu1 }
 0x18b   :  { %v3672_v17 = vmax.f32 %v546_v12, 0.0  ;;  %v484_v18 = vadd.f32 %v483_v13, %v3534_v3 }
 0x18d   :  { %v3675_v21 = vmax.f32 %v484_v18, 0.0  ;;  %706 = vmatmul.f32.gmra.mxu0 %v3672_v17  ;;  %836 = vmatmul.f32.gmra.mxu2 %v3672_v17  ;;  %v272_v18 = vld [vmem:[#allocation8 + $0x78] sm:$0xff] }
 0x18e   :  { %1608 = vmatpush.msrb.mxu3 %v272_v18  ;;  %v286_v18 = vld [vmem:[#allocation8 + $0xe8] sm:$0xff] }
 0x18f   :  { %644 = vmatmul.f32.gmra.mxu3 %v3675_v21  ;;  %774 = vmatmul.f32.gmra.mxu1 %v3675_v21 }
 0x190   :  { %v548_v22 = vpop.f32.mrf.mxu2 }
 0x191   :  { %v549_v24 = vadd.f32 %v548_v22, %v3551_v9 }
 0x192   :  { %v486_v28 = vpop.f32.mrf.mxu1 }
 0x193   :  { %v3682_v30 = vmax.f32 %v549_v24, 0.0  ;;  %v487_v31 = vadd.f32 %v486_v28, %v3534_v3 }
 0x195   :  { %v3685_v32 = vmax.f32 %v487_v31, 0.0  ;;  %709 = vmatmul.f32.gmra.mxu0 %v3682_v30  ;;  %839 = vmatmul.f32.gmra.mxu2 %v3682_v30 }
 0x197   :  { %647 = vmatmul.f32.gmra.mxu3 %v3685_v32  ;;  %777 = vmatmul.f32.gmra.mxu1 %v3685_v32 }
 0x198   :  { %v551_v35 = vpop.f32.mrf.mxu2 }
 0x199   :  { %v552_v37 = vadd.f32 %v551_v35, %v3551_v9 }
 0x19a   :  { %v489_v38 = vpop.f32.mrf.mxu1 }
 0x19b   :  { %v3692_v39 = vmax.f32 %v552_v37, 0.0  ;;  %v490_v41 = vadd.f32 %v489_v38, %v3534_v3 }
 0x19d   :  { %v3695_v43 = vmax.f32 %v490_v41, 0.0  ;;  %712 = vmatmul.f32.gmra.mxu0 %v3692_v39  ;;  %842 = vmatmul.f32.gmra.mxu2 %v3692_v39 }
 0x19f   :  { %650 = vmatmul.f32.gmra.mxu3 %v3695_v43  ;;  %780 = vmatmul.f32.gmra.mxu1 %v3695_v43 }
 0x1a0   :  { %v554_v45 = vpop.f32.mrf.mxu2 }
 0x1a1   :  { %v555_v46 = vadd.f32 %v554_v45, %v3551_v9  ;;  %v271_v45 = vld [vmem:[#allocation8 + $0x70] sm:$0xff] }
 0x1a2   :  { %v492_v48 = vpop.f32.mrf.mxu1  ;;  %1609 = vmatpush.msrb.mxu3 %v271_v45  ;;  %v285_v45 = vld [vmem:[#allocation8 + $0xe0] sm:$0xff] }
 0x1a3   :  { %v3702_v50 = vmax.f32 %v555_v46, 0.0  ;;  %v493_v51 = vadd.f32 %v492_v48, %v3534_v3  ;;  %v288_v46 = vld [vmem:[#allocation8 + $0xf8] sm:$0xff] }
 0x1a4   :  { %1673 = vmatpush.msrb.mxu0 %v288_v46 }
 0x1a5   :  { %v3705_v52 = vmax.f32 %v493_v51, 0.0  ;;  %715 = vmatmul.f32.gmra.mxu0 %v3702_v50  ;;  %845 = vmatmul.f32.gmra.mxu2 %v3702_v50 }
 0x1a7   :  { %653 = vmatmul.f32.gmra.mxu3 %v3705_v52  ;;  %783 = vmatmul.f32.gmra.mxu1 %v3705_v52 }
 0x1a8   :  { %v557_v54 = vpop.f32.mrf.mxu2 }
 0x1a9   :  { %v558_v56 = vadd.f32 %v557_v54, %v3551_v9 }
 0x1aa   :  { %v495_v59 = vpop.f32.mrf.mxu1 }
 0x1ab   :  { %v3712_v60 = vmax.f32 %v558_v56, 0.0  ;;  %v496_v62 = vadd.f32 %v495_v59, %v3534_v3 }
 0x1ad   :  { %v3715_v5 = vmax.f32 %v496_v62, 0.0  ;;  %718 = vmatmul.f32.gmra.mxu0 %v3712_v60  ;;  %848 = vmatmul.f32.gmra.mxu2 %v3712_v60 }
 0x1af   :  { %656 = vmatmul.f32.gmra.mxu3 %v3715_v5  ;;  %786 = vmatmul.f32.gmra.mxu1 %v3715_v5 }
 0x1b0   :  { %v560_v8 = vpop.f32.mrf.mxu2 }
 0x1b1   :  { %v561_v11 = vadd.f32 %v560_v8, %v3551_v9 }
 0x1b3   :  { %v3722_v15 = vmax.f32 %v561_v11, 0.0 }
 0x1b4   :  { %v742_v23 = vpop.f32.mrf.mxu1 }
 0x1b5   :  { %721 = vmatmul.f32.gmra.mxu0 %v3722_v15  ;;  %851 = vmatmul.f32.gmra.mxu2 %v3722_v15 }
 0x1ba   :  { %v612_v3 = vpop.f32.mrf.mxu3  ;;  %v677_v26 = vpop.f32.mrf.mxu0 }
 0x1bb   :  { %v678_v27 = vadd.f32 %v677_v26, %v612_v3  ;;  %v287_v3 = vld [vmem:[#allocation8 + $0xf0] sm:$0xff] }
 0x1bc   :  { %v745_v44 = vpop.f32.mrf.mxu1  ;;  %1674 = vmatpush.msrb.mxu0 %v287_v3 }
 0x1bd   :  { %v3727_v58 = vsub.f32 %v3549_v7, %v678_v27 }
 0x1be   :  { %1675 = vmatpush.msrb.mxu0 %v286_v18 }
 0x1bf   :  { %v887_v0 = vmul.f32 %v3727_v58, %v3727_v58 }
 0x1c0   :  { %v807_v1 = vpop.f32.mrf.mxu2  ;;  %1676 = vmatpush.msrb.mxu0 %v285_v45 }
 0x1c1   :  { %v808_v4 = vadd.f32 %v807_v1, %v742_v23  ;;  %935 = vmatmul.f32.vlgmr.msra.gmra.mxu3 %v887_v0  ;;  %1065 = vmatmul.f32.vlgmr.msrb.gmra.mxu1 %v887_v0  ;;  %v270_v23 = vld [vmem:[#allocation8 + $0x68] sm:$0xff] }
 0x1c2   :  { %v615_v9 = vpop.f32.mrf.mxu3  ;;  %v680_v10 = vpop.f32.mrf.mxu0  ;;  %1610 = vmatpush.msrb.mxu3 %v270_v23  ;;  %v284_v23 = vld [vmem:[#allocation8 + $0xd8] sm:$0xff] }
 0x1c3   :  { %v3732_v12 = vsub.f32 %v3566_v16, %v808_v4  ;;  %v681_v13 = vadd.f32 %v680_v10, %v615_v9  ;;  %1677 = vmatpush.msrb.mxu0 %v284_v23 }
 0x1c4   :  { %v748_v22 = vpop.f32.mrf.mxu1 }
 0x1c5   :  { %v888_v7 = vmul.f32 %v3732_v12, %v3732_v12  ;;  %v3737_v24 = vsub.f32 %v3572_v19, %v681_v13  ;;  %v269_v13 = vld [vmem:[#allocation8 + $0x60] sm:$0xff] }
 0x1c6   :  { %1611 = vmatpush.msrb.mxu3 %v269_v13  ;;  %v283_v13 = vld [vmem:[#allocation8 + $0xd0] sm:$0xff] }
 0x1c7   :  { %1000 = vmatmul.f32.vlgmr.msra.gmra.mxu0 %v888_v7  ;;  %1130 = vmatmul.f32.vlgmr.msrb.gmra.mxu2 %v888_v7  ;;  %v889_v28 = vmul.f32 %v3737_v24, %v3737_v24 }
 0x1c8   :  { %v810_v31 = vpop.f32.mrf.mxu2  ;;  %1678 = vmatpush.msrb.mxu0 %v283_v13 }
 0x1c9   :  { %v811_v35 = vadd.f32 %v810_v31, %v745_v44  ;;  %938 = vmatmul.f32.gmra.mxu3 %v889_v28  ;;  %1068 = vmatmul.f32.gmra.mxu1 %v889_v28 }
 0x1ca   :  { %v618_v16 = vpop.f32.mrf.mxu3  ;;  %v683_v37 = vpop.f32.mrf.mxu0 }
 0x1cb   :  { %v684_v38 = vadd.f32 %v683_v37, %v618_v16  ;;  %v3742_v41 = vsub.f32 %v3582_v25, %v811_v35 }
 0x1cc   :  { %v751_v48 = vpop.f32.mrf.mxu1 }
 0x1cd   :  { %v890_v19 = vmul.f32 %v3742_v41, %v3742_v41  ;;  %v3747_v51 = vsub.f32 %v3585_v29, %v684_v38 }
 0x1cf   :  { %1003 = vmatmul.f32.gmra.mxu0 %v890_v19  ;;  %1133 = vmatmul.f32.gmra.mxu2 %v890_v19  ;;  %v891_v54 = vmul.f32 %v3747_v51, %v3747_v51 }
 0x1d0   :  { %v813_v56 = vpop.f32.mrf.mxu2 }
 0x1d1   :  { %v814_v59 = vadd.f32 %v813_v56, %v748_v22  ;;  %941 = vmatmul.f32.gmra.mxu3 %v891_v54  ;;  %1071 = vmatmul.f32.gmra.mxu1 %v891_v54 }
 0x1d2   :  { %v621_v25 = vpop.f32.mrf.mxu3  ;;  %v686_v62 = vpop.f32.mrf.mxu0 }
 0x1d3   :  { %v687_v8 = vadd.f32 %v686_v62, %v621_v25  ;;  %v3752_v11 = vsub.f32 %v3592_v34, %v814_v59 }
 0x1d4   :  { %v754_v26 = vpop.f32.mrf.mxu1 }
 0x1d5   :  { %v892_v29 = vmul.f32 %v3752_v11, %v3752_v11  ;;  %v3757_v27 = vsub.f32 %v3595_v36, %v687_v8 }
 0x1d7   :  { %1006 = vmatmul.f32.gmra.mxu0 %v892_v29  ;;  %1136 = vmatmul.f32.gmra.mxu2 %v892_v29  ;;  %v893_v44 = vmul.f32 %v3757_v27, %v3757_v27 }
 0x1d8   :  { %v816_v0 = vpop.f32.mrf.mxu2 }
 0x1d9   :  { %v817_v1 = vadd.f32 %v816_v0, %v751_v48  ;;  %944 = vmatmul.f32.gmra.mxu3 %v893_v44  ;;  %1074 = vmatmul.f32.gmra.mxu1 %v893_v44 }
 0x1da   :  { %v624_v34 = vpop.f32.mrf.mxu3  ;;  %v689_v4 = vpop.f32.mrf.mxu0 }
 0x1db   :  { %v690_v9 = vadd.f32 %v689_v4, %v624_v34  ;;  %v3762_v10 = vsub.f32 %v3602_v40, %v817_v1 }
 0x1dc   :  { %v757_v22 = vpop.f32.mrf.mxu1 }
 0x1dd   :  { %v3765_v36 = vsub.f32 %v3605_v42, %v690_v9  ;;  %v894_v7 = vmul.f32 %v3762_v10, %v3762_v10  ;;  %v268_v42 = vld [vmem:[#allocation8 + $0x58] sm:$0xff] }
 0x1de   :  { %1612 = vmatpush.msrb.mxu3 %v268_v42  ;;  %v282_v42 = vld [vmem:[#allocation8 + $0xc8] sm:$0xff] }
 0x1df   :  { %1009 = vmatmul.f32.gmra.mxu0 %v894_v7  ;;  %1139 = vmatmul.f32.gmra.mxu2 %v894_v7  ;;  %v895_v28 = vmul.f32 %v3765_v36, %v3765_v36 }
 0x1e0   :  { %v819_v31 = vpop.f32.mrf.mxu2  ;;  %1679 = vmatpush.msrb.mxu0 %v282_v42 }
 0x1e1   :  { %v820_v35 = vadd.f32 %v819_v31, %v754_v26  ;;  %947 = vmatmul.f32.gmra.mxu3 %v895_v28  ;;  %1077 = vmatmul.f32.gmra.mxu1 %v895_v28 }
 0x1e2   :  { %v627_v40 = vpop.f32.mrf.mxu3  ;;  %v692_v16 = vpop.f32.mrf.mxu0 }
 0x1e3   :  { %v3772_v37 = vsub.f32 %v3612_v47, %v820_v35  ;;  %v693_v38 = vadd.f32 %v692_v16, %v627_v40 }
 0x1e4   :  { %v760_v46 = vpop.f32.mrf.mxu1 }
 0x1e5   :  { %v3775_v48 = vsub.f32 %v3615_v49, %v693_v38  ;;  %v896_v19 = vmul.f32 %v3772_v37, %v3772_v37  ;;  %v267_v49 = vld [vmem:[#allocation8 + $0x50] sm:$0xff] }
 0x1e6   :  { %1613 = vmatpush.msrb.mxu3 %v267_v49  ;;  %v281_v49 = vld [vmem:[#allocation8 + $0xc0] sm:$0xff] }
 0x1e7   :  { %1012 = vmatmul.f32.gmra.mxu0 %v896_v19  ;;  %1142 = vmatmul.f32.gmra.mxu2 %v896_v19  ;;  %v897_v54 = vmul.f32 %v3775_v48, %v3775_v48 }
 0x1e8   :  { %v822_v56 = vpop.f32.mrf.mxu2  ;;  %1680 = vmatpush.msrb.mxu0 %v281_v49 }
 0x1e9   :  { %v823_v47 = vadd.f32 %v822_v56, %v757_v22  ;;  %950 = vmatmul.f32.gmra.mxu3 %v897_v54  ;;  %1080 = vmatmul.f32.gmra.mxu1 %v897_v54 }
 0x1ea   :  { %v630_v59 = vpop.f32.mrf.mxu3  ;;  %v695_v25 = vpop.f32.mrf.mxu0 }
 0x1eb   :  { %v3782_v62 = vsub.f32 %v3622_v53, %v823_v47  ;;  %v696_v8 = vadd.f32 %v695_v25, %v630_v59 }
 0x1ec   :  { %v763_v3 = vpop.f32.mrf.mxu1 }
 0x1ed   :  { %v3785_v26 = vsub.f32 %v3625_v55, %v696_v8  ;;  %v898_v29 = vmul.f32 %v3782_v62, %v3782_v62  ;;  %v266_v55 = vld [vmem:[#allocation8 + $0x48] sm:$0xff] }
 0x1ee   :  { %1614 = vmatpush.msrb.mxu3 %v266_v55  ;;  %v280_v55 = vld [vmem:[#allocation8 + $0xb8] sm:$0xff] }
 0x1ef   :  { %1015 = vmatmul.f32.gmra.mxu0 %v898_v29  ;;  %1145 = vmatmul.f32.gmra.mxu2 %v898_v29  ;;  %v899_v44 = vmul.f32 %v3785_v26, %v3785_v26 }
 0x1f0   :  { %v825_v0 = vpop.f32.mrf.mxu2  ;;  %1681 = vmatpush.msrb.mxu0 %v280_v55 }
 0x1f1   :  { %v826_v53 = vadd.f32 %v825_v0, %v760_v46  ;;  %953 = vmatmul.f32.gmra.mxu3 %v899_v44  ;;  %1083 = vmatmul.f32.gmra.mxu1 %v899_v44 }
 0x1f2   :  { %v633_v1 = vpop.f32.mrf.mxu3  ;;  %v698_v34 = vpop.f32.mrf.mxu0 }
 0x1f3   :  { %v3792_v4 = vsub.f32 %v3632_v61, %v826_v53  ;;  %v699_v9 = vadd.f32 %v698_v34, %v633_v1 }
 0x1f4   :  { %v766_v18 = vpop.f32.mrf.mxu1 }
 0x1f5   :  { %v3795_v22 = vsub.f32 %v3635_v63, %v699_v9  ;;  %v900_v7 = vmul.f32 %v3792_v4, %v3792_v4  ;;  %v265_v63 = vld [vmem:[#allocation8 + $0x40] sm:$0xff] }
 0x1f6   :  { %1615 = vmatpush.msrb.mxu3 %v265_v63  ;;  %v279_v63 = vld [vmem:[#allocation8 + $0xb0] sm:$0xff] }
 0x1f7   :  { %1018 = vmatmul.f32.gmra.mxu0 %v900_v7  ;;  %1148 = vmatmul.f32.gmra.mxu2 %v900_v7  ;;  %v901_v28 = vmul.f32 %v3795_v22, %v3795_v22 }
 0x1f8   :  { %v828_v31 = vpop.f32.mrf.mxu2  ;;  %1682 = vmatpush.msrb.mxu0 %v279_v63 }
 0x1f9   :  { %v829_v61 = vadd.f32 %v828_v31, %v763_v3  ;;  %956 = vmatmul.f32.gmra.mxu3 %v901_v28  ;;  %1086 = vmatmul.f32.gmra.mxu1 %v901_v28 }
 0x1fa   :  { %v636_v35 = vpop.f32.mrf.mxu3  ;;  %v701_v40 = vpop.f32.mrf.mxu0 }
 0x1fb   :  { %v3802_v16 = vsub.f32 %v3642_v14, %v829_v61  ;;  %v702_v38 = vadd.f32 %v701_v40, %v636_v35 }
 0x1fc   :  { %v769_v45 = vpop.f32.mrf.mxu1 }
 0x1fd   :  { %v3805_v46 = vsub.f32 %v3645_v20, %v702_v38  ;;  %v902_v19 = vmul.f32 %v3802_v16, %v3802_v16  ;;  %v264_v20 = vld [vmem:[#allocation8 + $0x38] sm:$0xff] }
 0x1fe   :  { %1616 = vmatpush.msrb.mxu3 %v264_v20  ;;  %v278_v20 = vld [vmem:[#allocation8 + $0xa8] sm:$0xff] }
 0x1ff   :  { %1021 = vmatmul.f32.gmra.mxu0 %v902_v19  ;;  %1151 = vmatmul.f32.gmra.mxu2 %v902_v19  ;;  %v903_v54 = vmul.f32 %v3805_v46, %v3805_v46 }
 0x200   :  { %v831_v56 = vpop.f32.mrf.mxu2  ;;  %1683 = vmatpush.msrb.mxu0 %v278_v20 }
 0x201   :  { %v832_v14 = vadd.f32 %v831_v56, %v766_v18  ;;  %959 = vmatmul.f32.gmra.mxu3 %v903_v54  ;;  %1089 = vmatmul.f32.gmra.mxu1 %v903_v54 }
 0x202   :  { %v639_v47 = vpop.f32.mrf.mxu3  ;;  %v704_v59 = vpop.f32.mrf.mxu0 }
 0x203   :  { %v3812_v25 = vsub.f32 %v3652_v33, %v832_v14  ;;  %v705_v8 = vadd.f32 %v704_v59, %v639_v47 }
 0x204   :  { %v772_v23 = vpop.f32.mrf.mxu1 }
 0x205   :  { %v3815_v3 = vsub.f32 %v3655_v57, %v705_v8  ;;  %v904_v29 = vmul.f32 %v3812_v25, %v3812_v25  ;;  %v263_v57 = vld [vmem:[#allocation8 + $0x30] sm:$0xff]  ;;  %v261_v8 = vld [vmem:[#allocation8 + $0x20] sm:$0xff] }
 0x206   :  { %1617 = vmatpush.msrb.mxu3 %v263_v57 }
 0x207   :  { %1024 = vmatmul.f32.gmra.mxu0 %v904_v29  ;;  %1154 = vmatmul.f32.gmra.mxu2 %v904_v29  ;;  %v905_v44 = vmul.f32 %v3815_v3, %v3815_v3 }
 0x208   :  { %v834_v0 = vpop.f32.mrf.mxu2 }
 0x209   :  { %v835_v33 = vadd.f32 %v834_v0, %v769_v45  ;;  %962 = vmatmul.f32.gmra.mxu3 %v905_v44  ;;  %1092 = vmatmul.f32.gmra.mxu1 %v905_v44  ;;  %v260_v0 = vld [vmem:[#allocation8 + $0x18] sm:$0xff] }
 0x20a   :  { %v642_v53 = vpop.f32.mrf.mxu3  ;;  %v707_v1 = vpop.f32.mrf.mxu0 }
 0x20b   :  { %v3822_v34 = vsub.f32 %v3662_v2, %v835_v33  ;;  %v708_v9 = vadd.f32 %v707_v1, %v642_v53 }
 0x20c   :  { %v775_v13 = vpop.f32.mrf.mxu1 }
 0x20d   :  { %v3825_v18 = vsub.f32 %v3665_v6, %v708_v9  ;;  %v906_v7 = vmul.f32 %v3822_v34, %v3822_v34  ;;  %v262_v6 = vld [vmem:[#allocation8 + $0x28] sm:$0xff] }
 0x20e   :  { %1618 = vmatpush.msrb.mxu3 %v262_v6 }
 0x20f   :  { %1027 = vmatmul.f32.gmra.mxu0 %v906_v7  ;;  %1157 = vmatmul.f32.gmra.mxu2 %v906_v7  ;;  %v907_v28 = vmul.f32 %v3825_v18, %v3825_v18 }
 0x210   :  { %v837_v31 = vpop.f32.mrf.mxu2  ;;  %1619 = vmatpush.msrb.mxu3 %v261_v8 }
 0x211   :  { %v838_v2 = vadd.f32 %v837_v31, %v772_v23  ;;  %965 = vmatmul.f32.gmra.mxu3 %v907_v28  ;;  %1095 = vmatmul.f32.gmra.mxu1 %v907_v28 }
 0x212   :  { %v645_v61 = vpop.f32.mrf.mxu3  ;;  %v710_v35 = vpop.f32.mrf.mxu0  ;;  %1620 = vmatpush.msrb.mxu3 %v260_v0 }
 0x213   :  { %v3832_v40 = vsub.f32 %v3672_v17, %v838_v2  ;;  %v711_v38 = vadd.f32 %v710_v35, %v645_v61 }
 0x214   :  { %v778_v19 = vpop.f32.mrf.mxu1 }
 0x215   :  { %v3835_v42 = vsub.f32 %v3675_v21, %v711_v38  ;;  %v908_v45 = vmul.f32 %v3832_v40, %v3832_v40 }
 0x217   :  { %1030 = vmatmul.f32.gmra.mxu0 %v908_v45  ;;  %1160 = vmatmul.f32.gmra.mxu2 %v908_v45  ;;  %v909_v54 = vmul.f32 %v3835_v42, %v3835_v42 }
 0x218   :  { %v840_v56 = vpop.f32.mrf.mxu2 }
 0x219   :  { %v841_v17 = vadd.f32 %v840_v56, %v775_v13  ;;  %968 = vmatmul.f32.gmra.mxu3 %v909_v54  ;;  %1098 = vmatmul.f32.gmra.mxu1 %v909_v54 }
 0x21a   :  { %v648_v14 = vpop.f32.mrf.mxu3  ;;  %v713_v47 = vpop.f32.mrf.mxu0 }
 0x21b   :  { %v3842_v59 = vsub.f32 %v3682_v30, %v841_v17  ;;  %v714_v21 = vadd.f32 %v713_v47, %v648_v14  ;;  %v277_v30 = vld [vmem:[#allocation8 + $0xa0] sm:$0xff] }
 0x21c   :  { %v781_v44 = vpop.f32.mrf.mxu1  ;;  %1684 = vmatpush.msrb.mxu0 %v277_v30  ;;  %v275_v30 = vld [vmem:[#allocation8 + $0x90] sm:$0xff] }
 0x21d   :  { %v3845_v49 = vsub.f32 %v3685_v32, %v714_v21  ;;  %v910_v23 = vmul.f32 %v3842_v59, %v3842_v59 }
 0x21f   :  { %1033 = vmatmul.f32.gmra.mxu0 %v910_v23  ;;  %1163 = vmatmul.f32.gmra.mxu2 %v910_v23  ;;  %v911_v29 = vmul.f32 %v3845_v49, %v3845_v49  ;;  %v259_v23 = vld [vmem:[#allocation8 + $0x10] sm:$0xff] }
 0x220   :  { %v843_v33 = vpop.f32.mrf.mxu2  ;;  %1621 = vmatpush.msrb.mxu3 %v259_v23 }
 0x221   :  { %v844_v53 = vadd.f32 %v843_v33, %v778_v19  ;;  %971 = vmatmul.f32.gmra.mxu3 %v911_v29  ;;  %1101 = vmatmul.f32.gmra.mxu1 %v911_v29  ;;  %v276_v29 = vld [vmem:[#allocation8 + $0x98] sm:$0xff]  ;;  %v257_v33 = vld [vmem:[#allocation8] sm:$0xff] }
 0x222   :  { %v651_v1 = vpop.f32.mrf.mxu3  ;;  %v716_v32 = vpop.f32.mrf.mxu0  ;;  %1685 = vmatpush.msrb.mxu0 %v276_v29  ;;  %v191_v29 = vld [vmem:[%s4949_s4] sm:$0x3] }
 0x223   :  { %v3852_v9 = vsub.f32 %v3692_v39, %v844_v53  ;;  %v717_v57 = vadd.f32 %v716_v32, %v651_v1  ;;  %v274_v53 = vld [vmem:[#allocation8 + $0x88] sm:$0xff] }
 0x224   :  { %v784_v2 = vpop.f32.mrf.mxu1  ;;  %1686 = vmatpush.msrb.mxu0 %v275_v30 }
 0x225   :  { %v3855_v55 = vsub.f32 %v3695_v43, %v717_v57  ;;  %v912_v13 = vmul.f32 %v3852_v9, %v3852_v9 }
 0x226   :  { %1687 = vmatpush.msrb.mxu0 %v274_v53 }
 0x227   :  { %1036 = vmatmul.f32.gmra.mxu0 %v912_v13  ;;  %1166 = vmatmul.f32.gmra.mxu2 %v912_v13  ;;  %v913_v7 = vmul.f32 %v3855_v55, %v3855_v55 }
 0x228   :  { %v846_v28 = vpop.f32.mrf.mxu2 }
 0x229   :  { %v847_v31 = vadd.f32 %v846_v28, %v781_v44  ;;  %974 = vmatmul.f32.gmra.mxu3 %v913_v7  ;;  %1104 = vmatmul.f32.gmra.mxu1 %v913_v7  ;;  %v258_v44 = vld [vmem:[#allocation8 + $0x8] sm:$0xff] }
 0x22a   :  { %v654_v61 = vpop.f32.mrf.mxu3  ;;  %v719_v39 = vpop.f32.mrf.mxu0  ;;  %1622 = vmatpush.msrb.mxu3 %v258_v44 }
 0x22b   :  { %v3862_v35 = vsub.f32 %v3702_v50, %v847_v31  ;;  %v720_v43 = vadd.f32 %v719_v39, %v654_v61 }
 0x22c   :  { %1623 = vmatpush.msrb.mxu3 %v257_v33 }
 0x22d   :  { %v3865_v38 = vsub.f32 %v3705_v52, %v720_v43  ;;  %v914_v6 = vmul.f32 %v3862_v35, %v3862_v35  ;;  %v787_v52 = vpop.f32.mrf.mxu1 }
 0x22f   :  { %1039 = vmatmul.f32.gmra.mxu0 %v914_v6  ;;  %1169 = vmatmul.f32.gmra.mxu2 %v914_v6  ;;  %v915_v63 = vmul.f32 %v3865_v38, %v3865_v38 }
 0x230   :  { %v849_v45 = vpop.f32.mrf.mxu2 }
 0x231   :  { %v850_v19 = vadd.f32 %v849_v45, %v784_v2  ;;  %977 = vmatmul.f32.gmra.mxu3 %v915_v63  ;;  %1107 = vmatmul.f32.gmra.mxu1 %v915_v63 }
 0x232   :  { %v657_v54 = vpop.f32.mrf.mxu3  ;;  %v722_v56 = vpop.f32.mrf.mxu0 }
 0x233   :  { %v3872_v50 = vsub.f32 %v3712_v60, %v850_v19  ;;  %v723_v17 = vadd.f32 %v722_v56, %v657_v54 }
 0x235   :  { %v3875_v14 = vsub.f32 %v3715_v5, %v723_v17  ;;  %v916_v47 = vmul.f32 %v3872_v50, %v3872_v50 }
 0x237   :  { %1042 = vmatmul.f32.gmra.mxu0 %v916_v47  ;;  %1172 = vmatmul.f32.gmra.mxu2 %v916_v47  ;;  %v917_v21 = vmul.f32 %v3875_v14, %v3875_v14 }
 0x238   :  { %v852_v8 = vpop.f32.mrf.mxu2 }
 0x239   :  { %v853_v20 = vadd.f32 %v852_v8, %v787_v52  ;;  %980 = vmatmul.f32.gmra.mxu3 %v917_v21  ;;  %1110 = vmatmul.f32.gmra.mxu1 %v917_v21 }
 0x23b   :  { %v3882_v60 = vsub.f32 %v3722_v15, %v853_v20  ;;  %v273_v15 = vld [vmem:[#allocation8 + $0x80] sm:$0xff] }
 0x23c   :  { %1688 = vmatpush.msrb.mxu0 %v273_v15 }
 0x23d   :  { %v918_v5 = vmul.f32 %v3882_v60, %v3882_v60 }
 0x23e   :  { %v1066_v0 = vpop.f32.mrf.mxu1 }
 0x23f   :  { %1045 = vmatmul.f32.gmra.mxu0 %v918_v5  ;;  %1175 = vmatmul.f32.gmra.mxu2 %v918_v5  ;;  %v1067_v28 = vadd.f32 1e-05, %v1066_v0 }
 0x244   :  { %v936_v1 = vpop.f32.mrf.mxu3  ;;  %v1001_v32 = vpop.f32.mrf.mxu0 }
 0x245   :  { %v937_v57 = vadd.f32 1e-05, %v936_v1 }
 0x246   :  { %v1069_v13 = vpop.f32.mrf.mxu1 }
 0x247   :  { %v1002_v7 = vadd.f32 %v1001_v32, %v937_v57  ;;  %v1070_v54 = vadd.f32 1e-05, %v1069_v13  ;;  %v192_v57 = vld [vmem:[%s4950_s5] sm:$0x3]  ;;  %v3901_v13 = vperm.slane %v191_v29, 0 }
 0x249   :  { %2748 = vrsqrt.f32 %v1002_v7  ;;  %vm1185_vm1 = vweird.f32 %v1002_v7 }
 0x24a   :  { %v1131_v31 = vpop.f32.mrf.mxu2 }
 0x24b   :  { %v1132_v2 = vadd.f32 %v1131_v31, %v1067_v28 }
 0x24c   :  { %v939_v61 = vpop.f32.mrf.mxu3  ;;  %v1004_v39 = vpop.f32.mrf.mxu0 }
 0x24d   :  { %2750 = vrsqrt.f32 %v1132_v2  ;;  %v940_v43 = vadd.f32 1e-05, %v939_v61  ;;  %vm1195_vm4 = vweird.f32 %v1132_v2 }
 0x24e   :  { %v1072_v6 = vpop.f32.mrf.mxu1 }
 0x24f   :  { %v2749_v63 = vpop.eup %2748  ;;  %v3886_v45 = vadd.f32 %v1004_v39, %v940_v43  ;;  %v1073_v28 = vadd.f32 1e-05, %v1072_v6 }
 0x250   :  { %v1180_v19 = vmul.f32 %v2749_v63, %v1002_v7  ;;  %vm1186_vm0 = vweird.f32 %v2749_v63 }
 0x251   :  { %2752 = vrsqrt.f32 %v3886_v45  ;;  %vm1187_vm2 = vmor %vm1185_vm1, %vm1186_vm0  ;;  %vm1205_vm7 = vweird.f32 %v3886_v45 }
 0x252   :  { %v1181_v56 = vmul.f32 %v2749_v63, %v1180_v19  ;;  %v1134_v17 = vpop.f32.mrf.mxu2 }
 0x253   :  { %v2751_v52 = vpop.eup %2750  ;;  %v3889_v47 = vadd.f32 %v1134_v17, %v1070_v54 }
 0x254   :  { %v1182_v21 = vmul.f32 0.5, %v1181_v56  ;;  %v1190_v8 = vmul.f32 %v2751_v52, %v1132_v2  ;;  %v942_v20 = vpop.f32.mrf.mxu3  ;;  %v1007_v23 = vpop.f32.mrf.mxu0  ;;  %vm1196_vm3 = vweird.f32 %v2751_v52  ;;  %v3909_v56 = vperm.slane %v192_v57, 0 }
 0x255   :  { %2754 = vrsqrt.f32 %v3889_v47  ;;  %v943_v5 = vadd.f32 1e-05, %v942_v20  ;;  %vm1197_vm5 = vmor %vm1195_vm4, %vm1196_vm3  ;;  %vm1215_vm10 = vweird.f32 %v3889_v47 }
 0x256   :  { %v1183_v44 = vsub.f32 1.5, %v1182_v21  ;;  %v1191_v0 = vmul.f32 %v2751_v52, %v1190_v8  ;;  %v1075_v30 = vpop.f32.mrf.mxu1 }
 0x257   :  { %v2753_v33 = vpop.eup %2752  ;;  %v3895_v53 = vadd.f32 %v1007_v23, %v943_v5  ;;  %v3914_v23 = vperm.slane %v191_v29, 1  ;;  %v3926_v29 = vperm.slane %v192_v57, 1 }
 0x258   :  { %v1184_v15 = vmul.f32 %v2749_v63, %v1183_v44  ;;  %v1192_v1 = vmul.f32 0.5, %v1191_v0  ;;  %v1200_v32 = vmul.f32 %v2753_v33, %v3886_v45  ;;  %vm1206_vm6 = vweird.f32 %v2753_v33 }
 0x259   :  { %2756 = vrsqrt.f32 %v3895_v53  ;;  %vm1207_vm8 = vmor %vm1205_vm7, %vm1206_vm6  ;;  %vm1225_vm13 = vweird.f32 %v3895_v53 }
 0x25a   :  { %v1188_v31 = vsel %vm1187_vm2, %v2749_v63, %v1184_v15  ;;  %v1193_v61 = vsub.f32 1.5, %v1192_v1  ;;  %v1201_v39 = vmul.f32 %v2753_v33, %v1200_v32  ;;  %v1137_v43 = vpop.f32.mrf.mxu2 }
 0x25b   :  { %v3904_v19 = vpop.eup %2754  ;;  %v1499_v7 = vmul.f32 %v1188_v31, %v3727_v58  ;;  %v3907_v54 = vadd.f32 %v1137_v43, %v1073_v28  ;;  %v1076_v43 = vadd.f32 1e-05, %v1075_v30 }
 0x25c   :  { %v1194_v17 = vmul.f32 %v2751_v52, %v1193_v61  ;;  %v1202_v21 = vmul.f32 0.5, %v1201_v39  ;;  %v1210_v6 = vmul.f32 %v3904_v19, %v3889_v47  ;;  %v945_v8 = vpop.f32.mrf.mxu3  ;;  %v1010_v63 = vpop.f32.mrf.mxu0  ;;  %vm1216_vm9 = vweird.f32 %v3904_v19 }
 0x25d   :  { %v1536_v20 = vmul.f32 %v3901_v13, %v1499_v7  ;;  %2758 = vrsqrt.f32 %v3907_v54  ;;  %v946_v58 = vadd.f32 1e-05, %v945_v8  ;;  %vm1217_vm11 = vmor %vm1215_vm10, %vm1216_vm9  ;;  %vm1235_vm0 = vweird.f32 %v3907_v54 }
 0x25e   :  { %v1198_v5 = vsel %vm1197_vm5, %v2751_v52, %v1194_v17  ;;  %v1203_v44 = vsub.f32 1.5, %v1202_v21  ;;  %v1211_v0 = vmul.f32 %v3904_v19, %v1210_v6  ;;  %v1078_v2 = vpop.f32.mrf.mxu1 }
 0x25f   :  { %v3918_v15 = vpop.eup %2756  ;;  %v1500_v1 = vmul.f32 %v1198_v5, %v3732_v12  ;;  %v3921_v32 = vadd.f32 %v1010_v63, %v946_v58  ;;  %v3924_v28 = vadd.f32 %v3909_v56, %v1536_v20 }
 0x260   :  { %v1204_v31 = vmul.f32 %v2753_v33, %v1203_v44  ;;  %v1212_v52 = vmul.f32 0.5, %v1211_v0  ;;  %v1220_v61 = vmul.f32 %v3918_v15, %v3895_v53  ;;  %vm1226_vm12 = vweird.f32 %v3918_v15 }
 0x261   :  { %v1537_v39 = vmul.f32 %v3914_v23, %v1500_v1  ;;  %2760 = vrsqrt.f32 %v3921_v32  ;;  %1624 = vmatmul.f32.vlgmr.msrb.gmra.mxu3 %v3924_v28  ;;  %vm1227_vm14 = vmor %vm1225_vm13, %vm1226_vm12  ;;  %vm1245_vm3 = vweird.f32 %v3921_v32 }
 0x262   :  { %v1213_v12 = vsub.f32 1.5, %v1212_v52  ;;  %v1221_v57 = vmul.f32 %v3918_v15, %v1220_v61  ;;  %v1140_v7 = vpop.f32.mrf.mxu2  ;;  %v1208_v17 = vsel %vm1207_vm8, %v2753_v33, %v1204_v31  ;;  %v322_v33 = vld [vmem:[#allocation10 + $0xf8] sm:$0xff] }
 0x263   :  { %v3936_v45 = vpop.eup %2758  ;;  %v3938_v21 = vadd.f32 %v1140_v7, %v1076_v43  ;;  %v3941_v6 = vadd.f32 %v3926_v29, %v1537_v39  ;;  %v1501_v30 = vmul.f32 %v1208_v17, %v3737_v24  ;;  %1838 = vmatpush.msra.mxu2 %v322_v33  ;;  %v321_v17 = vld [vmem:[#allocation10 + $0xf0] sm:$0xff] }
 0x264   :  { %v1214_v8 = vmul.f32 %v3904_v19, %v1213_v12  ;;  %v1222_v63 = vmul.f32 0.5, %v1221_v57  ;;  %v1230_v20 = vmul.f32 %v3936_v45, %v3907_v54  ;;  %v948_v58 = vpop.f32.mrf.mxu3  ;;  %v1013_v5 = vpop.f32.mrf.mxu0  ;;  %1773 = vmatpush.msra.mxu1 %v321_v17  ;;  %vm1236_vm15 = vweird.f32 %v3936_v45 }
 0x265   :  { %2762 = vrsqrt.f32 %v3938_v21  ;;  %v949_v44 = vadd.f32 1e-05, %v948_v58  ;;  %1689 = vmatmul.f32.vlgmr.msrb.gmra.mxu0 %v3941_v6  ;;  %v1538_v24 = vmul.f32 %v3901_v13, %v1501_v30  ;;  %vm1237_vm1 = vmor %vm1235_vm0, %vm1236_vm15  ;;  %vm1255_vm6 = vweird.f32 %v3938_v21 }
 0x266   :  { %v1223_v0 = vsub.f32 1.5, %v1222_v63  ;;  %v1231_v47 = vmul.f32 %v3936_v45, %v1230_v20  ;;  %v1081_v1 = vpop.f32.mrf.mxu1  ;;  %v1218_v31 = vsel %vm1217_vm11, %v3904_v19, %v1214_v8  ;;  %v1079_v19 = vadd.f32 1e-05, %v1078_v2 }
 0x267   :  { %v3956_v52 = vpop.eup %2760  ;;  %v3958_v61 = vadd.f32 %v1013_v5, %v949_v44  ;;  %v3961_v39 = vadd.f32 %v3909_v56, %v1538_v24  ;;  %v1502_v43 = vmul.f32 %v1218_v31, %v3742_v41 }
 0x268   :  { %v1224_v12 = vmul.f32 %v3918_v15, %v1223_v0  ;;  %v1232_v57 = vmul.f32 0.5, %v1231_v47  ;;  %v1240_v7 = vmul.f32 %v3956_v52, %v3921_v32  ;;  %vm1246_vm2 = vweird.f32 %v3956_v52 }
 0x269   :  { %2764 = vrsqrt.f32 %v3958_v61  ;;  %1627 = vmatmul.f32.gmra.mxu3 %v3961_v39  ;;  %v1539_v30 = vmul.f32 %v3914_v23, %v1502_v43  ;;  %vm1247_vm4 = vmor %vm1245_vm3, %vm1246_vm2  ;;  %vm1265_vm9 = vweird.f32 %v3958_v61 }
 0x26a   :  { %v1233_v8 = vsub.f32 1.5, %v1232_v57  ;;  %v1241_v41 = vmul.f32 %v3956_v52, %v1240_v7  ;;  %v1143_v53 = vpop.f32.mrf.mxu2  ;;  %v1228_v63 = vsel %vm1227_vm14, %v3918_v15, %v1224_v12  ;;  %v320_v15 = vld [vmem:[#allocation10 + $0xe8] sm:$0xff] }
 0x26b   :  { %v3974_v20 = vpop.eup %2762  ;;  %v3976_v58 = vadd.f32 %v1143_v53, %v1079_v19  ;;  %v3979_v2 = vadd.f32 %v3926_v29, %v1539_v30  ;;  %v1503_v5 = vmul.f32 %v1228_v63, %v3747_v51  ;;  %1839 = vmatpush.msra.mxu2 %v320_v15  ;;  %v319_v63 = vld [vmem:[#allocation10 + $0xe0] sm:$0xff] }
 0x26c   :  { %v1234_v33 = vmul.f32 %v3936_v45, %v1233_v8  ;;  %v1242_v44 = vmul.f32 0.5, %v1241_v41  ;;  %v1250_v24 = vmul.f32 %v3974_v20, %v3938_v21  ;;  %v951_v0 = vpop.f32.mrf.mxu3  ;;  %v1016_v47 = vpop.f32.mrf.mxu0  ;;  %1774 = vmatpush.msra.mxu1 %v319_v63  ;;  %vm1256_vm5 = vweird.f32 %v3974_v20 }
 0x26d   :  { %2766 = vrsqrt.f32 %v3976_v58  ;;  %v952_v31 = vadd.f32 1e-05, %v951_v0  ;;  %1692 = vmatmul.f32.gmra.mxu0 %v3979_v2  ;;  %v1540_v51 = vmul.f32 %v3901_v13, %v1503_v5  ;;  %vm1257_vm7 = vmor %vm1255_vm6, %vm1256_vm5  ;;  %vm1275_vm12 = vweird.f32 %v3976_v58 }
 0x26e   :  { %v1243_v43 = vsub.f32 1.5, %v1242_v44  ;;  %v1251_v54 = vmul.f32 %v3974_v20, %v1250_v24  ;;  %v1084_v12 = vpop.f32.mrf.mxu1  ;;  %v1238_v57 = vsel %vm1237_vm1, %v3936_v45, %v1234_v33  ;;  %v1082_v45 = vadd.f32 1e-05, %v1081_v1 }
 0x26f   :  { %v3994_v7 = vpop.eup %2764  ;;  %v3996_v17 = vadd.f32 %v1016_v47, %v952_v31  ;;  %v3999_v19 = vadd.f32 %v3909_v56, %v1540_v51  ;;  %v1504_v30 = vmul.f32 %v1238_v57, %v3752_v11 }
 0x270   :  { %v1244_v8 = vmul.f32 %v3956_v52, %v1243_v43  ;;  %v1252_v41 = vmul.f32 0.5, %v1251_v54  ;;  %v1260_v53 = vmul.f32 %v3994_v7, %v3958_v61  ;;  %vm1266_vm8 = vweird.f32 %v3994_v7 }
 0x271   :  { %2768 = vrsqrt.f32 %v3996_v17  ;;  %1630 = vmatmul.f32.gmra.mxu3 %v3999_v19  ;;  %v1541_v5 = vmul.f32 %v3914_v23, %v1504_v30  ;;  %vm1267_vm10 = vmor %vm1265_vm9, %vm1266_vm8  ;;  %vm1285_vm15 = vweird.f32 %v3996_v17 }
 0x272   :  { %v1253_v33 = vsub.f32 1.5, %v1252_v41  ;;  %v1261_v11 = vmul.f32 %v3994_v7, %v1260_v53  ;;  %v1146_v32 = vpop.f32.mrf.mxu2  ;;  %v1248_v44 = vsel %vm1247_vm4, %v3956_v52, %v1244_v8  ;;  %v318_v52 = vld [vmem:[#allocation10 + $0xd8] sm:$0xff] }
 0x273   :  { %v4012_v24 = vpop.eup %2766  ;;  %v4014_v0 = vadd.f32 %v1146_v32, %v1082_v45  ;;  %v4017_v1 = vadd.f32 %v3926_v29, %v1541_v5  ;;  %v1505_v47 = vmul.f32 %v1248_v44, %v3757_v27  ;;  %1840 = vmatpush.msra.mxu2 %v318_v52  ;;  %v317_v44 = vld [vmem:[#allocation10 + $0xd0] sm:$0xff] }
 0x274   :  { %v1254_v15 = vmul.f32 %v3974_v20, %v1253_v33  ;;  %v1262_v31 = vmul.f32 0.5, %v1261_v11  ;;  %v1270_v51 = vmul.f32 %v4012_v24, %v3976_v58  ;;  %v954_v43 = vpop.f32.mrf.mxu3  ;;  %v1019_v54 = vpop.f32.mrf.mxu0  ;;  %1775 = vmatpush.msra.mxu1 %v317_v44  ;;  %vm1276_vm11 = vweird.f32 %v4012_v24 }
 0x275   :  { %2770 = vrsqrt.f32 %v4014_v0  ;;  %v955_v57 = vadd.f32 1e-05, %v954_v43  ;;  %1695 = vmatmul.f32.gmra.mxu0 %v4017_v1  ;;  %v1542_v27 = vmul.f32 %v3901_v13, %v1505_v47  ;;  %vm1277_vm13 = vmor %vm1275_vm12, %vm1276_vm11  ;;  %vm1295_vm2 = vweird.f32 %v4014_v0 }
 0x276   :  { %v1263_v30 = vsub.f32 1.5, %v1262_v31  ;;  %v1271_v21 = vmul.f32 %v4012_v24, %v1270_v51  ;;  %v1087_v8 = vpop.f32.mrf.mxu1  ;;  %v1258_v41 = vsel %vm1257_vm7, %v3974_v20, %v1254_v15  ;;  %v1085_v20 = vadd.f32 1e-05, %v1084_v12 }
 0x277   :  { %v4032_v53 = vpop.eup %2768  ;;  %v4034_v63 = vadd.f32 %v1019_v54, %v955_v57  ;;  %v4037_v45 = vadd.f32 %v3909_v56, %v1542_v27  ;;  %v1506_v5 = vmul.f32 %v1258_v41, %v3762_v10 }
 0x278   :  { %v1264_v33 = vmul.f32 %v3994_v7, %v1263_v30  ;;  %v1272_v11 = vmul.f32 0.5, %v1271_v21  ;;  %v1280_v32 = vmul.f32 %v4032_v53, %v3996_v17  ;;  %vm1286_vm14 = vweird.f32 %v4032_v53 }
 0x279   :  { %2772 = vrsqrt.f32 %v4034_v63  ;;  %1633 = vmatmul.f32.gmra.mxu3 %v4037_v45  ;;  %v1543_v47 = vmul.f32 %v3914_v23, %v1506_v5  ;;  %vm1287_vm0 = vmor %vm1285_vm15, %vm1286_vm14  ;;  %vm1305_vm5 = vweird.f32 %v4034_v63 }
 0x27a   :  { %v1273_v15 = vsub.f32 1.5, %v1272_v11  ;;  %v1281_v10 = vmul.f32 %v4032_v53, %v1280_v32  ;;  %v1149_v61 = vpop.f32.mrf.mxu2  ;;  %v1268_v31 = vsel %vm1267_vm10, %v3994_v7, %v1264_v33  ;;  %v316_v11 = vld [vmem:[#allocation10 + $0xc8] sm:$0xff] }
 0x27b   :  { %v4050_v51 = vpop.eup %2770  ;;  %v4052_v43 = vadd.f32 %v1149_v61, %v1085_v20  ;;  %v4055_v12 = vadd.f32 %v3926_v29, %v1543_v47  ;;  %v1507_v54 = vmul.f32 %v1268_v31, %v3765_v36  ;;  %1841 = vmatpush.msra.mxu2 %v316_v11  ;;  %v1088_v31 = vadd.f32 1e-05, %v1087_v8 }
 0x27c   :  { %v1274_v52 = vmul.f32 %v4012_v24, %v1273_v15  ;;  %v1282_v57 = vmul.f32 0.5, %v1281_v10  ;;  %v1290_v27 = vmul.f32 %v4050_v51, %v4014_v0  ;;  %v957_v30 = vpop.f32.mrf.mxu3  ;;  %v1022_v21 = vpop.f32.mrf.mxu0  ;;  %vm1296_vm1 = vweird.f32 %v4050_v51 }
 0x27d   :  { %2774 = vrsqrt.f32 %v4052_v43  ;;  %v958_v7 = vadd.f32 1e-05, %v957_v30  ;;  %1698 = vmatmul.f32.gmra.mxu0 %v4055_v12  ;;  %v1544_v41 = vmul.f32 %v3901_v13, %v1507_v54  ;;  %vm1297_vm3 = vmor %vm1295_vm2, %vm1296_vm1  ;;  %vm1315_vm8 = vweird.f32 %v4052_v43 }
 0x27e   :  { %v1283_v5 = vsub.f32 1.5, %v1282_v57  ;;  %v1291_v36 = vmul.f32 %v4050_v51, %v1290_v27  ;;  %v1090_v58 = vpop.f32.mrf.mxu1  ;;  %v1278_v33 = vsel %vm1277_vm13, %v4012_v24, %v1274_v52  ;;  %v315_v24 = vld [vmem:[#allocation10 + $0xc0] sm:$0xff] }
 0x27f   :  { %v4068_v32 = vpop.eup %2772  ;;  %v4070_v44 = vadd.f32 %v1022_v21, %v958_v7  ;;  %v4073_v20 = vadd.f32 %v3909_v56, %v1544_v41  ;;  %v1508_v47 = vmul.f32 %v1278_v33, %v3772_v37  ;;  %1776 = vmatpush.msra.mxu1 %v315_v24 }
 0x280   :  { %v1284_v15 = vmul.f32 %v4032_v53, %v1283_v5  ;;  %v1292_v10 = vmul.f32 0.5, %v1291_v36  ;;  %v1300_v61 = vmul.f32 %v4068_v32, %v4034_v63  ;;  %vm1306_vm4 = vweird.f32 %v4068_v32 }
 0x281   :  { %2776 = vrsqrt.f32 %v4070_v44  ;;  %1636 = vmatmul.f32.gmra.mxu3 %v4073_v20  ;;  %v1545_v37 = vmul.f32 %v3914_v23, %v1508_v47  ;;  %vm1307_vm6 = vmor %vm1305_vm5, %vm1306_vm4  ;;  %vm1325_vm11 = vweird.f32 %v4070_v44 }
 0x282   :  { %v1293_v54 = vsub.f32 1.5, %v1292_v10  ;;  %v1301_v17 = vmul.f32 %v4068_v32, %v1300_v61  ;;  %v1152_v52 = vpop.f32.mrf.mxu2  ;;  %v1288_v57 = vsel %vm1287_vm0, %v4032_v53, %v1284_v15  ;;  %v314_v10 = vld [vmem:[#allocation10 + $0xb8] sm:$0xff] }
 0x283   :  { %v4088_v27 = vpop.eup %2774  ;;  %v4090_v30 = vadd.f32 %v1152_v52, %v1088_v31  ;;  %v4093_v8 = vadd.f32 %v3926_v29, %v1545_v37  ;;  %v1509_v21 = vmul.f32 %v1288_v57, %v3775_v48  ;;  %1842 = vmatpush.msra.mxu2 %v314_v10  ;;  %v1091_v57 = vadd.f32 1e-05, %v1090_v58 }
 0x284   :  { %v1294_v7 = vmul.f32 %v4050_v51, %v1293_v54  ;;  %v1302_v41 = vmul.f32 0.5, %v1301_v17  ;;  %v1310_v5 = vmul.f32 %v4088_v27, %v4052_v43  ;;  %v960_v36 = vpop.f32.mrf.mxu3  ;;  %v1025_v33 = vpop.f32.mrf.mxu0  ;;  %vm1316_vm7 = vweird.f32 %v4088_v27 }
 0x285   :  { %2778 = vrsqrt.f32 %v4090_v30  ;;  %v961_v53 = vadd.f32 1e-05, %v960_v36  ;;  %1701 = vmatmul.f32.gmra.mxu0 %v4093_v8  ;;  %v1546_v11 = vmul.f32 %v3901_v13, %v1509_v21  ;;  %vm1317_vm9 = vmor %vm1315_vm8, %vm1316_vm7  ;;  %vm1335_vm14 = vweird.f32 %v4090_v30 }
 0x286   :  { %v1303_v47 = vsub.f32 1.5, %v1302_v41  ;;  %v1311_v48 = vmul.f32 %v4088_v27, %v1310_v5  ;;  %v1093_v0 = vpop.f32.mrf.mxu1  ;;  %v1298_v15 = vsel %vm1297_vm3, %v4050_v51, %v1294_v7  ;;  %v313_v51 = vld [vmem:[#allocation10 + $0xb0] sm:$0xff] }
 0x287   :  { %v4106_v61 = vpop.eup %2776  ;;  %v4108_v24 = vadd.f32 %v1025_v33, %v961_v53  ;;  %v4111_v31 = vadd.f32 %v3909_v56, %v1546_v11  ;;  %v1510_v37 = vmul.f32 %v1298_v15, %v3782_v62  ;;  %1777 = vmatpush.msra.mxu1 %v313_v51 }
 0x288   :  { %v1304_v54 = vmul.f32 %v4068_v32, %v1303_v47  ;;  %v1312_v17 = vmul.f32 0.5, %v1311_v48  ;;  %v1320_v52 = vmul.f32 %v4106_v61, %v4070_v44  ;;  %vm1326_vm10 = vweird.f32 %v4106_v61 }
 0x289   :  { %2780 = vrsqrt.f32 %v4108_v24  ;;  %1639 = vmatmul.f32.gmra.mxu3 %v4111_v31  ;;  %v1547_v62 = vmul.f32 %v3914_v23, %v1510_v37  ;;  %vm1327_vm12 = vmor %vm1325_vm11, %vm1326_vm10  ;;  %vm1345_vm1 = vweird.f32 %v4108_v24 }
 0x28a   :  { %v1313_v21 = vsub.f32 1.5, %v1312_v17  ;;  %v1321_v63 = vmul.f32 %v4106_v61, %v1320_v52  ;;  %v1155_v7 = vpop.f32.mrf.mxu2  ;;  %v1308_v41 = vsel %vm1307_vm6, %v4068_v32, %v1304_v54  ;;  %v312_v17 = vld [vmem:[#allocation10 + $0xa8] sm:$0xff] }
 0x28b   :  { %v4126_v5 = vpop.eup %2778  ;;  %v4128_v36 = vadd.f32 %v1155_v7, %v1091_v57  ;;  %v4131_v58 = vadd.f32 %v3926_v29, %v1547_v62  ;;  %v1511_v33 = vmul.f32 %v1308_v41, %v3785_v26  ;;  %1843 = vmatpush.msra.mxu2 %v312_v17  ;;  %v1094_v41 = vadd.f32 1e-05, %v1093_v0 }
 0x28c   :  { %v1314_v53 = vmul.f32 %v4088_v27, %v1313_v21  ;;  %v1322_v11 = vmul.f32 0.5, %v1321_v63  ;;  %v1330_v47 = vmul.f32 %v4126_v5, %v4090_v30  ;;  %v963_v48 = vpop.f32.mrf.mxu3  ;;  %v1028_v15 = vpop.f32.mrf.mxu0  ;;  %vm1336_vm13 = vweird.f32 %v4126_v5 }
 0x28d   :  { %2782 = vrsqrt.f32 %v4128_v36  ;;  %v964_v32 = vadd.f32 1e-05, %v963_v48  ;;  %1704 = vmatmul.f32.gmra.mxu0 %v4131_v58  ;;  %v1548_v10 = vmul.f32 %v3901_v13, %v1511_v33  ;;  %vm1337_vm15 = vmor %vm1335_vm14, %vm1336_vm13  ;;  %vm1355_vm4 = vweird.f32 %v4128_v36 }
 0x28e   :  { %v1323_v37 = vsub.f32 1.5, %v1322_v11  ;;  %v1331_v26 = vmul.f32 %v4126_v5, %v1330_v47  ;;  %v1096_v43 = vpop.f32.mrf.mxu1  ;;  %v1318_v54 = vsel %vm1317_vm9, %v4088_v27, %v1314_v53  ;;  %v311_v27 = vld [vmem:[#allocation10 + $0xa0] sm:$0xff] }
 0x28f   :  { %v4144_v52 = vpop.eup %2780  ;;  %v4146_v51 = vadd.f32 %v1028_v15, %v964_v32  ;;  %v4149_v57 = vadd.f32 %v3909_v56, %v1548_v10  ;;  %v1512_v62 = vmul.f32 %v1318_v54, %v3792_v4  ;;  %1778 = vmatpush.msra.mxu1 %v311_v27 }
 0x290   :  { %v1324_v21 = vmul.f32 %v4106_v61, %v1323_v37  ;;  %v1332_v63 = vmul.f32 0.5, %v1331_v26  ;;  %v1340_v7 = vmul.f32 %v4144_v52, %v4108_v24  ;;  %vm1346_vm0 = vweird.f32 %v4144_v52 }
 0x291   :  { %2784 = vrsqrt.f32 %v4146_v51  ;;  %1642 = vmatmul.f32.gmra.mxu3 %v4149_v57  ;;  %v1549_v4 = vmul.f32 %v3914_v23, %v1512_v62  ;;  %vm1347_vm2 = vmor %vm1345_vm1, %vm1346_vm0  ;;  %vm1365_vm7 = vweird.f32 %v4146_v51 }
 0x292   :  { %v1333_v33 = vsub.f32 1.5, %v1332_v63  ;;  %v1341_v44 = vmul.f32 %v4144_v52, %v1340_v7  ;;  %v1158_v53 = vpop.f32.mrf.mxu2  ;;  %v1328_v11 = vsel %vm1327_vm12, %v4106_v61, %v1324_v21  ;;  %v310_v63 = vld [vmem:[#allocation10 + $0x98] sm:$0xff] }
 0x293   :  { %v4164_v47 = vpop.eup %2782  ;;  %v4166_v48 = vadd.f32 %v1158_v53, %v1094_v41  ;;  %v4169_v0 = vadd.f32 %v3926_v29, %v1549_v4  ;;  %v1513_v15 = vmul.f32 %v1328_v11, %v3795_v22  ;;  %1844 = vmatpush.msra.mxu2 %v310_v63  ;;  %v1097_v11 = vadd.f32 1e-05, %v1096_v43 }
 0x294   :  { %v1334_v32 = vmul.f32 %v4126_v5, %v1333_v33  ;;  %v1342_v10 = vmul.f32 0.5, %v1341_v44  ;;  %v1350_v37 = vmul.f32 %v4164_v47, %v4128_v36  ;;  %v966_v26 = vpop.f32.mrf.mxu3  ;;  %v1031_v54 = vpop.f32.mrf.mxu0  ;;  %vm1356_vm3 = vweird.f32 %v4164_v47 }
 0x295   :  { %2786 = vrsqrt.f32 %v4166_v48  ;;  %v967_v61 = vadd.f32 1e-05, %v966_v26  ;;  %1707 = vmatmul.f32.gmra.mxu0 %v4169_v0  ;;  %v1550_v17 = vmul.f32 %v3901_v13, %v1513_v15  ;;  %vm1357_vm5 = vmor %vm1355_vm4, %vm1356_vm3  ;;  %vm1375_vm10 = vweird.f32 %v4166_v48 }
 0x296   :  { %v1343_v62 = vsub.f32 1.5, %v1342_v10  ;;  %v1351_v22 = vmul.f32 %v4164_v47, %v1350_v37  ;;  %v1099_v30 = vpop.f32.mrf.mxu1  ;;  %v1338_v21 = vsel %vm1337_vm15, %v4126_v5, %v1334_v32  ;;  %v309_v5 = vld [vmem:[#allocation10 + $0x90] sm:$0xff] }
 0x297   :  { %v4182_v7 = vpop.eup %2784  ;;  %v4184_v27 = vadd.f32 %v1031_v54, %v967_v61  ;;  %v4187_v41 = vadd.f32 %v3909_v56, %v1550_v17  ;;  %v1514_v4 = vmul.f32 %v1338_v21, %v3802_v16  ;;  %1779 = vmatpush.msra.mxu1 %v309_v5 }
 0x298   :  { %v1344_v33 = vmul.f32 %v4144_v52, %v1343_v62  ;;  %v1352_v44 = vmul.f32 0.5, %v1351_v22  ;;  %v1360_v53 = vmul.f32 %v4182_v7, %v4146_v51  ;;  %vm1366_vm6 = vweird.f32 %v4182_v7 }
 0x299   :  { %4981 = vst [vmem:[#allocation16_spill] sm:$0xff] %v4187_v41  ;;  %2788 = vrsqrt.f32 %v4184_v27  ;;  %1645 = vmatmul.f32.gmra.mxu3 %v4187_v41  ;;  %v1551_v16 = vmul.f32 %v3914_v23, %v1514_v4  ;;  %vm1367_vm8 = vmor %vm1365_vm7, %vm1366_vm6  ;;  %vm1385_vm13 = vweird.f32 %v4184_v27 }
 0x29a   :  { %v1353_v15 = vsub.f32 1.5, %v1352_v44  ;;  %v1361_v24 = vmul.f32 %v4182_v7, %v1360_v53  ;;  %v1161_v32 = vpop.f32.mrf.mxu2  ;;  %v1348_v10 = vsel %vm1347_vm2, %v4144_v52, %v1344_v33  ;;  %v308_v33 = vld [vmem:[#allocation10 + $0x88] sm:$0xff] }
 0x29b   :  { %v4202_v37 = vpop.eup %2786  ;;  %v4204_v26 = vadd.f32 %v1161_v32, %v1097_v11  ;;  %v4207_v43 = vadd.f32 %v3926_v29, %v1551_v16  ;;  %v1515_v54 = vmul.f32 %v1348_v10, %v3805_v46  ;;  %1845 = vmatpush.msra.mxu2 %v308_v33  ;;  %v307_v32 = vld [vmem:[#allocation10 + $0x80] sm:$0xff]  ;;  %v1100_v10 = vadd.f32 1e-05, %v1099_v30 }
 0x29c   :  { %v1354_v61 = vmul.f32 %v4164_v47, %v1353_v15  ;;  %v1362_v17 = vmul.f32 0.5, %v1361_v24  ;;  %v1370_v62 = vmul.f32 %v4202_v37, %v4166_v48  ;;  %v969_v22 = vpop.f32.mrf.mxu3  ;;  %v1034_v21 = vpop.f32.mrf.mxu0  ;;  %1780 = vmatpush.msra.mxu1 %v307_v32  ;;  %vm1376_vm9 = vweird.f32 %v4202_v37 }
 0x29d   :  { %4982 = vst [vmem:[#allocation17_spill] sm:$0xff] %v4207_v43  ;;  %2790 = vrsqrt.f32 %v4204_v26  ;;  %v970_v52 = vadd.f32 1e-05, %v969_v22  ;;  %1710 = vmatmul.f32.gmra.mxu0 %v4207_v43  ;;  %v1552_v63 = vmul.f32 %v3901_v13, %v1515_v54  ;;  %vm1377_vm11 = vmor %vm1375_vm10, %vm1376_vm9  ;;  %vm1395_vm0 = vweird.f32 %v4204_v26 }
 0x29e   :  { %v1358_v46 = vsel %vm1357_vm5, %v4164_v47, %v1354_v61  ;;  %v1363_v4 = vsub.f32 1.5, %v1362_v17  ;;  %v1371_v36 = vmul.f32 %v4202_v37, %v1370_v62  ;;  %v1102_v5 = vpop.f32.mrf.mxu1 }
 0x29f   :  { %v4220_v44 = vpop.eup %2788  ;;  %v4222_v53 = vadd.f32 %v1034_v21, %v970_v52  ;;  %v4225_v11 = vadd.f32 %v3909_v56, %v1552_v63  ;;  %v1516_v16 = vmul.f32 %v1358_v46, %v3812_v25 }
 0x2a0   :  { %v1364_v15 = vmul.f32 %v4182_v7, %v1363_v4  ;;  %v1372_v47 = vmul.f32 0.5, %v1371_v36  ;;  %v1380_v24 = vmul.f32 %v4220_v44, %v4184_v27  ;;  %vm1386_vm12 = vweird.f32 %v4220_v44 }
 0x2a1   :  { %4983 = vst [vmem:[#allocation18_spill] sm:$0xff] %v4225_v11  ;;  %2792 = vrsqrt.f32 %v4222_v53  ;;  %1648 = vmatmul.f32.gmra.mxu3 %v4225_v11  ;;  %v1553_v54 = vmul.f32 %v3914_v23, %v1516_v16  ;;  %vm1387_vm14 = vmor %vm1385_vm13, %vm1386_vm12  ;;  %vm1405_vm3 = vweird.f32 %v4222_v53 }
 0x2a2   :  { %v1373_v25 = vsub.f32 1.5, %v1372_v47  ;;  %v1381_v61 = vmul.f32 %v4220_v44, %v1380_v24  ;;  %v1164_v51 = vpop.f32.mrf.mxu2  ;;  %v1368_v17 = vsel %vm1367_vm8, %v4182_v7, %v1364_v15  ;;  %v306_v15 = vld [vmem:[#allocation10 + $0x78] sm:$0xff] }
 0x2a3   :  { %v4238_v62 = vpop.eup %2790  ;;  %v4240_v22 = vadd.f32 %v1164_v51, %v1100_v10  ;;  %v4243_v30 = vadd.f32 %v3926_v29, %v1553_v54  ;;  %v1517_v21 = vmul.f32 %v1368_v17, %v3815_v3  ;;  %1846 = vmatpush.msra.mxu2 %v306_v15  ;;  %v1103_v51 = vadd.f32 1e-05, %v1102_v5 }
 0x2a4   :  { %v1374_v52 = vmul.f32 %v4202_v37, %v1373_v25  ;;  %v1382_v63 = vmul.f32 0.5, %v1381_v61  ;;  %v1390_v46 = vmul.f32 %v4238_v62, %v4204_v26  ;;  %v972_v4 = vpop.f32.mrf.mxu3  ;;  %v1037_v36 = vpop.f32.mrf.mxu0  ;;  %v305_v61 = vld [vmem:[#allocation10 + $0x70] sm:$0xff]  ;;  %vm1396_vm15 = vweird.f32 %v4238_v62 }
 0x2a5   :  { %4984 = vst [vmem:[#allocation19_spill] sm:$0xff] %v4243_v30  ;;  %2794 = vrsqrt.f32 %v4240_v22  ;;  %v973_v7 = vadd.f32 1e-05, %v972_v4  ;;  %1713 = vmatmul.f32.gmra.mxu0 %v4243_v30  ;;  %v1554_v33 = vmul.f32 %v3901_v13, %v1517_v21  ;;  %1781 = vmatpush.msra.mxu1 %v305_v61  ;;  %vm1397_vm1 = vmor %vm1395_vm0, %vm1396_vm15  ;;  %vm1415_vm6 = vweird.f32 %v4240_v22 }
 0x2a6   :  { %v1378_v3 = vsel %vm1377_vm11, %v4202_v37, %v1374_v52  ;;  %v1383_v16 = vsub.f32 1.5, %v1382_v63  ;;  %v1391_v48 = vmul.f32 %v4238_v62, %v1390_v46  ;;  %v1105_v17 = vpop.f32.mrf.mxu1 }
 0x2a7   :  { %v4256_v47 = vpop.eup %2792  ;;  %v4258_v24 = vadd.f32 %v1037_v36, %v973_v7  ;;  %v4261_v32 = vadd.f32 %v3909_v56, %v1554_v33  ;;  %v1518_v10 = vmul.f32 %v1378_v3, %v3822_v34 }
 0x2a8   :  { %v1384_v54 = vmul.f32 %v4220_v44, %v1383_v16  ;;  %v1392_v37 = vmul.f32 0.5, %v1391_v48  ;;  %v1400_v25 = vmul.f32 %v4256_v47, %v4222_v53  ;;  %vm1406_vm2 = vweird.f32 %v4256_v47 }
 0x2a9   :  { %4985 = vst [vmem:[#allocation20_spill] sm:$0xff] %v4261_v32  ;;  %2796 = vrsqrt.f32 %v4258_v24  ;;  %1651 = vmatmul.f32.gmra.mxu3 %v4261_v32  ;;  %v1555_v21 = vmul.f32 %v3914_v23, %v1518_v10  ;;  %vm1407_vm4 = vmor %vm1405_vm3, %vm1406_vm2  ;;  %vm1425_vm9 = vweird.f32 %v4258_v24 }
 0x2aa   :  { %v1393_v34 = vsub.f32 1.5, %v1392_v37  ;;  %v1401_v27 = vmul.f32 %v4256_v47, %v1400_v25  ;;  %v1167_v52 = vpop.f32.mrf.mxu2  ;;  %v1388_v63 = vsel %vm1387_vm14, %v4220_v44, %v1384_v54  ;;  %v304_v54 = vld [vmem:[#allocation10 + $0x68] sm:$0xff] }
 0x2ab   :  { %v4274_v46 = vpop.eup %2794  ;;  %v4276_v4 = vadd.f32 %v1167_v52, %v1103_v51  ;;  %v4279_v5 = vadd.f32 %v3926_v29, %v1555_v21  ;;  %v1519_v36 = vmul.f32 %v1388_v63, %v3825_v18  ;;  %1847 = vmatpush.msra.mxu2 %v304_v54  ;;  %v1106_v52 = vadd.f32 1e-05, %v1105_v17 }
 0x2ac   :  { %v1394_v7 = vmul.f32 %v4238_v62, %v1393_v34  ;;  %v1402_v33 = vmul.f32 0.5, %v1401_v27  ;;  %v1410_v3 = vmul.f32 %v4274_v46, %v4240_v22  ;;  %v975_v16 = vpop.f32.mrf.mxu3  ;;  %v1040_v48 = vpop.f32.mrf.mxu0  ;;  %v303_v27 = vld [vmem:[#allocation10 + $0x60] sm:$0xff]  ;;  %vm1416_vm5 = vweird.f32 %v4274_v46 }
 0x2ad   :  { %4986 = vst [vmem:[#allocation21_spill] sm:$0xff] %v4279_v5  ;;  %2798 = vrsqrt.f32 %v4276_v4  ;;  %v976_v44 = vadd.f32 1e-05, %v975_v16  ;;  %1716 = vmatmul.f32.gmra.mxu0 %v4279_v5  ;;  %v1556_v15 = vmul.f32 %v3901_v13, %v1519_v36  ;;  %1782 = vmatpush.msra.mxu1 %v303_v27  ;;  %vm1417_vm7 = vmor %vm1415_vm6, %vm1416_vm5  ;;  %vm1435_vm12 = vweird.f32 %v4276_v4 }
 0x2ae   :  { %v1398_v18 = vsel %vm1397_vm1, %v4238_v62, %v1394_v7  ;;  %v1403_v10 = vsub.f32 1.5, %v1402_v33  ;;  %v1411_v26 = vmul.f32 %v4274_v46, %v1410_v3  ;;  %v1108_v3 = vpop.f32.mrf.mxu1 }
 0x2af   :  { %v4292_v37 = vpop.eup %2796  ;;  %v4294_v25 = vadd.f32 %v1040_v48, %v976_v44  ;;  %v4297_v61 = vadd.f32 %v3909_v56, %v1556_v15  ;;  %v1520_v51 = vmul.f32 %v1398_v18, %v3832_v40 }
 0x2b0   :  { %v1404_v21 = vmul.f32 %v4256_v47, %v1403_v10  ;;  %v1412_v62 = vmul.f32 0.5, %v1411_v26  ;;  %v1420_v34 = vmul.f32 %v4292_v37, %v4258_v24  ;;  %vm1426_vm8 = vweird.f32 %v4292_v37  ;;  %v297_v24 = vld [vmem:[#allocation10 + $0x30] sm:$0xff] }
 0x2b1   :  { %4987 = vst [vmem:[#allocation22_spill] sm:$0xff] %v4297_v61  ;;  %2800 = vrsqrt.f32 %v4294_v25  ;;  %1654 = vmatmul.f32.gmra.mxu3 %v4297_v61  ;;  %v1557_v63 = vmul.f32 %v3914_v23, %v1520_v51  ;;  %vm4344_vm10 = vmor %vm1425_vm9, %vm1426_vm8  ;;  %vm1445_vm15 = vweird.f32 %v4294_v25 }
 0x2b2   :  { %v1413_v40 = vsub.f32 1.5, %v1412_v62  ;;  %v1421_v36 = vmul.f32 %v4292_v37, %v1420_v34  ;;  %v1170_v53 = vpop.f32.mrf.mxu2  ;;  %v1408_v7 = vsel %vm1407_vm4, %v4256_v47, %v1404_v21  ;;  %v302_v21 = vld [vmem:[#allocation10 + $0x58] sm:$0xff]  ;;  %v301_v62 = vld [vmem:[#allocation10 + $0x50] sm:$0xff]  ;;  %v300_v34 = vld [vmem:[#allocation10 + $0x48] sm:$0xff] }
 0x2b3   :  { %v4310_v33 = vpop.eup %2798  ;;  %v4312_v16 = vadd.f32 %v1170_v53, %v1106_v52  ;;  %v4315_v17 = vadd.f32 %v3926_v29, %v1557_v63  ;;  %v1521_v48 = vmul.f32 %v1408_v7, %v3835_v42  ;;  %1848 = vmatpush.msra.mxu2 %v302_v21  ;;  %1783 = vmatpush.msra.mxu1 %v301_v62 }
 0x2b4   :  { %v1414_v44 = vmul.f32 %v4274_v46, %v1413_v40  ;;  %v1422_v15 = vmul.f32 0.5, %v1421_v36  ;;  %v1430_v18 = vmul.f32 %v4310_v33, %v4276_v4  ;;  %v978_v10 = vpop.f32.mrf.mxu3  ;;  %v1043_v47 = vpop.f32.mrf.mxu0  ;;  %vm1436_vm11 = vweird.f32 %v4310_v33  ;;  %v295_v4 = vld [vmem:[#allocation10 + $0x20] sm:$0xff] }
 0x2b5   :  { %4988 = vst [vmem:[#allocation23_spill] sm:$0xff] %v4315_v17  ;;  %2802 = vrsqrt.f32 %v4312_v16  ;;  %v979_v26 = vadd.f32 1e-05, %v978_v10  ;;  %1719 = vmatmul.f32.gmra.mxu0 %v4315_v17  ;;  %v1558_v42 = vmul.f32 %v3901_v13, %v1521_v48  ;;  %v298_v48 = vld [vmem:[#allocation10 + $0x38] sm:$0xff]  ;;  %1849 = vmatpush.msra.mxu2 %v300_v34  ;;  %vm4370_vm13 = vmor %vm1435_vm12, %vm1436_vm11  ;;  %vm1455_vm2 = vweird.f32 %v4312_v16 }
 0x2b6   :  { %v1418_v54 = vsel %vm1417_vm7, %v4274_v46, %v1414_v44  ;;  %v1423_v51 = vsub.f32 1.5, %v1422_v15  ;;  %v1431_v22 = vmul.f32 %v4310_v33, %v1430_v18  ;;  %v299_v46 = vld [vmem:[#allocation10 + $0x40] sm:$0xff]  ;;  %v1109_v15 = vadd.f32 1e-05, %v1108_v3  ;;  %v296_v3 = vld [vmem:[#allocation10 + $0x28] sm:$0xff] }
 0x2b7   :  { %v4330_v27 = vpop.eup %2800  ;;  %v4332_v52 = vadd.f32 %v1043_v47, %v979_v26  ;;  %v4335_v63 = vadd.f32 %v3909_v56, %v1558_v42  ;;  %v1522_v40 = vmul.f32 %v1418_v54, %v3842_v59  ;;  %1784 = vmatpush.msra.mxu1 %v299_v46  ;;  %1850 = vmatpush.msra.mxu2 %v298_v48  ;;  %v1111_v48 = vpop.f32.mrf.mxu1 }
 0x2b8   :  { %v1424_v36 = vmul.f32 %v4292_v37, %v1423_v51  ;;  %v1432_v53 = vmul.f32 0.5, %v1431_v22  ;;  %v1440_v7 = vmul.f32 %v4330_v27, %v4294_v25  ;;  %vm1446_vm14 = vweird.f32 %v4330_v27 }
 0x2b9   :  { %4989 = vst [vmem:[#allocation24_spill] sm:$0xff] %v4335_v63  ;;  %2804 = vrsqrt.f32 %v4332_v52  ;;  %1657 = vmatmul.f32.gmra.mxu3 %v4335_v63  ;;  %v1559_v59 = vmul.f32 %v3914_v23, %v1522_v40  ;;  %1785 = vmatpush.msra.mxu1 %v297_v24  ;;  %vm1447_vm0 = vmor %vm1445_vm15, %vm1446_vm14  ;;  %vm1465_vm5 = vweird.f32 %v4332_v52 }
 0x2ba   :  { %v1433_v18 = vsub.f32 1.5, %v1432_v53  ;;  %v1441_v10 = vmul.f32 %v4330_v27, %v1440_v7  ;;  %v1173_v47 = vpop.f32.mrf.mxu2  ;;  %v1428_v26 = vsel %vm4344_vm10, %v4292_v37, %v1424_v36  ;;  %1851 = vmatpush.msra.mxu2 %v296_v3 }
 0x2bb   :  { %v4356_v42 = vpop.eup %2802  ;;  %v4358_v54 = vadd.f32 %v1173_v47, %v1109_v15  ;;  %v4361_v51 = vadd.f32 %v3926_v29, %v1559_v59  ;;  %v1523_v22 = vmul.f32 %v1428_v26, %v3845_v49  ;;  %1786 = vmatpush.msra.mxu1 %v295_v4  ;;  %v1112_v26 = vadd.f32 1e-05, %v1111_v48 }
 0x2bc   :  { %v1434_v21 = vmul.f32 %v4310_v33, %v1433_v18  ;;  %v1442_v62 = vmul.f32 0.5, %v1441_v10  ;;  %v1450_v37 = vmul.f32 %v4356_v42, %v4312_v16  ;;  %v981_v34 = vpop.f32.mrf.mxu3  ;;  %v1046_v44 = vpop.f32.mrf.mxu0  ;;  %vm1456_vm1 = vweird.f32 %v4356_v42 }
 0x2bd   :  { %4992 = vst [vmem:[#allocation25_spill] sm:$0xff] %v4361_v51  ;;  %2806 = vrsqrt.f32 %v4358_v54  ;;  %v982_v49 = vadd.f32 1e-05, %v981_v34  ;;  %1722 = vmatmul.f32.gmra.mxu0 %v4361_v51  ;;  %v1560_v46 = vmul.f32 %v3901_v13, %v1523_v22  ;;  %vm1457_vm3 = vmor %vm1455_vm2, %vm1456_vm1  ;;  %vm1475_vm8 = vweird.f32 %v4358_v54 }
 0x2be   :  { %v1438_v36 = vsel %vm4370_vm13, %v4310_v33, %v1434_v21  ;;  %v1443_v53 = vsub.f32 1.5, %v1442_v62  ;;  %v1451_v7 = vmul.f32 %v4356_v42, %v1450_v37  ;;  %v294_v37 = vld [vmem:[#allocation10 + $0x18] sm:$0xff] }
 0x2bf   :  { %v2805_v15 = vpop.eup %2804  ;;  %v4382_v59 = vadd.f32 %v1046_v44, %v982_v49  ;;  %v4385_v24 = vadd.f32 %v3909_v56, %v1560_v46  ;;  %v1524_v18 = vmul.f32 %v1438_v36, %v3852_v9  ;;  %1852 = vmatpush.msra.mxu2 %v294_v37 }
 0x2c0   :  { %v1444_v10 = vmul.f32 %v4330_v27, %v1443_v53  ;;  %v1452_v33 = vmul.f32 0.5, %v1451_v7  ;;  %v1460_v47 = vmul.f32 %v2805_v15, %v4332_v52  ;;  %vm1466_vm4 = vweird.f32 %v2805_v15 }
 0x2c1   :  { %4995 = vst [vmem:[#allocation26_spill] sm:$0xff] %v4385_v24  ;;  %2808 = vrsqrt.f32 %v4382_v59  ;;  %1660 = vmatmul.f32.gmra.mxu3 %v4385_v24  ;;  %v1561_v3 = vmul.f32 %v3914_v23, %v1524_v18  ;;  %vm1467_vm6 = vmor %vm1465_vm5, %vm1466_vm4  ;;  %vm1485_vm11 = vweird.f32 %v4382_v59 }
 0x2c2   :  { %v1453_v22 = vsub.f32 1.5, %v1452_v33  ;;  %v1461_v21 = vmul.f32 %v2805_v15, %v1460_v47  ;;  %v1176_v9 = vpop.f32.mrf.mxu2  ;;  %v1448_v62 = vsel %vm1447_vm0, %v4330_v27, %v1444_v10 }
 0x2c3   :  { %v2807_v25 = vpop.eup %2806  ;;  %v4396_v34 = vadd.f32 %v1176_v9, %v1112_v26  ;;  %v4399_v40 = vadd.f32 %v3926_v29, %v1561_v3  ;;  %v1525_v49 = vmul.f32 %v1448_v62, %v3855_v55 }
 0x2c4   :  { %v1454_v46 = vmul.f32 %v4356_v42, %v1453_v22  ;;  %v1462_v4 = vmul.f32 0.5, %v1461_v21  ;;  %v1470_v36 = vmul.f32 %v2807_v25, %v4358_v54  ;;  %vm1476_vm7 = vweird.f32 %v2807_v25 }
 0x2c5   :  { %4996 = vst [vmem:[#allocation27_spill] sm:$0xff] %v4399_v40  ;;  %2810 = vrsqrt.f32 %v4396_v34  ;;  %1725 = vmatmul.f32.gmra.mxu0 %v4399_v40  ;;  %v1562_v27 = vmul.f32 %v3901_v13, %v1525_v49  ;;  %vm1477_vm9 = vmor %vm1475_vm8, %vm1476_vm7  ;;  %vm1495_vm14 = vweird.f32 %v4396_v34 }
 0x2c6   :  { %v1458_v53 = vsel %vm1457_vm3, %v4356_v42, %v1454_v46  ;;  %v1463_v7 = vsub.f32 1.5, %v1462_v4  ;;  %v1471_v55 = vmul.f32 %v2807_v25, %v1470_v36  ;;  %v293_v4 = vld [vmem:[#allocation10 + $0x10] sm:$0xff] }
 0x2c7   :  { %v2809_v48 = vpop.eup %2808  ;;  %v4410_v44 = vadd.f32 %v3909_v56, %v1562_v27  ;;  %v1526_v16 = vmul.f32 %v1458_v53, %v3862_v35  ;;  %1787 = vmatpush.msra.mxu1 %v293_v4  ;;  %v292_v53 = vld [vmem:[#allocation10 + $0x8] sm:$0xff] }
 0x2c8   :  { %v1464_v18 = vmul.f32 %v2805_v15, %v1463_v7  ;;  %v1472_v10 = vmul.f32 0.5, %v1471_v55  ;;  %v1480_v33 = vmul.f32 %v2809_v48, %v4382_v59  ;;  %vm1486_vm10 = vweird.f32 %v2809_v48  ;;  %v291_v7 = vld [vmem:[#allocation10] sm:$0xff]  ;;  %1853 = vmatpush.msra.mxu2 %v292_v53 }
 0x2c9   :  { %4997 = vst [vmem:[#allocation28_spill] sm:$0xff] %v4410_v44  ;;  %1663 = vmatmul.f32.gmra.mxu3 %v4410_v44  ;;  %v1563_v42 = vmul.f32 %v3914_v23, %v1526_v16  ;;  %vm1487_vm12 = vmor %vm1485_vm11, %vm1486_vm10  ;;  %1788 = vmatpush.msra.mxu1 %v291_v7 }
 0x2ca   :  { %v1473_v47 = vsub.f32 1.5, %v1472_v10  ;;  %v1481_v26 = vmul.f32 %v2809_v48, %v1480_v33  ;;  %v1468_v3 = vsel %vm1467_vm6, %v2805_v15, %v1464_v18 }
 0x2cb   :  { %v2811_v22 = vpop.eup %2810  ;;  %v4418_v21 = vadd.f32 %v3926_v29, %v1563_v42  ;;  %v1527_v35 = vmul.f32 %v1468_v3, %v3865_v38 }
 0x2cc   :  { %v1474_v9 = vmul.f32 %v2807_v25, %v1473_v47  ;;  %v1482_v52 = vmul.f32 0.5, %v1481_v26  ;;  %v1490_v62 = vmul.f32 %v2811_v22, %v4396_v34  ;;  %vm1496_vm13 = vweird.f32 %v2811_v22  ;;  %v4452_v34 = vld [vmem:[%s4953_s8] ss:$0 sm:$0xff] }
 0x2cd   :  { %4998 = vst [vmem:[#allocation29_spill] sm:$0xff] %v4418_v21  ;;  %1728 = vmatmul.f32.gmra.mxu0 %v4418_v21  ;;  %v1564_v37 = vmul.f32 %v3901_v13, %v1527_v35  ;;  %vm1497_vm15 = vmor %vm1495_vm14, %vm1496_vm13 }
 0x2ce   :  { %v1478_v49 = vsel %vm1477_vm9, %v2807_v25, %v1474_v9  ;;  %v1483_v46 = vsub.f32 1.5, %v1482_v52  ;;  %v1491_v15 = vmul.f32 %v2811_v22, %v1490_v62 }
 0x2cf   :  { %v4426_v36 = vadd.f32 %v3909_v56, %v1564_v37  ;;  %v1528_v38 = vmul.f32 %v1478_v49, %v3872_v50 }
 0x2d0   :  { %v1484_v54 = vmul.f32 %v2809_v48, %v1483_v46  ;;  %v1492_v27 = vmul.f32 0.5, %v1491_v15 }
 0x2d1   :  { %4999 = vst [vmem:[#allocation30_spill] sm:$0xff] %v4426_v36  ;;  %1666 = vmatmul.f32.gmra.mxu3 %v4426_v36  ;;  %v1565_v25 = vmul.f32 %v3914_v23, %v1528_v38 }
 0x2d2   :  { %v1493_v55 = vsub.f32 1.5, %v1492_v27  ;;  %v1488_v16 = vsel %vm1487_vm12, %v2809_v48, %v1484_v54 }
 0x2d3   :  { %v4433_v18 = vadd.f32 %v3926_v29, %v1565_v25  ;;  %v1529_v50 = vmul.f32 %v1488_v16, %v3875_v14 }
 0x2d4   :  { %v1494_v10 = vmul.f32 %v2811_v22, %v1493_v55 }
 0x2d5   :  { %5000 = vst [vmem:[#allocation31_spill] sm:$0xff] %v4433_v18  ;;  %1731 = vmatmul.f32.gmra.mxu0 %v4433_v18  ;;  %v1566_v59 = vmul.f32 %v3901_v13, %v1529_v50 }
 0x2d6   :  { %v1498_v33 = vsel %vm1497_vm15, %v2811_v22, %v1494_v10 }
 0x2d7   :  { %v4440_v42 = vadd.f32 %v3909_v56, %v1566_v59  ;;  %v1530_v48 = vmul.f32 %v1498_v33, %v3882_v60 }
 0x2d9   :  { %5001 = vst [vmem:[#allocation32_spill] sm:$0xff] %v4440_v42  ;;  %1669 = vmatmul.f32.gmra.mxu3 %v4440_v42  ;;  %v1567_v47 = vmul.f32 %v3914_v23, %v1530_v48  ;;  %v4458_v23 = vld [vmem:[%s4954_s9] ss:$0 sm:$0xff] }
 0x2db   :  { %v4446_v14 = vadd.f32 %v3926_v29, %v1567_v47 }
 0x2dd   :  { %5002 = vst [vmem:[#allocation33_spill] sm:$0xff] %v4446_v14  ;;  %1734 = vmatmul.f32.gmra.mxu0 %v4446_v14 }
 0x2e2   :  { %v1690_v13 = vpop.f32.mrf.mxu0 }
 0x2e4   :  { %v1625_v26 = vpop.f32.mrf.mxu3 }
 0x2e5   :  { %v1626_v56 = vadd.f32 %v4452_v34, %v1625_v26 }
 0x2e7   :  { %v1691_v3 = vadd.f32 %v1690_v13, %v1626_v56 }
 0x2e9   :  { %2812 = vtanh.f32 %v1691_v3 }
 0x2ea   :  { %v1693_v60 = vpop.f32.mrf.mxu0 }
 0x2ec   :  { %v1628_v29 = vpop.f32.mrf.mxu3 }
 0x2ed   :  { %v1629_v22 = vadd.f32 %v4452_v34, %v1628_v29 }
 0x2ef   :  { %v2813_v35 = vpop.eup %2812  ;;  %v1694_v9 = vadd.f32 %v1693_v60, %v1629_v22 }
 0x2f0   :  { %v1757_v52 = vmul.f32 %v2813_v35, %v4458_v23 }
 0x2f1   :  { %2814 = vtanh.f32 %v1694_v9 }
 0x2f2   :  { %v1696_v62 = vpop.f32.mrf.mxu0  ;;  %1789 = vmatmul.f32.vlgmr.msra.gmra.mxu1 %v1757_v52  ;;  %1854 = vmatmul.f32.vlgmr.msra.gmra.mxu2 %v1757_v52 }
 0x2f4   :  { %v1631_v37 = vpop.f32.mrf.mxu3 }
 0x2f5   :  { %v1632_v49 = vadd.f32 %v4452_v34, %v1631_v37 }
 0x2f7   :  { %v2815_v46 = vpop.eup %2814  ;;  %v1697_v15 = vadd.f32 %v1696_v62, %v1632_v49 }
 0x2f8   :  { %v1758_v4 = vmul.f32 %v2815_v46, %v4458_v23 }
 0x2f9   :  { %2816 = vtanh.f32 %v1697_v15 }
 0x2fa   :  { %v1699_v38 = vpop.f32.mrf.mxu0  ;;  %1792 = vmatmul.f32.gmra.mxu1 %v1758_v4  ;;  %1857 = vmatmul.f32.gmra.mxu2 %v1758_v4 }
 0x2fc   :  { %v1634_v54 = vpop.f32.mrf.mxu3 }
 0x2fd   :  { %v1635_v27 = vadd.f32 %v4452_v34, %v1634_v54 }
 0x2ff   :  { %v2817_v53 = vpop.eup %2816  ;;  %v1700_v7 = vadd.f32 %v1699_v38, %v1635_v27 }
 0x300   :  { %v1759_v25 = vmul.f32 %v2817_v53, %v4458_v23 }
 0x301   :  { %2818 = vtanh.f32 %v1700_v7 }
 0x302   :  { %v1702_v55 = vpop.f32.mrf.mxu0  ;;  %1795 = vmatmul.f32.gmra.mxu1 %v1759_v25  ;;  %1860 = vmatmul.f32.gmra.mxu2 %v1759_v25 }
 0x304   :  { %v1637_v16 = vpop.f32.mrf.mxu3 }
 0x305   :  { %v1638_v50 = vadd.f32 %v4452_v34, %v1637_v16 }
 0x307   :  { %v2819_v10 = vpop.eup %2818  ;;  %v1703_v59 = vadd.f32 %v1702_v55, %v1638_v50 }
 0x308   :  { %v1760_v33 = vmul.f32 %v2819_v10, %v4458_v23 }
 0x309   :  { %2820 = vtanh.f32 %v1703_v59 }
 0x30a   :  { %v1705_v48 = vpop.f32.mrf.mxu0  ;;  %1798 = vmatmul.f32.gmra.mxu1 %v1760_v33  ;;  %1863 = vmatmul.f32.gmra.mxu2 %v1760_v33 }
 0x30c   :  { %v1640_v47 = vpop.f32.mrf.mxu3 }
 0x30d   :  { %v1641_v13 = vadd.f32 %v4452_v34, %v1640_v47 }
 0x30f   :  { %v2821_v26 = vpop.eup %2820  ;;  %v1706_v56 = vadd.f32 %v1705_v48, %v1641_v13 }
 0x310   :  { %v1761_v3 = vmul.f32 %v2821_v26, %v4458_v23 }
 0x311   :  { %2822 = vtanh.f32 %v1706_v56 }
 0x312   :  { %v1708_v60 = vpop.f32.mrf.mxu0  ;;  %1801 = vmatmul.f32.gmra.mxu1 %v1761_v3  ;;  %1866 = vmatmul.f32.gmra.mxu2 %v1761_v3 }
 0x314   :  { %v1643_v29 = vpop.f32.mrf.mxu3 }
 0x315   :  { %v1644_v22 = vadd.f32 %v4452_v34, %v1643_v29 }
 0x317   :  { %v2823_v35 = vpop.eup %2822  ;;  %v1709_v9 = vadd.f32 %v1708_v60, %v1644_v22 }
 0x318   :  { %v1762_v52 = vmul.f32 %v2823_v35, %v4458_v23 }
 0x319   :  { %2824 = vtanh.f32 %v1709_v9 }
 0x31a   :  { %v1711_v62 = vpop.f32.mrf.mxu0  ;;  %1804 = vmatmul.f32.gmra.mxu1 %v1762_v52  ;;  %1869 = vmatmul.f32.gmra.mxu2 %v1762_v52 }
 0x31c   :  { %v1646_v37 = vpop.f32.mrf.mxu3 }
 0x31d   :  { %v1647_v49 = vadd.f32 %v4452_v34, %v1646_v37 }
 0x31f   :  { %v2825_v46 = vpop.eup %2824  ;;  %v1712_v15 = vadd.f32 %v1711_v62, %v1647_v49 }
 0x320   :  { %v1763_v4 = vmul.f32 %v2825_v46, %v4458_v23 }
 0x321   :  { %2826 = vtanh.f32 %v1712_v15 }
 0x322   :  { %v1714_v38 = vpop.f32.mrf.mxu0  ;;  %1807 = vmatmul.f32.gmra.mxu1 %v1763_v4  ;;  %1872 = vmatmul.f32.gmra.mxu2 %v1763_v4 }
 0x324   :  { %v1649_v54 = vpop.f32.mrf.mxu3 }
 0x325   :  { %v1650_v27 = vadd.f32 %v4452_v34, %v1649_v54 }
 0x327   :  { %v2827_v53 = vpop.eup %2826  ;;  %v1715_v7 = vadd.f32 %v1714_v38, %v1650_v27 }
 0x328   :  { %v1764_v25 = vmul.f32 %v2827_v53, %v4458_v23 }
 0x329   :  { %2828 = vtanh.f32 %v1715_v7 }
 0x32a   :  { %v1717_v55 = vpop.f32.mrf.mxu0  ;;  %1810 = vmatmul.f32.gmra.mxu1 %v1764_v25  ;;  %1875 = vmatmul.f32.gmra.mxu2 %v1764_v25 }
 0x32c   :  { %v1652_v16 = vpop.f32.mrf.mxu3 }
 0x32d   :  { %v1653_v50 = vadd.f32 %v4452_v34, %v1652_v16 }
 0x32f   :  { %v2829_v10 = vpop.eup %2828  ;;  %v1718_v59 = vadd.f32 %v1717_v55, %v1653_v50 }
 0x330   :  { %v1765_v33 = vmul.f32 %v2829_v10, %v4458_v23 }
 0x331   :  { %2830 = vtanh.f32 %v1718_v59 }
 0x332   :  { %v1720_v48 = vpop.f32.mrf.mxu0  ;;  %1813 = vmatmul.f32.gmra.mxu1 %v1765_v33  ;;  %1878 = vmatmul.f32.gmra.mxu2 %v1765_v33 }
 0x334   :  { %v1655_v47 = vpop.f32.mrf.mxu3 }
 0x335   :  { %v1656_v13 = vadd.f32 %v4452_v34, %v1655_v47 }
 0x337   :  { %v2831_v26 = vpop.eup %2830  ;;  %v1721_v56 = vadd.f32 %v1720_v48, %v1656_v13 }
 0x338   :  { %v1766_v3 = vmul.f32 %v2831_v26, %v4458_v23 }
 0x339   :  { %2832 = vtanh.f32 %v1721_v56 }
 0x33a   :  { %v1723_v60 = vpop.f32.mrf.mxu0  ;;  %1816 = vmatmul.f32.gmra.mxu1 %v1766_v3  ;;  %1881 = vmatmul.f32.gmra.mxu2 %v1766_v3 }
 0x33c   :  { %v1658_v29 = vpop.f32.mrf.mxu3 }
 0x33d   :  { %v1659_v22 = vadd.f32 %v4452_v34, %v1658_v29 }
 0x33f   :  { %v2833_v35 = vpop.eup %2832  ;;  %v1724_v9 = vadd.f32 %v1723_v60, %v1659_v22 }
 0x340   :  { %v1767_v52 = vmul.f32 %v2833_v35, %v4458_v23 }
 0x341   :  { %2834 = vtanh.f32 %v1724_v9 }
 0x342   :  { %v1726_v62 = vpop.f32.mrf.mxu0  ;;  %1819 = vmatmul.f32.gmra.mxu1 %v1767_v52  ;;  %1884 = vmatmul.f32.gmra.mxu2 %v1767_v52 }
 0x344   :  { %v1661_v37 = vpop.f32.mrf.mxu3 }
 0x345   :  { %v1662_v49 = vadd.f32 %v4452_v34, %v1661_v37 }
 0x347   :  { %v2835_v46 = vpop.eup %2834  ;;  %v1727_v15 = vadd.f32 %v1726_v62, %v1662_v49 }
 0x348   :  { %v1768_v4 = vmul.f32 %v2835_v46, %v4458_v23 }
 0x349   :  { %2836 = vtanh.f32 %v1727_v15 }
 0x34a   :  { %v1729_v38 = vpop.f32.mrf.mxu0  ;;  %1822 = vmatmul.f32.gmra.mxu1 %v1768_v4  ;;  %1887 = vmatmul.f32.gmra.mxu2 %v1768_v4 }
 0x34c   :  { %v1664_v54 = vpop.f32.mrf.mxu3 }
 0x34d   :  { %v1665_v27 = vadd.f32 %v4452_v34, %v1664_v54 }
 0x34f   :  { %v2837_v53 = vpop.eup %2836  ;;  %v1730_v7 = vadd.f32 %v1729_v38, %v1665_v27 }
 0x350   :  { %v1769_v25 = vmul.f32 %v2837_v53, %v4458_v23 }
 0x351   :  { %2838 = vtanh.f32 %v1730_v7 }
 0x352   :  { %1825 = vmatmul.f32.gmra.mxu1 %v1769_v25  ;;  %1890 = vmatmul.f32.gmra.mxu2 %v1769_v25  ;;  %v1732_v55 = vpop.f32.mrf.mxu0 }
 0x354   :  { %v1667_v16 = vpop.f32.mrf.mxu3 }
 0x355   :  { %v1668_v50 = vadd.f32 %v4452_v34, %v1667_v16 }
 0x357   :  { %v2839_v10 = vpop.eup %2838  ;;  %v1733_v59 = vadd.f32 %v1732_v55, %v1668_v50 }
 0x358   :  { %v1770_v33 = vmul.f32 %v2839_v10, %v4458_v23 }
 0x359   :  { %2840 = vtanh.f32 %v1733_v59 }
 0x35a   :  { %1828 = vmatmul.f32.gmra.mxu1 %v1770_v33  ;;  %1893 = vmatmul.f32.gmra.mxu2 %v1770_v33  ;;  %v1735_v13 = vpop.f32.mrf.mxu0 }
 0x35c   :  { %v1670_v48 = vpop.f32.mrf.mxu3 }
 0x35d   :  { %v1671_v47 = vadd.f32 %v4452_v34, %v1670_v48 }
 0x35f   :  { %v2841_v26 = vpop.eup %2840  ;;  %v1736_v56 = vadd.f32 %v1735_v13, %v1671_v47 }
 0x360   :  { %v1771_v3 = vmul.f32 %v2841_v26, %v4458_v23 }
 0x361   :  { %2842 = vtanh.f32 %v1736_v56 }
 0x362   :  { %1831 = vmatmul.f32.gmra.mxu1 %v1771_v3  ;;  %1896 = vmatmul.f32.gmra.mxu2 %v1771_v3 }
 0x367   :  { %v2843_v60 = vpop.eup %2842 }
 0x368   :  { %v1772_v29 = vmul.f32 %v2843_v60, %v4458_v23 }
 0x36a   :  { %1834 = vmatmul.f32.gmra.mxu1 %v1772_v29  ;;  %1899 = vmatmul.f32.gmra.mxu2 %v1772_v29 }
 0x36f   :  { %v1790_v22 = vpop.f32.mrf.mxu1 }
 0x375   :  { %v1855_v35 = vpop.f32.mrf.mxu2 }
 0x376   :  { %v1903_v9 = vmax.f32 %v1790_v22, %v1855_v35 }
 0x377   :  { %v1793_v52 = vpop.f32.mrf.mxu1 }
 0x378   :  { %1904 = vmax.xlane.f32.xlu0 %v1903_v9 }
 0x37d   :  { %v1858_v62 = vpop.f32.mrf.mxu2 }
 0x37e   :  { %v1906_v34 = vmax.f32 %v1793_v52, %v1858_v62 }
 0x37f   :  { %v1796_v37 = vpop.f32.mrf.mxu1 }
 0x380   :  { %1907 = vmax.xlane.f32.xlu0 %v1906_v34 }
 0x385   :  { %v1861_v49 = vpop.f32.mrf.mxu2 }
 0x386   :  { %v1909_v46 = vmax.f32 %v1796_v37, %v1861_v49 }
 0x387   :  { %v1799_v15 = vpop.f32.mrf.mxu1 }
 0x388   :  { %1910 = vmax.xlane.f32.xlu1 %v1909_v46 }
 0x38d   :  { %v1864_v4 = vpop.f32.mrf.mxu2 }
 0x38e   :  { %v1912_v38 = vmax.f32 %v1799_v15, %v1864_v4 }
 0x38f   :  { %v4491_v54 = vpop.f32.mrf.mxu1 }
 0x390   :  { %1913 = vmax.xlane.f32.xlu1 %v1912_v38 }
 0x395   :  { %v4493_v23 = vpop.f32.mrf.mxu2 }
 0x396   :  { %v1915_v27 = vmax.f32 %v4491_v54, %v4493_v23 }
 0x397   :  { %v4497_v53 = vpop.f32.mrf.mxu1 }
 0x398   :  { %1916 = vmax.xlane.f32.xlu2 %v1915_v27 }
 0x39d   :  { %v4499_v7 = vpop.f32.mrf.mxu2 }
 0x39e   :  { %v1918_v25 = vmax.f32 %v4497_v53, %v4499_v7 }
 0x39f   :  { %v4503_v55 = vpop.f32.mrf.mxu1 }
 0x3a0   :  { %1919 = vmax.xlane.f32.xlu2 %v1918_v25 }
 0x3a5   :  { %v4505_v16 = vpop.f32.mrf.mxu2 }
 0x3a6   :  { %v1921_v50 = vmax.f32 %v4503_v55, %v4505_v16 }
 0x3a7   :  { %v4509_v10 = vpop.f32.mrf.mxu1 }
 0x3a8   :  { %1922 = vmax.xlane.f32.xlu0 %v1921_v50 }
 0x3ad   :  { %v4511_v59 = vpop.f32.mrf.mxu2 }
 0x3ae   :  { %v1924_v33 = vmax.f32 %v4509_v10, %v4511_v59 }
 0x3af   :  { %v4517_v60 = vpop.f32.mrf.mxu1 }
 0x3b0   :  { %1925 = vmax.xlane.f32.xlu2 %v1924_v33 }
 0x3b5   :  { %v4515_v3 = vpop.f32.mrf.mxu2 }
 0x3b7   :  { %v4527_v50 = vpop.f32.mrf.mxu1 }
 0x3eb   :  { %v1905_v48 = vpop.xlane.xlu0 %1904 }
 0x3ec   :  { %v1951_v47 = vsub.f32 %v1790_v22, %v1905_v48  ;;  %v1952_v13 = vsub.f32 %v1855_v35, %v1905_v48  ;;  %v4525_v35 = vpop.f32.mrf.mxu2 }
 0x3ee   :  { %v1983_v26 = vmul.f32 1.442695, %v1951_v47  ;;  %v1985_v56 = vmul.f32 1.442695, %v1952_v13 }
 0x3f0   :  { %2844 = vpow2.f32 %v1983_v26 }
 0x3f1   :  { %2846 = vpow2.f32 %v1985_v56 }
 0x3f3   :  { %v1908_v29 = vpop.xlane.xlu0 %1907 }
 0x3f4   :  { %v1953_v9 = vsub.f32 %v1793_v52, %v1908_v29  ;;  %v1954_v34 = vsub.f32 %v1858_v62, %v1908_v29  ;;  %v1927_v29 = vmax.f32 %v4517_v60, %v4515_v3 }
 0x3f6   :  { %v4519_v46 = vpop.eup %2844  ;;  %v1987_v38 = vmul.f32 1.442695, %v1953_v9  ;;  %v1989_v27 = vmul.f32 1.442695, %v1954_v34  ;;  %v4537_v9 = vpop.f32.mrf.mxu2 }
 0x3f7   :  { %v4521_v25 = vpop.eup %2846 }
 0x3f8   :  { %2848 = vpow2.f32 %v1987_v38  ;;  %v2047_v22 = vadd.f32 %v4521_v25, %v4519_v46  ;;  %v4539_v38 = vpop.f32.mrf.mxu1 }
 0x3f9   :  { %2850 = vpow2.f32 %v1989_v27 }
 0x3fa   :  { %2048 = vadd.xlane.f32.xlu1 %v2047_v22 }
 0x3fb   :  { %v1911_v33 = vpop.xlane.xlu1 %1910 }
 0x3fc   :  { %v1955_v48 = vsub.f32 %v1796_v37, %v1911_v33  ;;  %v1956_v52 = vsub.f32 %v1861_v49, %v1911_v33 }
 0x3fe   :  { %v4529_v62 = vpop.eup %2848  ;;  %v1991_v47 = vmul.f32 1.442695, %v1955_v48  ;;  %v1993_v13 = vmul.f32 1.442695, %v1956_v52 }
 0x3ff   :  { %v4531_v26 = vpop.eup %2850 }
 0x400   :  { %2852 = vpow2.f32 %v1991_v47  ;;  %v2050_v56 = vadd.f32 %v4531_v26, %v4529_v62  ;;  %v1930_v47 = vmax.f32 %v4527_v50, %v4525_v35 }
 0x401   :  { %2854 = vpow2.f32 %v1993_v13 }
 0x402   :  { %2051 = vadd.xlane.f32.xlu0 %v2050_v56  ;;  %1928 = vmax.xlane.f32.xlu1 %v1927_v29  ;;  %v4551_v56 = vpop.f32.mrf.mxu2 }
 0x403   :  { %v1914_v37 = vpop.xlane.xlu1 %1913 }
 0x404   :  { %v1957_v49 = vsub.f32 %v1799_v15, %v1914_v37  ;;  %v1958_v34 = vsub.f32 %v1864_v4, %v1914_v37 }
 0x406   :  { %v4541_v27 = vpop.eup %2852  ;;  %v1995_v22 = vmul.f32 1.442695, %v1957_v49  ;;  %v1997_v33 = vmul.f32 1.442695, %v1958_v34 }
 0x407   :  { %v4543_v48 = vpop.eup %2854 }
 0x408   :  { %2856 = vpow2.f32 %v1995_v22  ;;  %v2053_v52 = vadd.f32 %v4543_v48, %v4541_v27  ;;  %v4557_v22 = vpop.f32.mrf.mxu1 }
 0x409   :  { %2858 = vpow2.f32 %v1997_v33 }
 0x40a   :  { %2054 = vadd.xlane.f32.xlu2 %v2053_v52  ;;  %1931 = vmax.xlane.f32.xlu0 %v1930_v47  ;;  %v1933_v52 = vmax.f32 %v4539_v38, %v4537_v9 }
 0x40b   :  { %v1917_v15 = vpop.xlane.xlu2 %1916 }
 0x40c   :  { %v1959_v4 = vsub.f32 %v4491_v54, %v1917_v15  ;;  %v1960_v13 = vsub.f32 %v4493_v23, %v1917_v15 }
 0x40e   :  { %v4553_v29 = vpop.eup %2856  ;;  %v1999_v37 = vmul.f32 1.442695, %v1959_v4  ;;  %v2001_v49 = vmul.f32 1.442695, %v1960_v13 }
 0x40f   :  { %v4555_v34 = vpop.eup %2858 }
 0x410   :  { %2860 = vpow2.f32 %v1999_v37  ;;  %v2056_v33 = vadd.f32 %v4555_v34, %v4553_v29  ;;  %v4569_v37 = vpop.f32.mrf.mxu2 }
 0x411   :  { %2862 = vpow2.f32 %v2001_v49  ;;  %v1936_v49 = vmax.f32 %v4557_v22, %v4551_v56 }
 0x412   :  { %2057 = vadd.xlane.f32.xlu1 %v2056_v33  ;;  %1934 = vmax.xlane.f32.xlu2 %v1933_v52  ;;  %v4575_v33 = vpop.f32.mrf.mxu1  ;;  %v337_v52 = vld [vmem:[%s4956_s11 + $0x70] sm:$0xff] }
 0x413   :  { %v1920_v54 = vpop.xlane.xlu2 %1919 }
 0x414   :  { %v1961_v23 = vsub.f32 %v4497_v53, %v1920_v54  ;;  %v1962_v47 = vsub.f32 %v4499_v7, %v1920_v54  ;;  %v338_v53 = vld [vmem:[%s4956_s11 + $0x78] sm:$0xff] }
 0x415   :  { %v354_v7 = vld [vmem:[%s4956_s11 + $0xf8] sm:$0xff]  ;;  %2399 = vmatpush.msra.mxu3 %v338_v53 }
 0x416   :  { %v4565_v15 = vpop.eup %2860  ;;  %v2003_v4 = vmul.f32 1.442695, %v1961_v23  ;;  %v2005_v13 = vmul.f32 1.442695, %v1962_v47  ;;  %2464 = vmatpush.msra.mxu0 %v354_v7 }
 0x417   :  { %v4567_v14 = vpop.eup %2862  ;;  %2400 = vmatpush.msra.mxu3 %v337_v52 }
 0x418   :  { %2864 = vpow2.f32 %v2003_v4  ;;  %v2059_v42 = vadd.f32 %v4567_v14, %v4565_v15  ;;  %v336_v4 = vld [vmem:[%s4956_s11 + $0x68] sm:$0xff] }
 0x419   :  { %2866 = vpow2.f32 %v2005_v13  ;;  %v352_v13 = vld [vmem:[%s4956_s11 + $0xe8] sm:$0xff]  ;;  %2401 = vmatpush.msra.mxu3 %v336_v4 }
 0x41a   :  { %2060 = vadd.xlane.f32.xlu0 %v2059_v42  ;;  %1937 = vmax.xlane.f32.xlu1 %v1936_v49  ;;  %v353_v42 = vld [vmem:[%s4956_s11 + $0xf0] sm:$0xff] }
 0x41b   :  { %v1923_v54 = vpop.xlane.xlu0 %1922  ;;  %2465 = vmatpush.msra.mxu0 %v353_v42  ;;  %v1939_v42 = vmax.f32 %v4575_v33, %v4569_v37 }
 0x41c   :  { %v1963_v23 = vsub.f32 %v4503_v55, %v1923_v54  ;;  %v1964_v47 = vsub.f32 %v4505_v16, %v1923_v54  ;;  %v335_v55 = vld [vmem:[%s4956_s11 + $0x60] sm:$0xff] }
 0x41d   :  { %v351_v16 = vld [vmem:[%s4956_s11 + $0xe0] sm:$0xff]  ;;  %2466 = vmatpush.msra.mxu0 %v352_v13  ;;  %2402 = vmatpush.msra.mxu3 %v335_v55 }
 0x41e   :  { %v4597_v49 = vpop.eup %2864  ;;  %v2007_v53 = vmul.f32 1.442695, %v1963_v23  ;;  %v2009_v7 = vmul.f32 1.442695, %v1964_v47  ;;  %v4611_v23 = vpop.f32.mrf.mxu2 }
 0x41f   :  { %v4605_v54 = vpop.eup %2866  ;;  %2467 = vmatpush.msra.mxu0 %v351_v16  ;;  %v4613_v47 = vpop.f32.mrf.mxu1 }
 0x420   :  { %2868 = vpow2.f32 %v2007_v53  ;;  %v2062_v52 = vadd.f32 %v4605_v54, %v4597_v49  ;;  %v1942_v55 = vmax.f32 %v4613_v47, %v4611_v23 }
 0x421   :  { %2870 = vpow2.f32 %v2009_v7 }
 0x422   :  { %2063 = vadd.xlane.f32.xlu2 %v2062_v52  ;;  %1940 = vmax.xlane.f32.xlu0 %v1939_v42 }
 0x423   :  { %v1926_v18 = vpop.xlane.xlu2 %1925 }
 0x424   :  { %v1965_v4 = vsub.f32 %v4509_v10, %v1926_v18  ;;  %v1966_v13 = vsub.f32 %v4511_v59, %v1926_v18 }
 0x426   :  { %v4617_v53 = vpop.eup %2868  ;;  %v2011_v36 = vmul.f32 1.442695, %v1965_v4  ;;  %v2013_v21 = vmul.f32 1.442695, %v1966_v13  ;;  %v4625_v16 = vpop.f32.mrf.mxu2  ;;  %v334_v13 = vld [vmem:[%s4956_s11 + $0x58] sm:$0xff] }
 0x427   :  { %v4619_v44 = vpop.eup %2870  ;;  %v4627_v10 = vpop.f32.mrf.mxu1  ;;  %2403 = vmatpush.msra.mxu3 %v334_v13  ;;  %v331_v13 = vld [vmem:[%s4956_s11 + $0x40] sm:$0xff] }
 0x428   :  { %2872 = vpow2.f32 %v2011_v36  ;;  %v2065_v7 = vadd.f32 %v4619_v44, %v4617_v53  ;;  %v1945_v52 = vmax.f32 %v4627_v10, %v4625_v16 }
 0x429   :  { %2874 = vpow2.f32 %v2013_v21 }
 0x42a   :  { %2066 = vadd.xlane.f32.xlu1 %v2065_v7  ;;  %1943 = vmax.xlane.f32.xlu2 %v1942_v55  ;;  %v350_v7 = vld [vmem:[%s4956_s11 + $0xd8] sm:$0xff]  ;;  %v333_v55 = vld [vmem:[%s4956_s11 + $0x50] sm:$0xff] }
 0x42b   :  { %2468 = vmatpush.msra.mxu0 %v350_v7  ;;  %2404 = vmatpush.msra.mxu3 %v333_v55  ;;  %v347_v7 = vld [vmem:[%s4956_s11 + $0xc0] sm:$0xff]  ;;  %v330_v55 = vld [vmem:[%s4956_s11 + $0x38] sm:$0xff] }
 0x42e   :  { %v4629_v18 = vpop.eup %2872  ;;  %v4637_v42 = vpop.f32.mrf.mxu2 }
 0x42f   :  { %v4631_v59 = vpop.eup %2874  ;;  %v4639_v21 = vpop.f32.mrf.mxu1 }
 0x430   :  { %v2068_v36 = vadd.f32 %v4631_v59, %v4629_v18  ;;  %v1948_v4 = vmax.f32 %v4639_v21, %v4637_v42 }
 0x432   :  { %2069 = vadd.xlane.f32.xlu0 %v2068_v36  ;;  %1946 = vmax.xlane.f32.xlu1 %v1945_v52  ;;  %v349_v36 = vld [vmem:[%s4956_s11 + $0xd0] sm:$0xff]  ;;  %v332_v52 = vld [vmem:[%s4956_s11 + $0x48] sm:$0xff] }
 0x433   :  { %2469 = vmatpush.msra.mxu0 %v349_v36  ;;  %2405 = vmatpush.msra.mxu3 %v332_v52  ;;  %v346_v36 = vld [vmem:[%s4956_s11 + $0xb8] sm:$0xff]  ;;  %v329_v52 = vld [vmem:[%s4956_s11 + $0x30] sm:$0xff] }
 0x435   :  { %2406 = vmatpush.msra.mxu3 %v331_v13  ;;  %v328_v13 = vld [vmem:[%s4956_s11 + $0x28] sm:$0xff] }
 0x437   :  { %2407 = vmatpush.msra.mxu3 %v330_v55  ;;  %v327_v55 = vld [vmem:[%s4956_s11 + $0x20] sm:$0xff] }
 0x439   :  { %2408 = vmatpush.msra.mxu3 %v329_v52  ;;  %v326_v52 = vld [vmem:[%s4956_s11 + $0x18] sm:$0xff] }
 0x43a   :  { %1949 = vmax.xlane.f32.xlu0 %v1948_v4  ;;  %v348_v4 = vld [vmem:[%s4956_s11 + $0xc8] sm:$0xff] }
 0x43b   :  { %2470 = vmatpush.msra.mxu0 %v348_v4  ;;  %v345_v4 = vld [vmem:[%s4956_s11 + $0xb0] sm:$0xff]  ;;  %2409 = vmatpush.msra.mxu3 %v328_v13 }
 0x43c   :  { %v325_v13 = vld [vmem:[%s4956_s11 + $0x10] sm:$0xff] }
 0x43d   :  { %2471 = vmatpush.msra.mxu0 %v347_v7  ;;  %v344_v7 = vld [vmem:[%s4956_s11 + $0xa8] sm:$0xff]  ;;  %2410 = vmatpush.msra.mxu3 %v327_v55 }
 0x43e   :  { %v324_v55 = vld [vmem:[%s4956_s11 + $0x8] sm:$0xff] }
 0x43f   :  { %2472 = vmatpush.msra.mxu0 %v346_v36  ;;  %v343_v36 = vld [vmem:[%s4956_s11 + $0xa0] sm:$0xff]  ;;  %2411 = vmatpush.msra.mxu3 %v326_v52 }
 0x440   :  { %v323_v52 = vld [vmem:[%s4956_s11] sm:$0xff] }
 0x441   :  { %2473 = vmatpush.msra.mxu0 %v345_v4  ;;  %v342_v4 = vld [vmem:[%s4956_s11 + $0x98] sm:$0xff]  ;;  %2412 = vmatpush.msra.mxu3 %v325_v13 }
 0x443   :  { %2474 = vmatpush.msra.mxu0 %v344_v7  ;;  %v341_v7 = vld [vmem:[%s4956_s11 + $0x90] sm:$0xff]  ;;  %2413 = vmatpush.msra.mxu3 %v324_v55 }
 0x445   :  { %2475 = vmatpush.msra.mxu0 %v343_v36  ;;  %v340_v36 = vld [vmem:[%s4956_s11 + $0x88] sm:$0xff]  ;;  %2414 = vmatpush.msra.mxu3 %v323_v52 }
 0x447   :  { %2476 = vmatpush.msra.mxu0 %v342_v4  ;;  %v339_v4 = vld [vmem:[%s4956_s11 + $0x80] sm:$0xff] }
 0x449   :  { %2477 = vmatpush.msra.mxu0 %v341_v7 }
 0x44b   :  { %2478 = vmatpush.msra.mxu0 %v340_v36 }
 0x44d   :  { %2479 = vmatpush.msra.mxu0 %v339_v4 }
 0x46d   :  { %v2049_v13 = vpop.xlane.xlu1 %2048 }
 0x46e   :  { %2876 = vrcp.f32 %v2049_v13  ;;  %v2104_v17 = vand.u32 2147483647, %v2049_v13  ;;  %v2106_v61 = vand.u32 2147483648, %v2049_v13  ;;  %vm2100_vm1 = vweird.f32 %v2049_v13 }
 0x470   :  { %v2107_v11 = vor.u32 1.1754944e-38, %v2106_v61  ;;  %vm2105_vm3 = vcmp.eq.f32.partialorder %v2104_v17, 8.507059e+37 }
 0x474   :  { %v2877_v7 = vpop.eup %2876 }
 0x475   :  { %v2096_v40 = vmul.f32 %v2877_v7, %v2049_v13  ;;  %v2052_v24 = vpop.xlane.xlu0 %2051  ;;  %v1929_v51 = vpop.xlane.xlu1 %1928  ;;  %vm2101_vm0 = vweird.f32 %v2877_v7 }
 0x476   :  { %2878 = vrcp.f32 %v2052_v24  ;;  %v1967_v55 = vsub.f32 %v4517_v60, %v1929_v51  ;;  %v1968_v36 = vsub.f32 %v4515_v3, %v1929_v51  ;;  %vm2102_vm2 = vmor %vm2100_vm1, %vm2101_vm0  ;;  %vm2115_vm5 = vweird.f32 %v2052_v24 }
 0x477   :  { %v2097_v63 = vsub.f32 1.0, %v2096_v40 }
 0x478   :  { %v2015_v5 = vmul.f32 1.442695, %v1967_v55  ;;  %v2017_v30 = vmul.f32 1.442695, %v1968_v36 }
 0x479   :  { %v2098_v32 = vmul.f32 %v2877_v7, %v2097_v63 }
 0x47a   :  { %2880 = vpow2.f32 %v2015_v5 }
 0x47b   :  { %v2099_v52 = vadd.f32 %v2877_v7, %v2098_v32  ;;  %2882 = vpow2.f32 %v2017_v30  ;;  %v2121_v32 = vand.u32 2147483648, %v2052_v24 }
 0x47c   :  { %v2879_v4 = vpop.eup %2878 }
 0x47d   :  { %v2103_v43 = vsel %vm2102_vm2, %v2877_v7, %v2099_v52  ;;  %v2111_v40 = vmul.f32 %v2879_v4, %v2052_v24  ;;  %v4717_v41 = vpop.xlane.xlu2 %2054  ;;  %v1932_v60 = vpop.xlane.xlu0 %1931  ;;  %vm2116_vm4 = vweird.f32 %v2879_v4 }
 0x47e   :  { %v2108_v51 = vsel %vm2105_vm3, %v2107_v11, %v2103_v43  ;;  %2884 = vrcp.f32 %v4717_v41  ;;  %v1969_v55 = vsub.f32 %v4527_v50, %v1932_v60  ;;  %v1970_v5 = vsub.f32 %v4525_v35, %v1932_v60  ;;  %vm4732_vm6 = vmor %vm2115_vm5, %vm2116_vm4 }
 0x47f   :  { %v2109_v63 = vmul.f32 32.0, %v2108_v51  ;;  %v2112_v3 = vsub.f32 1.0, %v2111_v40  ;;  %v2119_v43 = vand.u32 2147483647, %v2052_v24  ;;  %vm2130_vm9 = vweird.f32 %v4717_v41 }
 0x480   :  { %v4722_v13 = vpop.eup %2880  ;;  %v2019_v11 = vmul.f32 1.442695, %v1969_v55  ;;  %v2021_v36 = vmul.f32 1.442695, %v1970_v5  ;;  %v2136_v5 = vand.u32 2147483648, %v4717_v41 }
 0x481   :  { %v2335_v30 = vmul.f32 %v4519_v46, %v2109_v63  ;;  %v2336_v61 = vmul.f32 %v4521_v25, %v2109_v63  ;;  %v2113_v17 = vmul.f32 %v2879_v4, %v2112_v3  ;;  %v4726_v7 = vpop.eup %2882  ;;  %v2122_v25 = vor.u32 1.1754944e-38, %v2121_v32 }
 0x482   :  { %v2071_v50 = vadd.f32 %v4726_v7, %v4722_v13  ;;  %2886 = vpow2.f32 %v2019_v11  ;;  %vm2120_vm7 = vcmp.eq.f32.partialorder %v2119_v43, 8.507059e+37 }
 0x483   :  { %v2114_v52 = vadd.f32 %v2879_v4, %v2113_v17  ;;  %v2368_v35 = vmul.f32 %v2336_v61, %v3941_v6  ;;  %v2367_v40 = vmul.f32 %v2335_v30, %v3924_v28  ;;  %2888 = vpow2.f32 %v2021_v36 }
 0x484   :  { %v2885_v60 = vpop.eup %2884  ;;  %2072 = vadd.xlane.f32.xlu2 %v2071_v50 }
 0x485   :  { %v2126_v51 = vmul.f32 %v2885_v60, %v4717_v41  ;;  %2480 = vmatmul.f32.vlgmr.msra.gmra.mxu0 %v2368_v35  ;;  %v4737_v24 = vpop.xlane.xlu1 %2057  ;;  %v1935_v63 = vpop.xlane.xlu2 %1934  ;;  %v2118_v6 = vsel %vm4732_vm6, %v2879_v4, %v2114_v52  ;;  %2415 = vmatmul.f32.vlgmr.msra.gmra.mxu3 %v2367_v40  ;;  %vm2131_vm8 = vweird.f32 %v2885_v60  ;;  %v2134_v4 = vand.u32 2147483647, %v4717_v41 }
 0x486   :  { %2890 = vrcp.f32 %v4737_v24  ;;  %v1971_v3 = vsub.f32 %v4539_v38, %v1935_v63  ;;  %v1972_v55 = vsub.f32 %v4537_v9, %v1935_v63  ;;  %v2123_v32 = vsel %vm2120_vm7, %v2122_v25, %v2118_v6  ;;  %vm4753_vm10 = vmor %vm2130_vm9, %vm2131_vm8 }
 0x487   :  { %v2127_v28 = vsub.f32 1.0, %v2126_v51  ;;  %v2124_v30 = vmul.f32 32.0, %v2123_v32  ;;  %vm2135_vm11 = vcmp.eq.f32.partialorder %v2134_v4, 8.507059e+37  ;;  %vm2145_vm13 = vweird.f32 %v4737_v24 }
 0x488   :  { %v2023_v17 = vmul.f32 1.442695, %v1971_v3  ;;  %v2025_v11 = vmul.f32 1.442695, %v1972_v55  ;;  %v4745_v36 = vpop.eup %2886  ;;  %v2151_v3 = vand.u32 2147483648, %v4737_v24 }
 0x489   :  { %v2128_v61 = vmul.f32 %v2885_v60, %v2127_v28  ;;  %v2338_v43 = vmul.f32 %v4531_v26, %v2124_v30  ;;  %v2337_v52 = vmul.f32 %v4529_v62, %v2124_v30  ;;  %v4750_v50 = vpop.eup %2888  ;;  %v2137_v62 = vor.u32 1.1754944e-38, %v2136_v5 }
 0x48a   :  { %2892 = vpow2.f32 %v2023_v17  ;;  %v2074_v40 = vadd.f32 %v4750_v50, %v4745_v36  ;;  %v2149_v17 = vand.u32 2147483647, %v4737_v24 }
 0x48b   :  { %v2129_v38 = vadd.f32 %v2885_v60, %v2128_v61  ;;  %2894 = vpow2.f32 %v2025_v11  ;;  %v2370_v46 = vmul.f32 %v2338_v43, %v3979_v2  ;;  %v2369_v26 = vmul.f32 %v2337_v52, %v3961_v39 }
 0x48c   :  { %v2891_v9 = vpop.eup %2890  ;;  %2075 = vadd.xlane.f32.xlu1 %v2074_v40  ;;  %vm2150_vm15 = vcmp.eq.f32.partialorder %v2149_v17, 8.507059e+37 }
 0x48d   :  { %v2141_v25 = vmul.f32 %v2891_v9, %v4737_v24  ;;  %v4762_v51 = vpop.xlane.xlu0 %2060  ;;  %v1938_v41 = vpop.xlane.xlu1 %1937  ;;  %v2133_v63 = vsel %vm4753_vm10, %v2885_v60, %v2129_v38  ;;  %2483 = vmatmul.f32.gmra.mxu0 %v2370_v46  ;;  %2418 = vmatmul.f32.gmra.mxu3 %v2369_v26  ;;  %vm2146_vm12 = vweird.f32 %v2891_v9 }
 0x48e   :  { %2896 = vrcp.f32 %v4762_v51  ;;  %v1973_v28 = vsub.f32 %v4557_v22, %v1938_v41  ;;  %v1974_v2 = vsub.f32 %v4551_v56, %v1938_v41  ;;  %v2138_v39 = vsel %vm2135_vm11, %v2137_v62, %v2133_v63  ;;  %vm4780_vm14 = vmor %vm2145_vm13, %vm2146_vm12 }
 0x48f   :  { %v2142_v6 = vsub.f32 1.0, %v2141_v25  ;;  %v2139_v55 = vmul.f32 32.0, %v2138_v39  ;;  %v2166_v25 = vand.u32 2147483648, %v4762_v51  ;;  %v2164_v39 = vand.u32 2147483647, %v4762_v51 }
 0x490   :  { %v4770_v32 = vpop.eup %2892  ;;  %v2027_v60 = vmul.f32 1.442695, %v1973_v28  ;;  %v2029_v30 = vmul.f32 1.442695, %v1974_v2  ;;  %vm2160_vm1 = vweird.f32 %v4762_v51 }
 0x491   :  { %v2143_v5 = vmul.f32 %v2891_v9, %v2142_v6  ;;  %v4772_v61 = vpop.eup %2894  ;;  %v2340_v11 = vmul.f32 %v4543_v48, %v2139_v55  ;;  %v2339_v22 = vmul.f32 %v4541_v27, %v2139_v55  ;;  %v2152_v48 = vor.u32 1.1754944e-38, %v2151_v3 }
 0x492   :  { %2898 = vpow2.f32 %v2027_v60  ;;  %v2077_v4 = vadd.f32 %v4772_v61, %v4770_v32  ;;  %vm2165_vm3 = vcmp.eq.f32.partialorder %v2164_v39, 8.507059e+37 }
 0x493   :  { %v2144_v56 = vadd.f32 %v2891_v9, %v2143_v5  ;;  %2900 = vpow2.f32 %v2029_v30  ;;  %v2372_v38 = vmul.f32 %v2340_v11, %v4017_v1  ;;  %v2371_v35 = vmul.f32 %v2339_v22, %v3999_v19 }
 0x494   :  { %v2897_v43 = vpop.eup %2896  ;;  %2078 = vadd.xlane.f32.xlu2 %v2077_v4 }
 0x495   :  { %v2156_v27 = vmul.f32 %v2897_v43, %v4762_v51  ;;  %v4787_v40 = vpop.xlane.xlu2 %2063  ;;  %v1941_v24 = vpop.xlane.xlu0 %1940  ;;  %v2148_v46 = vsel %vm4780_vm14, %v2891_v9, %v2144_v56  ;;  %2486 = vmatmul.f32.gmra.mxu0 %v2372_v38  ;;  %2421 = vmatmul.f32.gmra.mxu3 %v2371_v35  ;;  %vm2161_vm0 = vweird.f32 %v2897_v43 }
 0x496   :  { %2902 = vrcp.f32 %v4787_v40  ;;  %v1975_v62 = vsub.f32 %v4575_v33, %v1941_v24  ;;  %v1976_v1 = vsub.f32 %v4569_v37, %v1941_v24  ;;  %v2153_v19 = vsel %vm2150_vm15, %v2152_v48, %v2148_v46  ;;  %vm4805_vm2 = vmor %vm2160_vm1, %vm2161_vm0 }
 0x497   :  { %v2157_v26 = vsub.f32 1.0, %v2156_v27  ;;  %v2154_v41 = vmul.f32 32.0, %v2153_v19  ;;  %v2181_v52 = vand.u32 2147483648, %v4787_v40  ;;  %v2179_v46 = vand.u32 2147483647, %v4787_v40 }
 0x498   :  { %v4795_v63 = vpop.eup %2898  ;;  %v2031_v28 = vmul.f32 1.442695, %v1975_v62  ;;  %v2033_v9 = vmul.f32 1.442695, %v1976_v1  ;;  %vm2175_vm5 = vweird.f32 %v4787_v40 }
 0x499   :  { %v2158_v6 = vmul.f32 %v2897_v43, %v2157_v26  ;;  %v4797_v2 = vpop.eup %2900  ;;  %v2342_v3 = vmul.f32 %v4555_v34, %v2154_v41  ;;  %v2341_v33 = vmul.f32 %v4553_v29, %v2154_v41  ;;  %v2167_v34 = vor.u32 1.1754944e-38, %v2166_v25 }
 0x49a   :  { %2904 = vpow2.f32 %v2031_v28  ;;  %v2080_v55 = vadd.f32 %v4797_v2, %v4795_v63  ;;  %vm2180_vm7 = vcmp.eq.f32.partialorder %v2179_v46, 8.507059e+37 }
 0x49b   :  { %v2159_v37 = vadd.f32 %v2897_v43, %v2158_v6  ;;  %2906 = vpow2.f32 %v2033_v9  ;;  %v2374_v30 = vmul.f32 %v2342_v3, %v4055_v12  ;;  %v2373_v17 = vmul.f32 %v2341_v33, %v4037_v45 }
 0x49c   :  { %v2903_v5 = vpop.eup %2902  ;;  %2081 = vadd.xlane.f32.xlu0 %v2080_v55 }
 0x49d   :  { %v2171_v29 = vmul.f32 %v2903_v5, %v4787_v40  ;;  %v4812_v11 = vpop.xlane.xlu1 %2066  ;;  %v1944_v51 = vpop.xlane.xlu2 %1943  ;;  %v2163_v22 = vsel %vm4805_vm2, %v2897_v43, %v2159_v37  ;;  %2489 = vmatmul.f32.gmra.mxu0 %v2374_v30  ;;  %2424 = vmatmul.f32.gmra.mxu3 %v2373_v17  ;;  %vm2176_vm4 = vweird.f32 %v2903_v5 }
 0x49e   :  { %2908 = vrcp.f32 %v4812_v11  ;;  %v1977_v4 = vsub.f32 %v4613_v47, %v1944_v51  ;;  %v1978_v12 = vsub.f32 %v4611_v23, %v1944_v51  ;;  %v2168_v45 = vsel %vm2165_vm3, %v2167_v34, %v2163_v22  ;;  %vm4830_vm6 = vmor %vm2175_vm5, %vm2176_vm4 }
 0x49f   :  { %v2172_v56 = vsub.f32 1.0, %v2171_v29  ;;  %v2169_v38 = vmul.f32 32.0, %v2168_v45  ;;  %v2194_v3 = vand.u32 2147483647, %v4812_v11  ;;  %v2196_v33 = vand.u32 2147483648, %v4812_v11 }
 0x4a0   :  { %v4820_v35 = vpop.eup %2904  ;;  %v2035_v27 = vmul.f32 1.442695, %v1977_v4  ;;  %v2037_v43 = vmul.f32 1.442695, %v1978_v12  ;;  %vm2190_vm9 = vweird.f32 %v4812_v11 }
 0x4a1   :  { %v2173_v48 = vmul.f32 %v2903_v5, %v2172_v56  ;;  %v4822_v24 = vpop.eup %2906  ;;  %v2344_v26 = vmul.f32 %v4567_v14, %v2169_v38  ;;  %v2343_v47 = vmul.f32 %v4565_v15, %v2169_v38  ;;  %v2182_v14 = vor.u32 1.1754944e-38, %v2181_v52 }
 0x4a2   :  { %2910 = vpow2.f32 %v2035_v27  ;;  %v2083_v62 = vadd.f32 %v4822_v24, %v4820_v35  ;;  %v2197_v22 = vor.u32 1.1754944e-38, %v2196_v33  ;;  %vm2195_vm11 = vcmp.eq.f32.partialorder %v2194_v3, 8.507059e+37 }
 0x4a3   :  { %v2174_v23 = vadd.f32 %v2903_v5, %v2173_v48  ;;  %2912 = vpow2.f32 %v2037_v43  ;;  %v2376_v25 = vmul.f32 %v2344_v26, %v4093_v8  ;;  %v2375_v41 = vmul.f32 %v2343_v47, %v4073_v20 }
 0x4a4   :  { %v2909_v1 = vpop.eup %2908  ;;  %2084 = vadd.xlane.f32.xlu1 %v2083_v62 }
 0x4a5   :  { %v2186_v15 = vmul.f32 %v2909_v1, %v4812_v11  ;;  %v4837_v6 = vpop.xlane.xlu0 %2069  ;;  %v1947_v40 = vpop.xlane.xlu1 %1946  ;;  %v2178_v28 = vsel %vm4830_vm6, %v2903_v5, %v2174_v23  ;;  %2492 = vmatmul.f32.gmra.mxu0 %v2376_v25  ;;  %2427 = vmatmul.f32.gmra.mxu3 %v2375_v41  ;;  %vm2191_vm8 = vweird.f32 %v2909_v1 }
 0x4a6   :  { %2914 = vrcp.f32 %v4837_v6  ;;  %v1979_v39 = vsub.f32 %v4627_v10, %v1947_v40  ;;  %v1980_v8 = vsub.f32 %v4625_v16, %v1947_v40  ;;  %v2183_v20 = vsel %vm2180_vm7, %v2182_v14, %v2178_v28  ;;  %vm2192_vm10 = vmor %vm2190_vm9, %vm2191_vm8  ;;  %v5013_v28 = vld [vmem:[#allocation16_spill] sm:$0xff] }
 0x4a7   :  { %v2187_v9 = vsub.f32 1.0, %v2186_v15  ;;  %v2184_v37 = vmul.f32 32.0, %v2183_v20  ;;  %v2209_v48 = vand.u32 2147483647, %v4837_v6  ;;  %vm2205_vm13 = vweird.f32 %v4837_v6 }
 0x4a8   :  { %v4846_v55 = vpop.eup %2910  ;;  %v2039_v5 = vmul.f32 1.442695, %v1979_v39  ;;  %v2041_v30 = vmul.f32 1.442695, %v1980_v8 }
 0x4a9   :  { %v2188_v60 = vmul.f32 %v2909_v1, %v2187_v9  ;;  %v4848_v17 = vpop.eup %2912  ;;  %v2345_v34 = vmul.f32 %v4597_v49, %v2184_v37  ;;  %v2346_v10 = vmul.f32 %v4605_v54, %v2184_v37  ;;  %vm2210_vm15 = vcmp.eq.f32.partialorder %v2209_v48, 8.507059e+37  ;;  %v5014_v9 = vld [vmem:[#allocation17_spill] sm:$0xff] }
 0x4aa   :  { %2916 = vpow2.f32 %v2039_v5  ;;  %v2086_v29 = vadd.f32 %v4848_v17, %v4846_v55 }
 0x4ab   :  { %v2189_v16 = vadd.f32 %v2909_v1, %v2188_v60  ;;  %2918 = vpow2.f32 %v2041_v30  ;;  %v2377_v56 = vmul.f32 %v2345_v34, %v4111_v31  ;;  %v2378_v4 = vmul.f32 %v2346_v10, %v4131_v58 }
 0x4ac   :  { %v2915_v51 = vpop.eup %2914  ;;  %2087 = vadd.xlane.f32.xlu2 %v2086_v29  ;;  %v2211_v31 = vand.u32 2147483648, %v4837_v6 }
 0x4ad   :  { %v2201_v49 = vmul.f32 %v2915_v51, %v4837_v6  ;;  %v1950_v54 = vpop.xlane.xlu0 %1949  ;;  %v2193_v12 = vsel %vm2192_vm10, %v2909_v1, %v2189_v16  ;;  %2495 = vmatmul.f32.gmra.mxu0 %v2378_v4  ;;  %2430 = vmatmul.f32.gmra.mxu3 %v2377_v56  ;;  %vm2206_vm12 = vweird.f32 %v2915_v51 }
 0x4ae   :  { %v1981_v11 = vsub.f32 %v4639_v21, %v1950_v54  ;;  %v1982_v45 = vsub.f32 %v4637_v42, %v1950_v54  ;;  %v2198_v52 = vsel %vm2195_vm11, %v2197_v22, %v2193_v12  ;;  %vm2207_vm14 = vmor %vm2205_vm13, %vm2206_vm12  ;;  %v2212_v19 = vor.u32 1.1754944e-38, %v2211_v31 }
 0x4af   :  { %v2202_v38 = vsub.f32 1.0, %v2201_v49  ;;  %v2199_v27 = vmul.f32 32.0, %v2198_v52 }
 0x4b0   :  { %v2043_v58 = vmul.f32 1.442695, %v1981_v11  ;;  %v2045_v43 = vmul.f32 1.442695, %v1982_v45  ;;  %v4862_v46 = vpop.eup %2916 }
 0x4b1   :  { %v2203_v26 = vmul.f32 %v2915_v51, %v2202_v38  ;;  %v2347_v47 = vmul.f32 %v4617_v53, %v2199_v27  ;;  %v2348_v21 = vmul.f32 %v4619_v44, %v2199_v27  ;;  %v4866_v23 = vpop.eup %2918 }
 0x4b2   :  { %2920 = vpow2.f32 %v2043_v58  ;;  %v2089_v62 = vadd.f32 %v4866_v23, %v4862_v46  ;;  %v5015_v58 = vld [vmem:[#allocation18_spill] sm:$0xff] }
 0x4b3   :  { %v2204_v42 = vadd.f32 %v2915_v51, %v2203_v26  ;;  %2922 = vpow2.f32 %v2045_v43  ;;  %v2379_v1 = vmul.f32 %v2347_v47, %v4149_v57  ;;  %v2380_v25 = vmul.f32 %v2348_v21, %v4169_v0  ;;  %v5016_v26 = vld [vmem:[#allocation19_spill] sm:$0xff] }
 0x4b4   :  { %2090 = vadd.xlane.f32.xlu0 %v2089_v62 }
 0x4b5   :  { %v2208_v53 = vsel %vm2207_vm14, %v2915_v51, %v2204_v42  ;;  %2498 = vmatmul.f32.gmra.mxu0 %v2380_v25  ;;  %2433 = vmatmul.f32.gmra.mxu3 %v2379_v1 }
 0x4b6   :  { %v2213_v44 = vsel %vm2210_vm15, %v2212_v19, %v2208_v53 }
 0x4b7   :  { %v2214_v41 = vmul.f32 32.0, %v2213_v44 }
 0x4b8   :  { %v4873_v14 = vpop.eup %2920 }
 0x4b9   :  { %v4875_v15 = vpop.eup %2922  ;;  %v2349_v6 = vmul.f32 %v4629_v18, %v2214_v41  ;;  %v2350_v40 = vmul.f32 %v4631_v59, %v2214_v41 }
 0x4ba   :  { %v2092_v57 = vadd.f32 %v4875_v15, %v4873_v14 }
 0x4bb   :  { %v2381_v0 = vmul.f32 %v2349_v6, %v5013_v28  ;;  %v2382_v39 = vmul.f32 %v2350_v40, %v5014_v9 }
 0x4bc   :  { %2093 = vadd.xlane.f32.xlu1 %v2092_v57 }
 0x4bd   :  { %2501 = vmatmul.f32.gmra.mxu0 %v2382_v39  ;;  %2436 = vmatmul.f32.gmra.mxu3 %v2381_v0 }
 0x4f7   :  { %v2073_v8 = vpop.xlane.xlu2 %2072 }
 0x4f8   :  { %2924 = vrcp.f32 %v2073_v8  ;;  %v2226_v59 = vand.u32 2147483648, %v2073_v8  ;;  %v2224_v5 = vand.u32 2147483647, %v2073_v8  ;;  %vm2220_vm1 = vweird.f32 %v2073_v8 }
 0x4fa   :  { %v2227_v10 = vor.u32 1.1754944e-38, %v2226_v59  ;;  %vm2225_vm3 = vcmp.eq.f32.partialorder %v2224_v5, 8.507059e+37 }
 0x4fe   :  { %v2925_v20 = vpop.eup %2924 }
 0x4ff   :  { %v2216_v3 = vmul.f32 %v2925_v20, %v2073_v8  ;;  %v2076_v33 = vpop.xlane.xlu1 %2075  ;;  %vm2221_vm0 = vweird.f32 %v2925_v20  ;;  %v5017_v8 = vld [vmem:[#allocation21_spill] sm:$0xff] }
 0x500   :  { %2926 = vrcp.f32 %v2076_v33  ;;  %vm2222_vm2 = vmor %vm2220_vm1, %vm2221_vm0  ;;  %v2241_v45 = vand.u32 2147483648, %v2076_v33  ;;  %v2239_v48 = vand.u32 2147483647, %v2076_v33  ;;  %vm2235_vm5 = vweird.f32 %v2076_v33 }
 0x501   :  { %v2217_v37 = vsub.f32 1.0, %v2216_v3 }
 0x502   :  { %v2481_v18 = vpop.f32.mrf.mxu0  ;;  %v2242_v62 = vor.u32 1.1754944e-38, %v2241_v45  ;;  %vm2240_vm7 = vcmp.eq.f32.partialorder %v2239_v48, 8.507059e+37  ;;  %v5020_v45 = vld [vmem:[#allocation23_spill] sm:$0xff] }
 0x503   :  { %v2218_v60 = vmul.f32 %v2925_v20, %v2217_v37 }
 0x505   :  { %v2219_v30 = vadd.f32 %v2925_v20, %v2218_v60 }
 0x506   :  { %v2927_v34 = vpop.eup %2926 }
 0x507   :  { %v2079_v16 = vpop.xlane.xlu2 %2078  ;;  %v2223_v29 = vsel %vm2222_vm2, %v2925_v20, %v2219_v30  ;;  %v2231_v51 = vmul.f32 %v2927_v34, %v2076_v33  ;;  %vm2236_vm4 = vweird.f32 %v2927_v34  ;;  %v5018_v33 = vld [vmem:[#allocation20_spill] sm:$0xff] }
 0x508   :  { %2928 = vrcp.f32 %v2079_v16  ;;  %v2416_v22 = vpop.f32.mrf.mxu3  ;;  %v2228_v4 = vsel %vm2225_vm3, %v2227_v10, %v2223_v29  ;;  %vm2237_vm6 = vmor %vm2235_vm5, %vm2236_vm4  ;;  %v2254_v6 = vand.u32 2147483647, %v2079_v16  ;;  %v2256_v40 = vand.u32 2147483648, %v2079_v16 }
 0x509   :  { %v2482_v56 = vadd.f32 %v2481_v18, %v2416_v22  ;;  %v2232_v49 = vsub.f32 1.0, %v2231_v51  ;;  %v2229_v12 = vmul.f32 32.0, %v2228_v4  ;;  %vm2250_vm9 = vweird.f32 %v2079_v16 }
 0x50a   :  { %v2484_v54 = vpop.f32.mrf.mxu0  ;;  %v2257_v18 = vor.u32 1.1754944e-38, %v2256_v40  ;;  %vm2255_vm11 = vcmp.eq.f32.partialorder %v2254_v6, 8.507059e+37 }
 0x50b   :  { %2529 = vxpose.xlu2.b32.start [1/16] (narrow) %v2482_v56, 32  ;;  %v2233_v11 = vmul.f32 %v2927_v34, %v2232_v49  ;;  %v2351_v52 = vmul.f32 %v4722_v13, %v2229_v12  ;;  %v2352_v38 = vmul.f32 %v4726_v7, %v2229_v12  ;;  %v5019_v12 = vld [vmem:[#allocation22_spill] sm:$0xff] }
 0x50d   :  { %v2234_v31 = vadd.f32 %v2927_v34, %v2233_v11  ;;  %v2383_v43 = vmul.f32 %v2351_v52, %v5015_v58  ;;  %v2384_v47 = vmul.f32 %v2352_v38, %v5016_v26 }
 0x50e   :  { %v2929_v27 = vpop.eup %2928 }
 0x50f   :  { %v2246_v21 = vmul.f32 %v2929_v27, %v2079_v16  ;;  %v2082_v42 = vpop.xlane.xlu0 %2081  ;;  %2439 = vmatmul.f32.gmra.mxu3 %v2383_v43  ;;  %2504 = vmatmul.f32.gmra.mxu0 %v2384_v47  ;;  %v2238_v7 = vsel %vm2237_vm6, %v2927_v34, %v2234_v31  ;;  %vm2251_vm8 = vweird.f32 %v2929_v27 }
 0x510   :  { %2930 = vrcp.f32 %v2082_v42  ;;  %v2419_v1 = vpop.f32.mrf.mxu3  ;;  %v2243_v53 = vsel %vm2240_vm7, %v2242_v62, %v2238_v7  ;;  %vm2252_vm10 = vmor %vm2250_vm9, %vm2251_vm8  ;;  %v2269_v16 = vand.u32 2147483647, %v2082_v42  ;;  %v2271_v29 = vand.u32 2147483648, %v2082_v42 }
 0x511   :  { %v2247_v13 = vsub.f32 1.0, %v2246_v21  ;;  %v2485_v19 = vadd.f32 %v2484_v54, %v2419_v1  ;;  %v2244_v41 = vmul.f32 32.0, %v2243_v53  ;;  %vm2265_vm13 = vweird.f32 %v2082_v42  ;;  %v5022_v53 = vld [vmem:[#allocation25_spill] sm:$0xff] }
 0x512   :  { %v2487_v25 = vpop.f32.mrf.mxu0  ;;  %v2272_v38 = vor.u32 1.1754944e-38, %v2271_v29  ;;  %vm2270_vm15 = vcmp.eq.f32.partialorder %v2269_v16, 8.507059e+37 }
 0x513   :  { %v2248_v44 = vmul.f32 %v2929_v27, %v2247_v13  ;;  %2530 = vxpose.xlu2.b32.cont [2/16] (narrow) %v2485_v19, 32  ;;  %v2354_v28 = vmul.f32 %v4750_v50, %v2244_v41  ;;  %v2353_v0 = vmul.f32 %v4745_v36, %v2244_v41  ;;  %v5021_v19 = vld [vmem:[#allocation24_spill] sm:$0xff] }
 0x515   :  { %v2249_v57 = vadd.f32 %v2929_v27, %v2248_v44  ;;  %v2386_v20 = vmul.f32 %v2354_v28, %v5017_v8  ;;  %v2385_v37 = vmul.f32 %v2353_v0, %v5018_v33 }
 0x516   :  { %v2931_v9 = vpop.eup %2930 }
 0x517   :  { %v2261_v39 = vmul.f32 %v2931_v9, %v2082_v42  ;;  %v2085_v3 = vpop.xlane.xlu1 %2084  ;;  %2507 = vmatmul.f32.gmra.mxu0 %v2386_v20  ;;  %2442 = vmatmul.f32.gmra.mxu3 %v2385_v37  ;;  %v2253_v5 = vsel %vm2252_vm10, %v2929_v27, %v2249_v57  ;;  %vm2266_vm12 = vweird.f32 %v2931_v9 }
 0x518   :  { %2932 = vrcp.f32 %v2085_v3  ;;  %v2422_v59 = vpop.f32.mrf.mxu3  ;;  %v2258_v36 = vsel %vm2255_vm11, %v2257_v18, %v2253_v5  ;;  %vm2267_vm14 = vmor %vm2265_vm13, %vm2266_vm12  ;;  %v2284_v47 = vand.u32 2147483647, %v2085_v3  ;;  %v2286_v21 = vand.u32 2147483648, %v2085_v3 }
 0x519   :  { %v2262_v60 = vsub.f32 1.0, %v2261_v39  ;;  %v2488_v50 = vadd.f32 %v2487_v25, %v2422_v59  ;;  %v2259_v10 = vmul.f32 32.0, %v2258_v36  ;;  %vm2280_vm1 = vweird.f32 %v2085_v3  ;;  %v5024_v36 = vld [vmem:[#allocation27_spill] sm:$0xff] }
 0x51a   :  { %v2490_v30 = vpop.f32.mrf.mxu0  ;;  %v2287_v6 = vor.u32 1.1754944e-38, %v2286_v21  ;;  %vm2285_vm3 = vcmp.eq.f32.partialorder %v2284_v47, 8.507059e+37 }
 0x51b   :  { %v2263_v34 = vmul.f32 %v2931_v9, %v2262_v60  ;;  %2531 = vxpose.xlu2.b32.cont [3/16] (narrow) %v2488_v50, 32  ;;  %v2355_v22 = vmul.f32 %v4770_v32, %v2259_v10  ;;  %v2356_v56 = vmul.f32 %v4772_v61, %v2259_v10  ;;  %v5023_v50 = vld [vmem:[#allocation26_spill] sm:$0xff] }
 0x51d   :  { %v2264_v51 = vadd.f32 %v2931_v9, %v2263_v34  ;;  %v2387_v11 = vmul.f32 %v2355_v22, %v5019_v12  ;;  %v2388_v52 = vmul.f32 %v2356_v56, %v5020_v45 }
 0x51e   :  { %v2933_v4 = vpop.eup %2932 }
 0x51f   :  { %v2276_v49 = vmul.f32 %v2933_v4, %v2085_v3  ;;  %v2088_v54 = vpop.xlane.xlu2 %2087  ;;  %2445 = vmatmul.f32.gmra.mxu3 %v2387_v11  ;;  %2510 = vmatmul.f32.gmra.mxu0 %v2388_v52  ;;  %v2268_v31 = vsel %vm2267_vm14, %v2931_v9, %v2264_v51  ;;  %vm2281_vm0 = vweird.f32 %v2933_v4 }
 0x520   :  { %2934 = vrcp.f32 %v2088_v54  ;;  %v2425_v27 = vpop.f32.mrf.mxu3  ;;  %v2273_v58 = vsel %vm2270_vm15, %v2272_v38, %v2268_v31  ;;  %vm2282_vm2 = vmor %vm2280_vm1, %vm2281_vm0  ;;  %v2299_v39 = vand.u32 2147483647, %v2088_v54  ;;  %v2301_v8 = vand.u32 2147483648, %v2088_v54  ;;  %v5026_v31 = vld [vmem:[#allocation29_spill] sm:$0xff] }
 0x521   :  { %v2277_v48 = vsub.f32 1.0, %v2276_v49  ;;  %v2491_v32 = vadd.f32 %v2490_v30, %v2425_v27  ;;  %v2274_v26 = vmul.f32 32.0, %v2273_v58  ;;  %vm2295_vm5 = vweird.f32 %v2088_v54 }
 0x522   :  { %v2493_v43 = vpop.f32.mrf.mxu0  ;;  %v2302_v5 = vor.u32 1.1754944e-38, %v2301_v8  ;;  %vm2300_vm7 = vcmp.eq.f32.partialorder %v2299_v39, 8.507059e+37  ;;  %v3105_v8 = vmov 0  }
 0x523   :  { %v2278_v61 = vmul.f32 %v2933_v4, %v2277_v48  ;;  %2532 = vxpose.xlu2.b32.cont [4/16] (narrow) %v2491_v32, 32  ;;  %v2357_v62 = vmul.f32 %v4795_v63, %v2274_v26  ;;  %v2358_v13 = vmul.f32 %v4797_v2, %v2274_v26  ;;  %v5025_v48 = vld [vmem:[#allocation28_spill] sm:$0xff]  ;;  %2745 = vset.pattern.permute.xlu1 %v3105_v8 }
 0x524   :  { %2744 = vset.pattern.permute.xlu0 %v3105_v8 }
 0x525   :  { %v2279_v42 = vadd.f32 %v2933_v4, %v2278_v61  ;;  %v2389_v25 = vmul.f32 %v2357_v62, %v5021_v19  ;;  %v2390_v44 = vmul.f32 %v2358_v13, %v5022_v53  ;;  %v5027_v19 = vld [vmem:[#allocation30_spill] sm:$0xff]  ;;  %v5028_v53 = vld [vmem:[#allocation31_spill] sm:$0xff] }
 0x526   :  { %v2935_v1 = vpop.eup %2934 }
 0x527   :  { %v2291_v7 = vmul.f32 %v2935_v1, %v2088_v54  ;;  %v2091_v41 = vpop.xlane.xlu0 %2090  ;;  %2448 = vmatmul.f32.gmra.mxu3 %v2389_v25  ;;  %2513 = vmatmul.f32.gmra.mxu0 %v2390_v44  ;;  %v2283_v28 = vsel %vm2282_vm2, %v2933_v4, %v2279_v42  ;;  %vm2296_vm4 = vweird.f32 %v2935_v1 }
 0x528   :  { %2936 = vrcp.f32 %v2091_v41  ;;  %v2428_v57 = vpop.f32.mrf.mxu3  ;;  %v2288_v0 = vsel %vm2285_vm3, %v2287_v6, %v2283_v28  ;;  %vm2297_vm6 = vmor %vm2295_vm5, %vm2296_vm4  ;;  %v2316_v51 = vand.u32 2147483648, %v2091_v41  ;;  %v2314_v56 = vand.u32 2147483647, %v2091_v41 }
 0x529   :  { %v2292_v40 = vsub.f32 1.0, %v2291_v7  ;;  %v2494_v63 = vadd.f32 %v2493_v43, %v2428_v57  ;;  %v2289_v9 = vmul.f32 32.0, %v2288_v0  ;;  %vm2310_vm9 = vweird.f32 %v2091_v41  ;;  %v5029_v0 = vld [vmem:[#allocation32_spill] sm:$0xff] }
 0x52a   :  { %v2496_v3 = vpop.f32.mrf.mxu0  ;;  %v2317_v45 = vor.u32 1.1754944e-38, %v2316_v51  ;;  %vm2315_vm11 = vcmp.eq.f32.partialorder %v2314_v56, 8.507059e+37  ;;  %v361_v51 = vld [vmem:[%s4958_s13 + $0x10] sm:$0xff] }
 0x52b   :  { %v2293_v2 = vmul.f32 %v2935_v1, %v2292_v40  ;;  %2533 = vxpose.xlu2.b32.cont [5/16] (narrow) %v2494_v63, 32  ;;  %v2359_v33 = vmul.f32 %v4820_v35, %v2289_v9  ;;  %v2360_v37 = vmul.f32 %v4822_v24, %v2289_v9  ;;  %v5030_v9 = vld [vmem:[#allocation33_spill] sm:$0xff] }
 0x52d   :  { %v2294_v20 = vadd.f32 %v2935_v1, %v2293_v2  ;;  %v2391_v30 = vmul.f32 %v2359_v33, %v5023_v50  ;;  %v2392_v34 = vmul.f32 %v2360_v37, %v5024_v36  ;;  %v360_v33 = vld [vmem:[%s4958_s13 + $0x8] sm:$0xff] }
 0x52e   :  { %v2937_v18 = vpop.eup %2936 }
 0x52f   :  { %v2094_v60 = vpop.xlane.xlu1 %2093  ;;  %v2306_v59 = vmul.f32 %v2937_v18, %v2091_v41  ;;  %v2298_v29 = vsel %vm2297_vm6, %v2935_v1, %v2294_v20  ;;  %2451 = vmatmul.f32.gmra.mxu3 %v2391_v30  ;;  %2516 = vmatmul.f32.gmra.mxu0 %v2392_v34  ;;  %vm2311_vm8 = vweird.f32 %v2937_v18  ;;  %v356_v20 = vld [vmem:[%s4957_s12 + $0x8] sm:$0xff]  ;;  %v359_v34 = vld [vmem:[%s4958_s13] sm:$0xff] }
 0x530   :  { %2938 = vrcp.f32 %v2094_v60  ;;  %v2431_v16 = vpop.f32.mrf.mxu3  ;;  %v2303_v24 = vsel %vm2300_vm7, %v2302_v5, %v2298_v29  ;;  %vm2312_vm10 = vmor %vm2310_vm9, %vm2311_vm8  ;;  %v2331_v26 = vand.u32 2147483648, %v2094_v60  ;;  %vm2325_vm13 = vweird.f32 %v2094_v60  ;;  %2618 = vperm.xlu1 %2745, %v356_v20   ;;  %v362_v5 = vld [vmem:[%s4958_s13 + $0x18] sm:$0xff]  ;;  %s3107_s13 = smov [#allocation11]  }
 0x531   :  { %v2307_v10 = vsub.f32 1.0, %v2306_v59  ;;  %v2497_v35 = vadd.f32 %v2496_v3, %v2431_v16  ;;  %v2304_v4 = vmul.f32 32.0, %v2303_v24  ;;  %v355_v59 = vld [vmem:[%s4957_s12] sm:$0xff]  ;;  %s2667_s18 = sshll.u32 %s3107_s13, 4  ;;  %s2668_s18 = int_to_ptr.vmem [resolvable:$true] %s2667_s18 }
 0x532   :  { %v2499_v38 = vpop.f32.mrf.mxu0  ;;  %v2332_v7 = vor.u32 1.1754944e-38, %v2331_v26  ;;  %2613 = vperm.xlu0 %2744, %v355_v59  }
 0x533   :  { %v2308_v22 = vmul.f32 %v2937_v18, %v2307_v10  ;;  %2534 = vxpose.xlu2.b32.cont [6/16] (narrow) %v2497_v35, 32  ;;  %v2361_v12 = vmul.f32 %v4846_v55, %v2304_v4  ;;  %v2362_v11 = vmul.f32 %v4848_v17, %v2304_v4  ;;  %v2329_v55 = vand.u32 2147483647, %v2094_v60 }
 0x535   :  { %v2309_v54 = vadd.f32 %v2937_v18, %v2308_v22  ;;  %v2393_v27 = vmul.f32 %v2361_v12, %v5025_v48  ;;  %v2394_v32 = vmul.f32 %v2362_v11, %v5026_v31  ;;  %vm2330_vm15 = vcmp.eq.f32.partialorder %v2329_v55, 8.507059e+37 }
 0x536   :  { %v2939_v49 = vpop.eup %2938 }
 0x537   :  { %v2321_v52 = vmul.f32 %v2939_v49, %v2094_v60  ;;  %v2313_v58 = vsel %vm2312_vm10, %v2937_v18, %v2309_v54  ;;  %vm2326_vm12 = vweird.f32 %v2939_v49  ;;  %2454 = vmatmul.f32.gmra.mxu3 %v2393_v27  ;;  %2519 = vmatmul.f32.gmra.mxu0 %v2394_v32 }
 0x538   :  { %v2318_v43 = vsel %vm2315_vm11, %v2317_v45, %v2313_v58  ;;  %v2434_v47 = vpop.f32.mrf.mxu3  ;;  %vm2327_vm14 = vmor %vm2325_vm13, %vm2326_vm12  ;;  %v3106_v58 = vmov 32.0  }
 0x539   :  { %v2322_v61 = vsub.f32 1.0, %v2321_v52  ;;  %v2319_v21 = vmul.f32 32.0, %v2318_v43  ;;  %v2500_v17 = vadd.f32 %v2499_v38, %v2434_v47  ;;  %2940 = vrcp.f32 %v3106_v58 }
 0x53a   :  { %v2502_v57 = vpop.f32.mrf.mxu0  ;;  %2637 = vperm.xlu0 %2744, %v359_v34  }
 0x53b   :  { %v2323_v42 = vmul.f32 %v2939_v49, %v2322_v61  ;;  %v2363_v62 = vmul.f32 %v4862_v46, %v2319_v21  ;;  %v2364_v13 = vmul.f32 %v4866_v23, %v2319_v21  ;;  %2535 = vxpose.xlu2.b32.cont [7/16] (narrow) %v2500_v17, 32 }
 0x53d   :  { %v2324_v1 = vadd.f32 %v2939_v49, %v2323_v42  ;;  %v2395_v25 = vmul.f32 %v2363_v62, %v5027_v19  ;;  %v2396_v44 = vmul.f32 %v2364_v13, %v5028_v53 }
 0x53f   :  { %v2328_v41 = vsel %vm2327_vm14, %v2939_v49, %v2324_v1  ;;  %2457 = vmatmul.f32.gmra.mxu3 %v2395_v25  ;;  %2522 = vmatmul.f32.gmra.mxu0 %v2396_v44  ;;  %v2941_v43 = vpop.eup %2940 }
 0x540   :  { %v2333_v6 = vsel %vm2330_vm15, %v2332_v7, %v2328_v41  ;;  %v2437_v28 = vpop.f32.mrf.mxu3  ;;  %v2571_v26 = vmul.f32 32.0, %v2941_v43  ;;  %vm2575_vm0 = vweird.f32 %v2941_v43 }
 0x541   :  { %v2334_v40 = vmul.f32 32.0, %v2333_v6  ;;  %v2503_v46 = vadd.f32 %v2502_v57, %v2437_v28 }
 0x542   :  { %2647 = vperm.xlu0 %2744, %v361_v51   ;;  %v2572_v42 = vsub.f32 1.0, %v2571_v26 }
 0x543   :  { %v2365_v23 = vmul.f32 %v4873_v14, %v2334_v40  ;;  %v2366_v63 = vmul.f32 %v4875_v15, %v2334_v40  ;;  %2536 = vxpose.xlu2.b32.cont [8/16] (narrow) %v2503_v46, 32  ;;  %v357_v14 = vld [vmem:[%s4957_s12 + $0x10] sm:$0xff]  ;;  %v358_v15 = vld [vmem:[%s4957_s12 + $0x18] sm:$0xff] }
 0x544   :  { %2623 = vperm.xlu1 %2745, %v357_v14   ;;  %v2573_v13 = vmul.f32 %v2941_v43, %v2572_v42 }
 0x545   :  { %v2397_v2 = vmul.f32 %v2365_v23, %v5029_v0  ;;  %v2398_v39 = vmul.f32 %v2366_v63, %v5030_v9 }
 0x546   :  { %v2574_v19 = vadd.f32 %v2941_v43, %v2573_v13 }
 0x547   :  { %2460 = vmatmul.f32.gmra.mxu3 %v2397_v2  ;;  %2525 = vmatmul.f32.gmra.mxu0 %v2398_v39 }
 0x548   :  { %v2576_v44 = vsel %vm2575_vm0, %v2941_v43, %v2574_v19 }
 0x54c   :  { %2628 = vperm.xlu1 %2745, %v358_v15  }
 0x554   :  { %2642 = vperm.xlu1 %2745, %v360_v33  }
 0x55c   :  { %2652 = vperm.xlu1 %2745, %v362_v5  }
 0x58c   :  { %v2505_v3 = vpop.f32.mrf.mxu0 }
 0x592   :  { %v2440_v37 = vpop.f32.mrf.mxu3 }
 0x593   :  { %v2506_v18 = vadd.f32 %v2505_v3, %v2440_v37 }
 0x594   :  { %v2508_v60 = vpop.f32.mrf.mxu0 }
 0x595   :  { %2537 = vxpose.xlu2.b32.cont [9/16] (narrow) %v2506_v18, 32 }
 0x59a   :  { %v2443_v50 = vpop.f32.mrf.mxu3 }
 0x59b   :  { %v2509_v30 = vadd.f32 %v2508_v60, %v2443_v50 }
 0x59c   :  { %v2511_v36 = vpop.f32.mrf.mxu0 }
 0x59d   :  { %2538 = vxpose.xlu2.b32.cont [10/16] (narrow) %v2509_v30, 32 }
 0x5a2   :  { %v2446_v10 = vpop.f32.mrf.mxu3  ;;  %v2619_v8 = vpop.permute.xlu1 %2618 }
 0x5a3   :  { %v2512_v16 = vadd.f32 %v2511_v36, %v2446_v10 }
 0x5a4   :  { %v2514_v29 = vpop.f32.mrf.mxu0  ;;  %v2614_v30 = vpop.permute.xlu0 %2613 }
 0x5a5   :  { %2539 = vxpose.xlu2.b32.cont [11/16] (narrow) %v2512_v16, 32 }
 0x5aa   :  { %v2449_v35 = vpop.f32.mrf.mxu3 }
 0x5ab   :  { %v2515_v24 = vadd.f32 %v2514_v29, %v2449_v35 }
 0x5ac   :  { %v2517_v22 = vpop.f32.mrf.mxu0  ;;  %v2638_v51 = vpop.permute.xlu0 %2637 }
 0x5ad   :  { %2540 = vxpose.xlu2.b32.cont [12/16] (narrow) %v2515_v24, 32 }
 0x5b2   :  { %v2452_v56 = vpop.f32.mrf.mxu3 }
 0x5b3   :  { %v2518_v4 = vadd.f32 %v2517_v22, %v2452_v56 }
 0x5b4   :  { %v2520_v49 = vpop.f32.mrf.mxu0 }
 0x5b5   :  { %2541 = vxpose.xlu2.b32.cont [13/16] (narrow) %v2518_v4, 32 }
 0x5b6   :  { %v2624_v37 = vpop.permute.xlu1 %2623 }
 0x5ba   :  { %v2455_v54 = vpop.f32.mrf.mxu3 }
 0x5bb   :  { %v2521_v12 = vadd.f32 %v2520_v49, %v2455_v54 }
 0x5bc   :  { %v2523_v11 = vpop.f32.mrf.mxu0 }
 0x5bd   :  { %2542 = vxpose.xlu2.b32.cont [14/16] (narrow) %v2521_v12, 32 }
 0x5be   :  { %v2629_v50 = vpop.permute.xlu1 %2628 }
 0x5c2   :  { %v2458_v45 = vpop.f32.mrf.mxu3 }
 0x5c3   :  { %v2524_v52 = vadd.f32 %v2523_v11, %v2458_v45 }
 0x5c4   :  { %v2526_v38 = vpop.f32.mrf.mxu0 }
 0x5c5   :  { %2543 = vxpose.xlu2.b32.cont [15/16] (narrow) %v2524_v52, 32 }
 0x5c6   :  { %v2643_v29 = vpop.permute.xlu1 %2642 }
 0x5ca   :  { %v2461_v48 = vpop.f32.mrf.mxu3 }
 0x5cb   :  { %v2527_v27 = vadd.f32 %v2526_v38, %v2461_v48 }
 0x5cd   :  { %2544 = vxpose.xlu2.b32.end [16/16] (narrow) %v2527_v27, 32 }
 0x5ce   :  { %v2653_v38 = vpop.permute.xlu1 %2652 }
 0x5ee   :  { %v2545_v31 = vpop.trf.xlu2 }
 0x5f6   :  { %v2546_v32 = vpop.trf.xlu2 }
 0x5f7   :  { %v2561_v47 = vadd.f32 %v2546_v32, %v2545_v31 }
 0x5fe   :  { %v2547_v61 = vpop.trf.xlu2 }
 0x5ff   :  { %v2562_v21 = vadd.f32 %v2561_v47, %v2547_v61 }
 0x606   :  { %v2548_v55 = vpop.trf.xlu2 }
 0x607   :  { %v2563_v17 = vadd.f32 %v2562_v21, %v2548_v55 }
 0x609   :  { %v2564_v62 = vrot.slane %v2563_v17, 4 }
 0x60b   :  { %v2565_v1 = vadd.f32 %v2564_v62, %v2563_v17 }
 0x60d   :  { %v2566_v7 = vrot.slane %v2565_v1, 2 }
 0x60f   :  { %v2567_v25 = vadd.f32 %v2566_v7, %v2565_v1 }
 0x611   :  { %v2568_v53 = vrot.slane %v2567_v25, 1 }
 0x613   :  { %v2569_v41 = vadd.f32 %v2568_v53, %v2567_v25 }
 0x615   :  { %v2577_v6 = vmul.f32 %v2576_v44, %v2569_v41 }
 0x617   :  { %v2578_v40 = vsub.f32 %v2545_v31, %v2577_v6  ;;  %v2579_v57 = vsub.f32 %v2546_v32, %v2577_v6  ;;  %v2580_v28 = vsub.f32 %v2547_v61, %v2577_v6  ;;  %v2581_v46 = vsub.f32 %v2548_v55, %v2577_v6  ;;  %v2648_v32 = vpop.permute.xlu0 %2647 }
 0x619   :  { %v2582_v23 = vmul.f32 %v2578_v40, %v2578_v40  ;;  %v2583_v63 = vmul.f32 %v2579_v57, %v2579_v57  ;;  %v2584_v0 = vmul.f32 %v2580_v28, %v2580_v28  ;;  %v2585_v9 = vmul.f32 %v2581_v46, %v2581_v46 }
 0x61b   :  { %v2586_v2 = vadd.f32 %v2583_v63, %v2582_v23 }
 0x61d   :  { %v2587_v39 = vadd.f32 %v2586_v2, %v2584_v0 }
 0x61f   :  { %v2588_v20 = vadd.f32 %v2587_v39, %v2585_v9 }
 0x621   :  { %v2589_v14 = vrot.slane %v2588_v20, 4 }
 0x623   :  { %v2590_v15 = vadd.f32 %v2589_v14, %v2588_v20 }
 0x625   :  { %v2591_v3 = vrot.slane %v2590_v15, 2 }
 0x627   :  { %v2592_v33 = vadd.f32 %v2591_v3, %v2590_v15 }
 0x629   :  { %v2593_v18 = vrot.slane %v2592_v33, 1 }
 0x62b   :  { %v2594_v60 = vadd.f32 %v2593_v18, %v2592_v33 }
 0x62d   :  { %v2595_v59 = vmul.f32 %v2594_v60, %v2576_v44 }
 0x62f   :  { %v2596_v5 = vadd.f32 1e-05, %v2595_v59 }
 0x631   :  { %2942 = vrsqrt.f32 %v2596_v5  ;;  %vm2603_vm2 = vweird.f32 %v2596_v5 }
 0x637   :  { %v2943_v36 = vpop.eup %2942 }
 0x638   :  { %v2598_v34 = vmul.f32 %v2943_v36, %v2596_v5  ;;  %vm2604_vm1 = vweird.f32 %v2943_v36 }
 0x639   :  { %vm2605_vm3 = vmor %vm2603_vm2, %vm2604_vm1 }
 0x63a   :  { %v2599_v10 = vmul.f32 %v2943_v36, %v2598_v34 }
 0x63c   :  { %v2600_v16 = vmul.f32 0.5, %v2599_v10 }
 0x63e   :  { %v2601_v35 = vsub.f32 1.5, %v2600_v16 }
 0x640   :  { %v2602_v24 = vmul.f32 %v2943_v36, %v2601_v35 }
 0x642   :  { %v2606_v22 = vsel %vm2605_vm3, %v2943_v36, %v2602_v24 }
 0x643   :  { %v2609_v56 = vmul.f32 %v2606_v22, %v2580_v28  ;;  %v2610_v4 = vmul.f32 %v2606_v22, %v2581_v46  ;;  %v2608_v49 = vmul.f32 %v2606_v22, %v2579_v57  ;;  %v2607_v54 = vmul.f32 %v2606_v22, %v2578_v40 }
 0x645   :  { %v2633_v12 = vmul.f32 %v2624_v37, %v2609_v56  ;;  %v2634_v11 = vmul.f32 %v2629_v50, %v2610_v4  ;;  %v2632_v45 = vmul.f32 %v2619_v8, %v2608_v49  ;;  %v2631_v52 = vmul.f32 %v2614_v30, %v2607_v54 }
 0x647   :  { %v2656_v48 = vadd.f32 %v2643_v29, %v2632_v45  ;;  %v2658_v27 = vadd.f32 %v2653_v38, %v2634_v11  ;;  %v2655_v31 = vadd.f32 %v2638_v51, %v2631_v52  ;;  %v2657_v58 = vadd.f32 %v2648_v32, %v2633_v12 }
 0x649   :  { %2660 = vst [vmem:[#allocation11 + $0x8] sm:$0xff] %v2656_v48 }
 0x64a   :  { %2662 = vst [vmem:[#allocation11 + $0x18] sm:$0xff] %v2658_v27 }
 0x64b   :  { %2659 = vst [vmem:[#allocation11] sm:$0xff] %v2655_v31 }
 0x64c   :  { %2661 = vst [vmem:[#allocation11 + $0x10] sm:$0xff] %v2657_v58 }
 0x64d   :  { %2675 = dma.vmem_to_hbm [thread:$0]  %s2668_s18, 512, %s2670_s6, [#allocation4], %s3097_s21, %s3097_s21, %s3098_s22  }
 0x64e   :  { %3094 = dma.done.wait [#allocation4], 512  }
 0x64f   :  { %3095 = vsyncadd [#allocation4], 4294966784 }
 0x650   :  { %2680 = vsyncpa [#allocation3], 1 }
 0x651   :  { %2681 = vsyncpa [#allocation6], 1 }
 0x652   :  { %2682 = vsyncpa [#allocation9], 1 }
 0x653   :  { %2683 = vsyncpa [#allocation4], 1 }

</bundles_post_ra>
